<compile_context>
chip_gen: v7x
topology: tpu7x:2x2x1
jax: 0.10.0
libtpu: 0.0.40
codegen_flags: <defaults>
</compile_context>

<pallas_src>
import jax
import jax.numpy as jnp
from jax import lax
from jax.experimental import pallas as pl
from jax.experimental.pallas import tpu as pltpu

EPS = 1e-5  # PyTorch BatchNorm2d default eps


# ---------------------------------------------------------------- helpers ---
def _vmem_cap_bytes():
    """Generation-aware VMEM cap: half of physical VMEM (64 MiB on v5e/v6e,
    32 MiB on v7x), with a safe default when the query is unavailable."""
    try:
        return int(pltpu.get_tpu_info().vmem_capacity_bytes) // 2
    except Exception:
        return 64 << 20


def _divisors_desc(x):
    return [d for d in range(x, 0, -1) if x % d == 0]


# ---------------------------------------------------------------- kernels ---
def _make_conv_stats_kernel(k, th, wd, cin, cout):
    """Conv(kxk, SAME, stride 1) + bias + ReLU on a th-row tile.

    The k width taps and cin are folded into one contraction of depth k*cin,
    so the conv is k accumulated bf16 MXU matmuls with f32 accumulation.
    Emits the bf16 activation tile plus per-channel f32 sum / sum-of-squares
    (BatchNorm training statistics, reduced exactly over all N*H*W outside)."""

    def kernel(x_ref, w_ref, b_ref, y_ref, st_ref):
        xwin = x_ref[0]                                   # (th+2p, wd+2p, cin) bf16
        acc = jnp.zeros((th * wd, cout), jnp.float32)
        for dy in range(k):                               # unrolled at trace time
            # One per-dy LHS: the k width-shifted views concatenated on channels.
            lhs = jnp.concatenate(
                [xwin[dy:dy + th, dx:dx + wd, :] for dx in range(k)], axis=-1)
            acc = acc + jnp.dot(lhs.reshape(th * wd, k * cin), w_ref[dy],
                                preferred_element_type=jnp.float32)
        y = jnp.maximum(acc + b_ref[...], 0.0)            # bias + ReLU, f32
        y_ref[...] = y.astype(y_ref.dtype)                # bf16 activation tile
        st_ref[0] = jnp.concatenate(
            [jnp.sum(y, axis=0, keepdims=True),
             jnp.sum(y * y, axis=0, keepdims=True)], axis=0)   # (2, cout) f32

    return kernel


def _make_bn_pool_kernel(cout, wo):
    """Hoisted-affine BatchNorm (one FMA/elem) fused with the 2x2 max-pool.
    Input block is a metadata-only (rows, 2, Wo, 2*C) view of the bf16
    activations; output is a lane-dense (rows, Wo*C) slab."""

    def kernel(y_ref, sc_ref, sh_ref, o_ref):
        t = y_ref[...].astype(jnp.float32)                # (ph, 2, wo, 2*cout)
        sc, sh = sc_ref[...], sh_ref[...]                 # (1, cout) each
        a = t[..., :cout] * sc + sh                       # even output columns
        b = t[..., cout:] * sc + sh                       # odd output columns
        m = jnp.maximum(a, b)                             # (ph, 2, wo, cout)
        r = jnp.maximum(m[:, 0], m[:, 1])                 # (ph, wo, cout)
        o_ref[...] = r.reshape(r.shape[0], wo * cout).astype(o_ref.dtype)

    return kernel


# ------------------------------------------------------------------- layer ---
def conv_relu_bn_pool(x, w, b, gamma, beta, out_dtype):
    """Conv2d(k, pad=k//2, stride 1) + ReLU + BatchNorm2d(train) + MaxPool2d(2)."""
    n, h, wd, cin = x.shape
    k, _, _, cout = w.shape
    p = k // 2
    wp = wd + 2 * p
    assert h % 2 == 0 and wd % 2 == 0, "MaxPool2d(2,2) needs even spatial dims"
    m = n * h * wd
    cap = _vmem_cap_bytes()
    budget = cap // 2                                  # headroom for dbl-buffering

    # ---------------- pass 1: conv + bias + ReLU + BN sum/sumsq --------------
    w_bytes = k * k * cin * cout * 2 + cout * 4

    def p1_bytes(t):
        x_blk = (t + 2 * p) * wp * cin * 2             # bf16 haloed input window
        y_blk = t * wd * cout * 2                      # bf16 activation tile
        tmp = t * wd * (k * cin * 2 + 2 * cout * 4)    # lhs + f32 acc / epilogue
        return 2 * (x_blk + y_blk) + 2 * w_bytes + tmp

    aligned = [d for d in _divisors_desc(h) if (d * wd) % 8 == 0]
    fitting = [d for d in aligned if p1_bytes(d) <= budget]
    th = fitting[0] if fitting else (aligned[-1] if aligned else h)
    nt = h // th

    xpad = jnp.pad(x, ((0, 0), (p, p), (p, p), (0, 0))).astype(jnp.bfloat16)
    wmat = w.reshape(k, k * cin, cout).astype(jnp.bfloat16)
    b2 = b.reshape(1, cout).astype(jnp.float32)

    if nt == 1:
        # whole padded image per step: plain blocked window, no halo duplication.
        x_spec = pl.BlockSpec((1, h + 2 * p, wp, cin), lambda bi, j: (bi, 0, 0, 0))
    else:
        # overlapping haloed row windows read directly from the padded input via
        # element-offset indexing -- no XLA-side halo stack / extra HBM round trip.
        x_spec = pl.BlockSpec((1, pl.Element(th + 2 * p), wp, cin),
                              lambda bi, j: (bi, j * th, 0, 0))

    vmem1 = int(min(max(32 << 20, 2 * p1_bytes(th)), cap))

    y, st = pl.pallas_call(
        _make_conv_stats_kernel(k, th, wd, cin, cout),
        grid=(n, nt),
        in_specs=[
            x_spec,
            pl.BlockSpec((k, k * cin, cout), lambda bi, j: (0, 0, 0)),   # resident
            pl.BlockSpec((1, cout), lambda bi, j: (0, 0)),
        ],
        out_specs=[
            pl.BlockSpec((th * wd, cout), lambda bi, j: (bi * nt + j, 0)),
            pl.BlockSpec((1, 2, cout), lambda bi, j: (bi * nt + j, 0, 0)),
        ],
        out_shape=(
            jax.ShapeDtypeStruct((m, cout), jnp.bfloat16),
            jax.ShapeDtypeStruct((n * nt, 2, cout), jnp.float32),
        ),
        compiler_params=pltpu.CompilerParams(
            dimension_semantics=("parallel", "arbitrary"),
            vmem_limit_bytes=vmem1),
        cost_estimate=pl.CostEstimate(
            flops=int(2 * m * k * k * cin * cout + 4 * m * cout),
            transcendentals=0,
            bytes_accessed=int(xpad.size * 2 + wmat.size * 2 + cout * 4
                               + m * cout * 2 + n * nt * 2 * cout * 4)),
    )(xpad, wmat, b2)

    # ------------- exact global BatchNorm statistics (training mode) ---------
    mean = jnp.sum(st[:, 0, :], axis=0) / m
    ex2 = jnp.sum(st[:, 1, :], axis=0) / m
    var = jnp.maximum(ex2 - mean * mean, 0.0)
    scale = (gamma * lax.rsqrt(var + EPS)).astype(jnp.float32)
    shift = (beta - mean * scale).astype(jnp.float32)
    sc2 = scale.reshape(1, cout)
    sh2 = shift.reshape(1, cout)

    # ---------------- pass 2: normalize + fused 2x2 max-pool -----------------
    ho, wo = h // 2, wd // 2
    rows = n * ho
    out_bytes = jnp.dtype(out_dtype).itemsize
    # Metadata-only pooling view: partners on a small axis / the lane halves.
    y4 = y.reshape(rows, 2, wo, 2 * cout)

    def p2_bytes(t):
        in_blk = t * 2 * wo * 2 * cout * 2
        out_blk = t * wo * cout * out_bytes
        tmp = t * 2 * wo * 2 * cout * 4 * 2
        return 2 * (in_blk + out_blk) + tmp

    cands = [d for d in _divisors_desc(rows) if d % 8 == 0 or d == rows]
    fit2 = [d for d in cands if p2_bytes(d) <= budget]
    multi = [d for d in fit2 if rows // d >= 2]          # >=2 steps for megacore
    ph = multi[0] if multi else (fit2[0] if fit2 else cands[-1])
    vmem2 = int(min(max(32 << 20, 2 * p2_bytes(ph)), cap))

    out_flat = pl.pallas_call(
        _make_bn_pool_kernel(cout, wo),
        grid=(rows // ph,),
        in_specs=[
            pl.BlockSpec((ph, 2, wo, 2 * cout), lambda i: (i, 0, 0, 0)),
            pl.BlockSpec((1, cout), lambda i: (0, 0)),
            pl.BlockSpec((1, cout), lambda i: (0, 0)),
        ],
        out_specs=pl.BlockSpec((ph, wo * cout), lambda i: (i, 0)),
        out_shape=jax.ShapeDtypeStruct((rows, wo * cout), out_dtype),
        compiler_params=pltpu.CompilerParams(
            dimension_semantics=("parallel",), vmem_limit_bytes=vmem2),
        cost_estimate=pl.CostEstimate(
            flops=int(5 * m * cout), transcendentals=0,
            bytes_accessed=int(m * cout * 2 + rows * wo * cout * out_bytes
                               + 2 * cout * 4)),
    )(y4, sc2, sh2)
    return out_flat.reshape(n, ho, wo, cout)


# ---------------------------------------------------------------- forward ---
def fully_cnn_forward(x_nchw, params):
    """(N, C, H, W) -> (N, 256, H/8, W/8), matching FullyCnn.forward (train mode)."""
    x = jnp.transpose(x_nchw, (0, 2, 3, 1)).astype(jnp.float32)   # -> NHWC
    last = len(params) - 1
    for i, (w, b, gamma, beta) in enumerate(params):
        out_dtype = jnp.float32 if i == last else jnp.bfloat16
        x = conv_relu_bn_pool(x, w, b, gamma, beta, out_dtype)
    return jnp.transpose(x, (0, 3, 1, 2)).astype(jnp.float32)     # -> NCHW


# ------------------------------------------------------------------ params ---
def init_params(key, input_channels=3):
    specs = [(input_channels, 64, 5), (64, 128, 5), (128, 256, 3)]
    params = []
    for i, (cin, cout, k) in enumerate(specs):
        kw_key, kb_key = jax.random.split(jax.random.fold_in(key, i))
        bound = 1.0 / (cin * k * k) ** 0.5       # PyTorch Conv2d default init bound
        w = jax.random.uniform(kw_key, (k, k, cin, cout), jnp.float32, -bound, bound)
        b = jax.random.uniform(kb_key, (cout,), jnp.float32, -bound, bound)
        gamma = jnp.ones((cout,), jnp.float32)   # BatchNorm2d default affine init
        beta = jnp.zeros((cout,), jnp.float32)
        params.append((w, b, gamma, beta))
    return params


# --------------------------------------------------------------- reference ---
def reference_forward(x_nchw, params):
    """Pure-XLA reference mirroring the kernel's precision policy (bf16 conv
    inputs with f32 accumulation, bf16 pre-BN / inter-layer activations) so the
    comparison is not dominated by BatchNorm amplifying unmatched rounding."""
    x = jnp.transpose(x_nchw, (0, 2, 3, 1)).astype(jnp.float32)
    last = len(params) - 1
    for i, (w, b, gamma, beta) in enumerate(params):
        y = lax.conv_general_dilated(
            x.astype(jnp.bfloat16), w.astype(jnp.bfloat16), (1, 1), "SAME",
            dimension_numbers=("NHWC", "HWIO", "NHWC"),
            preferred_element_type=jnp.float32)
        y = jnp.maximum(y + b, 0.0)
        mean = jnp.mean(y, axis=(0, 1, 2), keepdims=True)
        var = jnp.mean(jnp.square(y - mean), axis=(0, 1, 2), keepdims=True)
        yq = y.astype(jnp.bfloat16).astype(jnp.float32)   # mirrors bf16 y stream
        z = (yq - mean) * lax.rsqrt(var + EPS) * gamma + beta
        z = lax.reduce_window(z, -jnp.inf, lax.max,
                              (1, 2, 2, 1), (1, 2, 2, 1), "VALID")
        x = z if i == last else z.astype(jnp.bfloat16).astype(jnp.float32)
    return jnp.transpose(x, (0, 3, 1, 2))


if __name__ == "__main__":
    key = jax.random.PRNGKey(0)
    pkey, xkey = jax.random.split(key)
    params = init_params(pkey, input_channels=3)
    x = jax.random.normal(xkey, (2, 3, 16, 16), jnp.float32)   # NCHW like PyTorch

    fwd = jax.jit(fully_cnn_forward)
    out = jax.block_until_ready(fwd(x, params))
    ref = jax.block_until_ready(reference_forward(x, params))

    assert out.shape == (2, 256, 2, 2), out.shape
    err = jnp.abs(out - ref)
    # BatchNorm divides by the per-channel std; at these tiny spatial sizes a
    # few channels have small variance, so even matched bf16 rounding can be
    # locally amplified.  A real logic bug produces O(1) mean error, so these
    # bounds remain discriminative.
    assert float(jnp.mean(err)) < 1e-2, float(jnp.mean(err))
    assert float(jnp.max(err)) < 2.5e-1, float(jnp.max(err))
    print("KERNEL_OK")
</pallas_src>

<mosaic_0001>
module attributes {stable_mosaic.version = 11 : i64} {
  func.func @kernel(%arg0: i32, %arg1: i32, %arg2: memref<1x20x20x3xbf16, #tpu.memory_space<vmem>>, %arg3: memref<5x15x64xbf16, #tpu.memory_space<vmem>>, %arg4: memref<1x64xf32, #tpu.memory_space<vmem>>, %arg5: memref<256x64xbf16, #tpu.memory_space<vmem>>, %arg6: memref<1x2x64xf32, #tpu.memory_space<vmem>>) attributes {dimension_semantics = [#tpu.dimension_semantics<parallel>, #tpu.dimension_semantics<arbitrary>], iteration_bounds = array<i64: 2, 1>, scalar_prefetch = 0 : i64, scratch_operands = 0 : i64, tpu.core_type = #tpu.core_type<tc>, window_params = [{transform_indices = @transform_0, window_bounds = array<i64: 1, 20, 20, 3>}, {pipeline_mode = #tpu.pipeline_mode<synchronous>, transform_indices = @transform_1, window_bounds = array<i64: 5, 15, 64>}, {pipeline_mode = #tpu.pipeline_mode<synchronous>, transform_indices = @transform_2, window_bounds = array<i64: 1, 64>}, {transform_indices = @transform_3, window_bounds = array<i64: 256, 64>}, {transform_indices = @transform_4, window_bounds = array<i64: 1, 2, 64>}]} {
    %c0 = arith.constant 0 : index
    %c0_0 = arith.constant 0 : index
    %c0_1 = arith.constant 0 : index
    %c0_2 = arith.constant 0 : index
    %0 = vector.load %arg2[%c0, %c0_0, %c0_1, %c0_2] : memref<1x20x20x3xbf16, #tpu.memory_space<vmem>>, vector<1x20x20x3xbf16>
    %1 = vector.shape_cast %0 : vector<1x20x20x3xbf16> to vector<20x20x3xbf16>
    %cst = arith.constant 0.000000e+00 : f32
    %2 = vector.broadcast %cst : f32 to vector<256x64xf32>
    %3 = vector.extract_strided_slice %1 {offsets = [0, 0, 0], sizes = [16, 16, 3], strides = [1, 1, 1]} : vector<20x20x3xbf16> to vector<16x16x3xbf16>
    %4 = vector.extract_strided_slice %1 {offsets = [0, 1, 0], sizes = [16, 16, 3], strides = [1, 1, 1]} : vector<20x20x3xbf16> to vector<16x16x3xbf16>
    %5 = vector.extract_strided_slice %1 {offsets = [0, 2, 0], sizes = [16, 16, 3], strides = [1, 1, 1]} : vector<20x20x3xbf16> to vector<16x16x3xbf16>
    %6 = vector.extract_strided_slice %1 {offsets = [0, 3, 0], sizes = [16, 16, 3], strides = [1, 1, 1]} : vector<20x20x3xbf16> to vector<16x16x3xbf16>
    %7 = vector.extract_strided_slice %1 {offsets = [0, 4, 0], sizes = [16, 16, 3], strides = [1, 1, 1]} : vector<20x20x3xbf16> to vector<16x16x3xbf16>
    %8 = tpu.concatenate %3, %4, %5, %6, %7 in 2 : vector<16x16x3xbf16>, vector<16x16x3xbf16>, vector<16x16x3xbf16>, vector<16x16x3xbf16>, vector<16x16x3xbf16> -> vector<16x16x15xbf16>
    %9 = vector.shape_cast %8 : vector<16x16x15xbf16> to vector<256x15xbf16>
    %c0_3 = arith.constant 0 : index
    %c0_4 = arith.constant 0 : index
    %c0_5 = arith.constant 0 : index
    %10 = vector.load %arg3[%c0_3, %c0_4, %c0_5] : memref<5x15x64xbf16, #tpu.memory_space<vmem>>, vector<1x15x64xbf16>
    %11 = vector.shape_cast %10 : vector<1x15x64xbf16> to vector<15x64xbf16>
    %cst_6 = arith.constant dense<0.000000e+00> : vector<256x64xf32>
    %12 = tpu.matmul %9, %11, %cst_6 {dimension_numbers = #tpu.dot_dimension_numbers<[1], [0], [0], [1], [0, 0, 1, 1], [], []>} : vector<256x15xbf16>, vector<15x64xbf16>, vector<256x64xf32> -> vector<256x64xf32>
    %13 = arith.addf %2, %12 : vector<256x64xf32>
    %14 = vector.extract_strided_slice %1 {offsets = [1, 0, 0], sizes = [16, 16, 3], strides = [1, 1, 1]} : vector<20x20x3xbf16> to vector<16x16x3xbf16>
    %15 = vector.extract_strided_slice %1 {offsets = [1, 1, 0], sizes = [16, 16, 3], strides = [1, 1, 1]} : vector<20x20x3xbf16> to vector<16x16x3xbf16>
    %16 = vector.extract_strided_slice %1 {offsets = [1, 2, 0], sizes = [16, 16, 3], strides = [1, 1, 1]} : vector<20x20x3xbf16> to vector<16x16x3xbf16>
    %17 = vector.extract_strided_slice %1 {offsets = [1, 3, 0], sizes = [16, 16, 3], strides = [1, 1, 1]} : vector<20x20x3xbf16> to vector<16x16x3xbf16>
    %18 = vector.extract_strided_slice %1 {offsets = [1, 4, 0], sizes = [16, 16, 3], strides = [1, 1, 1]} : vector<20x20x3xbf16> to vector<16x16x3xbf16>
    %19 = tpu.concatenate %14, %15, %16, %17, %18 in 2 : vector<16x16x3xbf16>, vector<16x16x3xbf16>, vector<16x16x3xbf16>, vector<16x16x3xbf16>, vector<16x16x3xbf16> -> vector<16x16x15xbf16>
    %20 = vector.shape_cast %19 : vector<16x16x15xbf16> to vector<256x15xbf16>
    %c1 = arith.constant 1 : index
    %c0_7 = arith.constant 0 : index
    %c0_8 = arith.constant 0 : index
    %21 = vector.load %arg3[%c1, %c0_7, %c0_8] : memref<5x15x64xbf16, #tpu.memory_space<vmem>>, vector<1x15x64xbf16>
    %22 = vector.shape_cast %21 : vector<1x15x64xbf16> to vector<15x64xbf16>
    %cst_9 = arith.constant dense<0.000000e+00> : vector<256x64xf32>
    %23 = tpu.matmul %20, %22, %cst_9 {dimension_numbers = #tpu.dot_dimension_numbers<[1], [0], [0], [1], [0, 0, 1, 1], [], []>} : vector<256x15xbf16>, vector<15x64xbf16>, vector<256x64xf32> -> vector<256x64xf32>
    %24 = arith.addf %13, %23 : vector<256x64xf32>
    %25 = vector.extract_strided_slice %1 {offsets = [2, 0, 0], sizes = [16, 16, 3], strides = [1, 1, 1]} : vector<20x20x3xbf16> to vector<16x16x3xbf16>
    %26 = vector.extract_strided_slice %1 {offsets = [2, 1, 0], sizes = [16, 16, 3], strides = [1, 1, 1]} : vector<20x20x3xbf16> to vector<16x16x3xbf16>
    %27 = vector.extract_strided_slice %1 {offsets = [2, 2, 0], sizes = [16, 16, 3], strides = [1, 1, 1]} : vector<20x20x3xbf16> to vector<16x16x3xbf16>
    %28 = vector.extract_strided_slice %1 {offsets = [2, 3, 0], sizes = [16, 16, 3], strides = [1, 1, 1]} : vector<20x20x3xbf16> to vector<16x16x3xbf16>
    %29 = vector.extract_strided_slice %1 {offsets = [2, 4, 0], sizes = [16, 16, 3], strides = [1, 1, 1]} : vector<20x20x3xbf16> to vector<16x16x3xbf16>
    %30 = tpu.concatenate %25, %26, %27, %28, %29 in 2 : vector<16x16x3xbf16>, vector<16x16x3xbf16>, vector<16x16x3xbf16>, vector<16x16x3xbf16>, vector<16x16x3xbf16> -> vector<16x16x15xbf16>
    %31 = vector.shape_cast %30 : vector<16x16x15xbf16> to vector<256x15xbf16>
    %c2 = arith.constant 2 : index
    %c0_10 = arith.constant 0 : index
    %c0_11 = arith.constant 0 : index
    %32 = vector.load %arg3[%c2, %c0_10, %c0_11] : memref<5x15x64xbf16, #tpu.memory_space<vmem>>, vector<1x15x64xbf16>
    %33 = vector.shape_cast %32 : vector<1x15x64xbf16> to vector<15x64xbf16>
    %cst_12 = arith.constant dense<0.000000e+00> : vector<256x64xf32>
    %34 = tpu.matmul %31, %33, %cst_12 {dimension_numbers = #tpu.dot_dimension_numbers<[1], [0], [0], [1], [0, 0, 1, 1], [], []>} : vector<256x15xbf16>, vector<15x64xbf16>, vector<256x64xf32> -> vector<256x64xf32>
    %35 = arith.addf %24, %34 : vector<256x64xf32>
    %36 = vector.extract_strided_slice %1 {offsets = [3, 0, 0], sizes = [16, 16, 3], strides = [1, 1, 1]} : vector<20x20x3xbf16> to vector<16x16x3xbf16>
    %37 = vector.extract_strided_slice %1 {offsets = [3, 1, 0], sizes = [16, 16, 3], strides = [1, 1, 1]} : vector<20x20x3xbf16> to vector<16x16x3xbf16>
    %38 = vector.extract_strided_slice %1 {offsets = [3, 2, 0], sizes = [16, 16, 3], strides = [1, 1, 1]} : vector<20x20x3xbf16> to vector<16x16x3xbf16>
    %39 = vector.extract_strided_slice %1 {offsets = [3, 3, 0], sizes = [16, 16, 3], strides = [1, 1, 1]} : vector<20x20x3xbf16> to vector<16x16x3xbf16>
    %40 = vector.extract_strided_slice %1 {offsets = [3, 4, 0], sizes = [16, 16, 3], strides = [1, 1, 1]} : vector<20x20x3xbf16> to vector<16x16x3xbf16>
    %41 = tpu.concatenate %36, %37, %38, %39, %40 in 2 : vector<16x16x3xbf16>, vector<16x16x3xbf16>, vector<16x16x3xbf16>, vector<16x16x3xbf16>, vector<16x16x3xbf16> -> vector<16x16x15xbf16>
    %42 = vector.shape_cast %41 : vector<16x16x15xbf16> to vector<256x15xbf16>
    %c3 = arith.constant 3 : index
    %c0_13 = arith.constant 0 : index
    %c0_14 = arith.constant 0 : index
    %43 = vector.load %arg3[%c3, %c0_13, %c0_14] : memref<5x15x64xbf16, #tpu.memory_space<vmem>>, vector<1x15x64xbf16>
    %44 = vector.shape_cast %43 : vector<1x15x64xbf16> to vector<15x64xbf16>
    %cst_15 = arith.constant dense<0.000000e+00> : vector<256x64xf32>
    %45 = tpu.matmul %42, %44, %cst_15 {dimension_numbers = #tpu.dot_dimension_numbers<[1], [0], [0], [1], [0, 0, 1, 1], [], []>} : vector<256x15xbf16>, vector<15x64xbf16>, vector<256x64xf32> -> vector<256x64xf32>
    %46 = arith.addf %35, %45 : vector<256x64xf32>
    %47 = vector.extract_strided_slice %1 {offsets = [4, 0, 0], sizes = [16, 16, 3], strides = [1, 1, 1]} : vector<20x20x3xbf16> to vector<16x16x3xbf16>
    %48 = vector.extract_strided_slice %1 {offsets = [4, 1, 0], sizes = [16, 16, 3], strides = [1, 1, 1]} : vector<20x20x3xbf16> to vector<16x16x3xbf16>
    %49 = vector.extract_strided_slice %1 {offsets = [4, 2, 0], sizes = [16, 16, 3], strides = [1, 1, 1]} : vector<20x20x3xbf16> to vector<16x16x3xbf16>
    %50 = vector.extract_strided_slice %1 {offsets = [4, 3, 0], sizes = [16, 16, 3], strides = [1, 1, 1]} : vector<20x20x3xbf16> to vector<16x16x3xbf16>
    %51 = vector.extract_strided_slice %1 {offsets = [4, 4, 0], sizes = [16, 16, 3], strides = [1, 1, 1]} : vector<20x20x3xbf16> to vector<16x16x3xbf16>
    %52 = tpu.concatenate %47, %48, %49, %50, %51 in 2 : vector<16x16x3xbf16>, vector<16x16x3xbf16>, vector<16x16x3xbf16>, vector<16x16x3xbf16>, vector<16x16x3xbf16> -> vector<16x16x15xbf16>
    %53 = vector.shape_cast %52 : vector<16x16x15xbf16> to vector<256x15xbf16>
    %c4 = arith.constant 4 : index
    %c0_16 = arith.constant 0 : index
    %c0_17 = arith.constant 0 : index
    %54 = vector.load %arg3[%c4, %c0_16, %c0_17] : memref<5x15x64xbf16, #tpu.memory_space<vmem>>, vector<1x15x64xbf16>
    %55 = vector.shape_cast %54 : vector<1x15x64xbf16> to vector<15x64xbf16>
    %cst_18 = arith.constant dense<0.000000e+00> : vector<256x64xf32>
    %56 = tpu.matmul %53, %55, %cst_18 {dimension_numbers = #tpu.dot_dimension_numbers<[1], [0], [0], [1], [0, 0, 1, 1], [], []>} : vector<256x15xbf16>, vector<15x64xbf16>, vector<256x64xf32> -> vector<256x64xf32>
    %57 = arith.addf %46, %56 : vector<256x64xf32>
    %c0_19 = arith.constant 0 : index
    %c0_20 = arith.constant 0 : index
    %58 = vector.load %arg4[%c0_19, %c0_20] : memref<1x64xf32, #tpu.memory_space<vmem>>, vector<1x64xf32>
    %59 = vector.broadcast %58 : vector<1x64xf32> to vector<256x64xf32>
    %60 = arith.addf %57, %59 : vector<256x64xf32>
    %cst_21 = arith.constant 0.000000e+00 : f32
    %61 = vector.broadcast %cst_21 : f32 to vector<256x64xf32>
    %62 = arith.maximumf %60, %61 : vector<256x64xf32>
    %63 = arith.truncf %62 : vector<256x64xf32> to vector<256x64xbf16>
    %c0_22 = arith.constant 0 : index
    %c0_23 = arith.constant 0 : index
    %64 = vector.load %arg5[%c0_22, %c0_23] : memref<256x64xbf16, #tpu.memory_space<vmem>>, vector<256x64xbf16>
    tpu.vector_store %arg5[%c0_22, %c0_23], %63 {strides = array<i32>} : memref<256x64xbf16, #tpu.memory_space<vmem>>, vector<256x64xbf16>,
    %cst_24 = arith.constant dense<0.000000e+00> : vector<64xf32>
    %65 = vector.multi_reduction <add>, %62, %cst_24 [0] : vector<256x64xf32> to vector<64xf32>
    %66 = vector.shape_cast %65 : vector<64xf32> to vector<1x64xf32>
    %67 = arith.mulf %62, %62 : vector<256x64xf32>
    %cst_25 = arith.constant dense<0.000000e+00> : vector<64xf32>
    %68 = vector.multi_reduction <add>, %67, %cst_25 [0] : vector<256x64xf32> to vector<64xf32>
    %69 = vector.shape_cast %68 : vector<64xf32> to vector<1x64xf32>
    %70 = tpu.concatenate %66, %69 in 0 : vector<1x64xf32>, vector<1x64xf32> -> vector<2x64xf32>
    %c0_26 = arith.constant 0 : index
    %c0_27 = arith.constant 0 : index
    %c0_28 = arith.constant 0 : index
    %71 = vector.load %arg6[%c0_26, %c0_27, %c0_28] : memref<1x2x64xf32, #tpu.memory_space<vmem>>, vector<1x2x64xf32>
    %72 = vector.shape_cast %71 : vector<1x2x64xf32> to vector<2x64xf32>
    %73 = vector.shape_cast %70 : vector<2x64xf32> to vector<1x2x64xf32>
    tpu.vector_store %arg6[%c0_26, %c0_27, %c0_28], %73 {strides = array<i32>} : memref<1x2x64xf32, #tpu.memory_space<vmem>>, vector<1x2x64xf32>,
    return
  }
  func.func @transform_0(%arg0: i32, %arg1: i32) -> (i32, i32, i32, i32) {
    %c0_i32 = arith.constant 0 : i32
    %c0_i32_0 = arith.constant 0 : i32
    %c0_i32_1 = arith.constant 0 : i32
    %c0_i32_2 = arith.constant 0 : i32
    return %arg0, %c0_i32, %c0_i32_0, %c0_i32_1 : i32, i32, i32, i32
  }
  func.func @transform_1(%arg0: i32, %arg1: i32) -> (i32, i32, i32) {
    %c0_i32 = arith.constant 0 : i32
    %c0_i32_0 = arith.constant 0 : i32
    %c0_i32_1 = arith.constant 0 : i32
    %c0_i32_2 = arith.constant 0 : i32
    return %c0_i32, %c0_i32_0, %c0_i32_1 : i32, i32, i32
  }
  func.func @transform_2(%arg0: i32, %arg1: i32) -> (i32, i32) {
    %c0_i32 = arith.constant 0 : i32
    %c0_i32_0 = arith.constant 0 : i32
    %c0_i32_1 = arith.constant 0 : i32
    return %c0_i32, %c0_i32_0 : i32, i32
  }
  func.func @transform_3(%arg0: i32, %arg1: i32) -> (i32, i32) {
    %c1_i32 = arith.constant 1 : i32
    %0 = arith.muli %arg0, %c1_i32 : i32
    %1 = arith.addi %0, %arg1 : i32
    %c0_i32 = arith.constant 0 : i32
    %c0_i32_0 = arith.constant 0 : i32
    return %1, %c0_i32 : i32, i32
  }
  func.func @transform_4(%arg0: i32, %arg1: i32) -> (i32, i32, i32) {
    %c1_i32 = arith.constant 1 : i32
    %0 = arith.muli %arg0, %c1_i32 : i32
    %1 = arith.addi %0, %arg1 : i32
    %c0_i32 = arith.constant 0 : i32
    %c0_i32_0 = arith.constant 0 : i32
    %c0_i32_1 = arith.constant 0 : i32
    return %1, %c0_i32, %c0_i32_0 : i32, i32, i32
  }
}

module attributes {stable_mosaic.version = 11 : i64} {
  func.func @kernel(%arg0: i32, %arg1: memref<8x2x8x128xbf16, #tpu.memory_space<vmem>>, %arg2: memref<1x64xf32, #tpu.memory_space<vmem>>, %arg3: memref<1x64xf32, #tpu.memory_space<vmem>>, %arg4: memref<8x512xbf16, #tpu.memory_space<vmem>>) attributes {dimension_semantics = [#tpu.dimension_semantics<parallel>], iteration_bounds = array<i64: 2>, scalar_prefetch = 0 : i64, scratch_operands = 0 : i64, tpu.core_type = #tpu.core_type<tc>, window_params = [{transform_indices = @transform_0, window_bounds = array<i64: 8, 2, 8, 128>}, {pipeline_mode = #tpu.pipeline_mode<synchronous>, transform_indices = @transform_1, window_bounds = array<i64: 1, 64>}, {pipeline_mode = #tpu.pipeline_mode<synchronous>, transform_indices = @transform_2, window_bounds = array<i64: 1, 64>}, {transform_indices = @transform_3, window_bounds = array<i64: 8, 512>}]} {
    %c0 = arith.constant 0 : index
    %c0_0 = arith.constant 0 : index
    %c0_1 = arith.constant 0 : index
    %c0_2 = arith.constant 0 : index
    %0 = vector.load %arg1[%c0, %c0_0, %c0_1, %c0_2] : memref<8x2x8x128xbf16, #tpu.memory_space<vmem>>, vector<8x2x8x128xbf16>
    %1 = arith.extf %0 : vector<8x2x8x128xbf16> to vector<8x2x8x128xf32>
    %c0_3 = arith.constant 0 : index
    %c0_4 = arith.constant 0 : index
    %2 = vector.load %arg2[%c0_3, %c0_4] : memref<1x64xf32, #tpu.memory_space<vmem>>, vector<1x64xf32>
    %c0_5 = arith.constant 0 : index
    %c0_6 = arith.constant 0 : index
    %3 = vector.load %arg3[%c0_5, %c0_6] : memref<1x64xf32, #tpu.memory_space<vmem>>, vector<1x64xf32>
    %4 = vector.extract_strided_slice %1 {offsets = [0, 0, 0, 0], sizes = [8, 2, 8, 64], strides = [1, 1, 1, 1]} : vector<8x2x8x128xf32> to vector<8x2x8x64xf32>
    %5 = vector.shape_cast %2 : vector<1x64xf32> to vector<1x1x1x64xf32>
    %6 = vector.broadcast %5 : vector<1x1x1x64xf32> to vector<8x2x8x64xf32>
    %7 = arith.mulf %4, %6 : vector<8x2x8x64xf32>
    %8 = vector.shape_cast %3 : vector<1x64xf32> to vector<1x1x1x64xf32>
    %9 = vector.broadcast %8 : vector<1x1x1x64xf32> to vector<8x2x8x64xf32>
    %10 = arith.addf %7, %9 : vector<8x2x8x64xf32>
    %11 = vector.extract_strided_slice %1 {offsets = [0, 0, 0, 64], sizes = [8, 2, 8, 64], strides = [1, 1, 1, 1]} : vector<8x2x8x128xf32> to vector<8x2x8x64xf32>
    %12 = vector.shape_cast %2 : vector<1x64xf32> to vector<1x1x1x64xf32>
    %13 = vector.broadcast %12 : vector<1x1x1x64xf32> to vector<8x2x8x64xf32>
    %14 = arith.mulf %11, %13 : vector<8x2x8x64xf32>
    %15 = vector.shape_cast %3 : vector<1x64xf32> to vector<1x1x1x64xf32>
    %16 = vector.broadcast %15 : vector<1x1x1x64xf32> to vector<8x2x8x64xf32>
    %17 = arith.addf %14, %16 : vector<8x2x8x64xf32>
    %18 = arith.maximumf %10, %17 : vector<8x2x8x64xf32>
    %19 = vector.extract_strided_slice %18 {offsets = [0, 0, 0, 0], sizes = [8, 1, 8, 64], strides = [1, 1, 1, 1]} : vector<8x2x8x64xf32> to vector<8x1x8x64xf32>
    %20 = vector.shape_cast %19 : vector<8x1x8x64xf32> to vector<8x8x64xf32>
    %21 = vector.extract_strided_slice %18 {offsets = [0, 1, 0, 0], sizes = [8, 1, 8, 64], strides = [1, 1, 1, 1]} : vector<8x2x8x64xf32> to vector<8x1x8x64xf32>
    %22 = vector.shape_cast %21 : vector<8x1x8x64xf32> to vector<8x8x64xf32>
    %23 = arith.maximumf %20, %22 : vector<8x8x64xf32>
    %24 = vector.shape_cast %23 : vector<8x8x64xf32> to vector<8x512xf32>
    %25 = arith.truncf %24 : vector<8x512xf32> to vector<8x512xbf16>
    %c0_7 = arith.constant 0 : index
    %c0_8 = arith.constant 0 : index
    %26 = vector.load %arg4[%c0_7, %c0_8] : memref<8x512xbf16, #tpu.memory_space<vmem>>, vector<8x512xbf16>
    tpu.vector_store %arg4[%c0_7, %c0_8], %25 {strides = array<i32>} : memref<8x512xbf16, #tpu.memory_space<vmem>>, vector<8x512xbf16>,
    return
  }
  func.func @transform_0(%arg0: i32) -> (i32, i32, i32, i32) {
    %c0_i32 = arith.constant 0 : i32
    %c0_i32_0 = arith.constant 0 : i32
    %c0_i32_1 = arith.constant 0 : i32
    %c0_i32_2 = arith.constant 0 : i32
    return %arg0, %c0_i32, %c0_i32_0, %c0_i32_1 : i32, i32, i32, i32
  }
  func.func @transform_1(%arg0: i32) -> (i32, i32) {
    %c0_i32 = arith.constant 0 : i32
    %c0_i32_0 = arith.constant 0 : i32
    %c0_i32_1 = arith.constant 0 : i32
    return %c0_i32, %c0_i32_0 : i32, i32
  }
  func.func @transform_2(%arg0: i32) -> (i32, i32) {
    %c0_i32 = arith.constant 0 : i32
    %c0_i32_0 = arith.constant 0 : i32
    %c0_i32_1 = arith.constant 0 : i32
    return %c0_i32, %c0_i32_0 : i32, i32
  }
  func.func @transform_3(%arg0: i32) -> (i32, i32) {
    %c0_i32 = arith.constant 0 : i32
    %c0_i32_0 = arith.constant 0 : i32
    return %arg0, %c0_i32 : i32, i32
  }
}

module attributes {stable_mosaic.version = 11 : i64} {
  func.func @kernel(%arg0: i32, %arg1: i32, %arg2: memref<1x12x12x64xbf16, #tpu.memory_space<vmem>>, %arg3: memref<5x320x128xbf16, #tpu.memory_space<vmem>>, %arg4: memref<1x128xf32, #tpu.memory_space<vmem>>, %arg5: memref<64x128xbf16, #tpu.memory_space<vmem>>, %arg6: memref<1x2x128xf32, #tpu.memory_space<vmem>>) attributes {dimension_semantics = [#tpu.dimension_semantics<parallel>, #tpu.dimension_semantics<arbitrary>], iteration_bounds = array<i64: 2, 1>, scalar_prefetch = 0 : i64, scratch_operands = 0 : i64, tpu.core_type = #tpu.core_type<tc>, window_params = [{transform_indices = @transform_0, window_bounds = array<i64: 1, 12, 12, 64>}, {pipeline_mode = #tpu.pipeline_mode<synchronous>, transform_indices = @transform_1, window_bounds = array<i64: 5, 320, 128>}, {pipeline_mode = #tpu.pipeline_mode<synchronous>, transform_indices = @transform_2, window_bounds = array<i64: 1, 128>}, {transform_indices = @transform_3, window_bounds = array<i64: 64, 128>}, {transform_indices = @transform_4, window_bounds = array<i64: 1, 2, 128>}]} {
    %c0 = arith.constant 0 : index
    %c0_0 = arith.constant 0 : index
    %c0_1 = arith.constant 0 : index
    %c0_2 = arith.constant 0 : index
    %0 = vector.load %arg2[%c0, %c0_0, %c0_1, %c0_2] : memref<1x12x12x64xbf16, #tpu.memory_space<vmem>>, vector<1x12x12x64xbf16>
    %1 = vector.shape_cast %0 : vector<1x12x12x64xbf16> to vector<12x12x64xbf16>
    %cst = arith.constant 0.000000e+00 : f32
    %2 = vector.broadcast %cst : f32 to vector<64x128xf32>
    %3 = vector.extract_strided_slice %1 {offsets = [0, 0, 0], sizes = [8, 8, 64], strides = [1, 1, 1]} : vector<12x12x64xbf16> to vector<8x8x64xbf16>
    %4 = vector.extract_strided_slice %1 {offsets = [0, 1, 0], sizes = [8, 8, 64], strides = [1, 1, 1]} : vector<12x12x64xbf16> to vector<8x8x64xbf16>
    %5 = vector.extract_strided_slice %1 {offsets = [0, 2, 0], sizes = [8, 8, 64], strides = [1, 1, 1]} : vector<12x12x64xbf16> to vector<8x8x64xbf16>
    %6 = vector.extract_strided_slice %1 {offsets = [0, 3, 0], sizes = [8, 8, 64], strides = [1, 1, 1]} : vector<12x12x64xbf16> to vector<8x8x64xbf16>
    %7 = vector.extract_strided_slice %1 {offsets = [0, 4, 0], sizes = [8, 8, 64], strides = [1, 1, 1]} : vector<12x12x64xbf16> to vector<8x8x64xbf16>
    %8 = tpu.concatenate %3, %4, %5, %6, %7 in 2 : vector<8x8x64xbf16>, vector<8x8x64xbf16>, vector<8x8x64xbf16>, vector<8x8x64xbf16>, vector<8x8x64xbf16> -> vector<8x8x320xbf16>
    %9 = vector.shape_cast %8 : vector<8x8x320xbf16> to vector<64x320xbf16>
    %c0_3 = arith.constant 0 : index
    %c0_4 = arith.constant 0 : index
    %c0_5 = arith.constant 0 : index
    %10 = vector.load %arg3[%c0_3, %c0_4, %c0_5] : memref<5x320x128xbf16, #tpu.memory_space<vmem>>, vector<1x320x128xbf16>
    %11 = vector.shape_cast %10 : vector<1x320x128xbf16> to vector<320x128xbf16>
    %cst_6 = arith.constant dense<0.000000e+00> : vector<64x128xf32>
    %12 = tpu.matmul %9, %11, %cst_6 {dimension_numbers = #tpu.dot_dimension_numbers<[1], [0], [0], [1], [0, 0, 1, 1], [], []>} : vector<64x320xbf16>, vector<320x128xbf16>, vector<64x128xf32> -> vector<64x128xf32>
    %13 = arith.addf %2, %12 : vector<64x128xf32>
    %14 = vector.extract_strided_slice %1 {offsets = [1, 0, 0], sizes = [8, 8, 64], strides = [1, 1, 1]} : vector<12x12x64xbf16> to vector<8x8x64xbf16>
    %15 = vector.extract_strided_slice %1 {offsets = [1, 1, 0], sizes = [8, 8, 64], strides = [1, 1, 1]} : vector<12x12x64xbf16> to vector<8x8x64xbf16>
    %16 = vector.extract_strided_slice %1 {offsets = [1, 2, 0], sizes = [8, 8, 64], strides = [1, 1, 1]} : vector<12x12x64xbf16> to vector<8x8x64xbf16>
    %17 = vector.extract_strided_slice %1 {offsets = [1, 3, 0], sizes = [8, 8, 64], strides = [1, 1, 1]} : vector<12x12x64xbf16> to vector<8x8x64xbf16>
    %18 = vector.extract_strided_slice %1 {offsets = [1, 4, 0], sizes = [8, 8, 64], strides = [1, 1, 1]} : vector<12x12x64xbf16> to vector<8x8x64xbf16>
    %19 = tpu.concatenate %14, %15, %16, %17, %18 in 2 : vector<8x8x64xbf16>, vector<8x8x64xbf16>, vector<8x8x64xbf16>, vector<8x8x64xbf16>, vector<8x8x64xbf16> -> vector<8x8x320xbf16>
    %20 = vector.shape_cast %19 : vector<8x8x320xbf16> to vector<64x320xbf16>
    %c1 = arith.constant 1 : index
    %c0_7 = arith.constant 0 : index
    %c0_8 = arith.constant 0 : index
    %21 = vector.load %arg3[%c1, %c0_7, %c0_8] : memref<5x320x128xbf16, #tpu.memory_space<vmem>>, vector<1x320x128xbf16>
    %22 = vector.shape_cast %21 : vector<1x320x128xbf16> to vector<320x128xbf16>
    %cst_9 = arith.constant dense<0.000000e+00> : vector<64x128xf32>
    %23 = tpu.matmul %20, %22, %cst_9 {dimension_numbers = #tpu.dot_dimension_numbers<[1], [0], [0], [1], [0, 0, 1, 1], [], []>} : vector<64x320xbf16>, vector<320x128xbf16>, vector<64x128xf32> -> vector<64x128xf32>
    %24 = arith.addf %13, %23 : vector<64x128xf32>
    %25 = vector.extract_strided_slice %1 {offsets = [2, 0, 0], sizes = [8, 8, 64], strides = [1, 1, 1]} : vector<12x12x64xbf16> to vector<8x8x64xbf16>
    %26 = vector.extract_strided_slice %1 {offsets = [2, 1, 0], sizes = [8, 8, 64], strides = [1, 1, 1]} : vector<12x12x64xbf16> to vector<8x8x64xbf16>
    %27 = vector.extract_strided_slice %1 {offsets = [2, 2, 0], sizes = [8, 8, 64], strides = [1, 1, 1]} : vector<12x12x64xbf16> to vector<8x8x64xbf16>
    %28 = vector.extract_strided_slice %1 {offsets = [2, 3, 0], sizes = [8, 8, 64], strides = [1, 1, 1]} : vector<12x12x64xbf16> to vector<8x8x64xbf16>
    %29 = vector.extract_strided_slice %1 {offsets = [2, 4, 0], sizes = [8, 8, 64], strides = [1, 1, 1]} : vector<12x12x64xbf16> to vector<8x8x64xbf16>
    %30 = tpu.concatenate %25, %26, %27, %28, %29 in 2 : vector<8x8x64xbf16>, vector<8x8x64xbf16>, vector<8x8x64xbf16>, vector<8x8x64xbf16>, vector<8x8x64xbf16> -> vector<8x8x320xbf16>
    %31 = vector.shape_cast %30 : vector<8x8x320xbf16> to vector<64x320xbf16>
    %c2 = arith.constant 2 : index
    %c0_10 = arith.constant 0 : index
    %c0_11 = arith.constant 0 : index
    %32 = vector.load %arg3[%c2, %c0_10, %c0_11] : memref<5x320x128xbf16, #tpu.memory_space<vmem>>, vector<1x320x128xbf16>
    %33 = vector.shape_cast %32 : vector<1x320x128xbf16> to vector<320x128xbf16>
    %cst_12 = arith.constant dense<0.000000e+00> : vector<64x128xf32>
    %34 = tpu.matmul %31, %33, %cst_12 {dimension_numbers = #tpu.dot_dimension_numbers<[1], [0], [0], [1], [0, 0, 1, 1], [], []>} : vector<64x320xbf16>, vector<320x128xbf16>, vector<64x128xf32> -> vector<64x128xf32>
    %35 = arith.addf %24, %34 : vector<64x128xf32>
    %36 = vector.extract_strided_slice %1 {offsets = [3, 0, 0], sizes = [8, 8, 64], strides = [1, 1, 1]} : vector<12x12x64xbf16> to vector<8x8x64xbf16>
    %37 = vector.extract_strided_slice %1 {offsets = [3, 1, 0], sizes = [8, 8, 64], strides = [1, 1, 1]} : vector<12x12x64xbf16> to vector<8x8x64xbf16>
    %38 = vector.extract_strided_slice %1 {offsets = [3, 2, 0], sizes = [8, 8, 64], strides = [1, 1, 1]} : vector<12x12x64xbf16> to vector<8x8x64xbf16>
    %39 = vector.extract_strided_slice %1 {offsets = [3, 3, 0], sizes = [8, 8, 64], strides = [1, 1, 1]} : vector<12x12x64xbf16> to vector<8x8x64xbf16>
    %40 = vector.extract_strided_slice %1 {offsets = [3, 4, 0], sizes = [8, 8, 64], strides = [1, 1, 1]} : vector<12x12x64xbf16> to vector<8x8x64xbf16>
    %41 = tpu.concatenate %36, %37, %38, %39, %40 in 2 : vector<8x8x64xbf16>, vector<8x8x64xbf16>, vector<8x8x64xbf16>, vector<8x8x64xbf16>, vector<8x8x64xbf16> -> vector<8x8x320xbf16>
    %42 = vector.shape_cast %41 : vector<8x8x320xbf16> to vector<64x320xbf16>
    %c3 = arith.constant 3 : index
    %c0_13 = arith.constant 0 : index
    %c0_14 = arith.constant 0 : index
    %43 = vector.load %arg3[%c3, %c0_13, %c0_14] : memref<5x320x128xbf16, #tpu.memory_space<vmem>>, vector<1x320x128xbf16>
    %44 = vector.shape_cast %43 : vector<1x320x128xbf16> to vector<320x128xbf16>
    %cst_15 = arith.constant dense<0.000000e+00> : vector<64x128xf32>
    %45 = tpu.matmul %42, %44, %cst_15 {dimension_numbers = #tpu.dot_dimension_numbers<[1], [0], [0], [1], [0, 0, 1, 1], [], []>} : vector<64x320xbf16>, vector<320x128xbf16>, vector<64x128xf32> -> vector<64x128xf32>
    %46 = arith.addf %35, %45 : vector<64x128xf32>
    %47 = vector.extract_strided_slice %1 {offsets = [4, 0, 0], sizes = [8, 8, 64], strides = [1, 1, 1]} : vector<12x12x64xbf16> to vector<8x8x64xbf16>
    %48 = vector.extract_strided_slice %1 {offsets = [4, 1, 0], sizes = [8, 8, 64], strides = [1, 1, 1]} : vector<12x12x64xbf16> to vector<8x8x64xbf16>
    %49 = vector.extract_strided_slice %1 {offsets = [4, 2, 0], sizes = [8, 8, 64], strides = [1, 1, 1]} : vector<12x12x64xbf16> to vector<8x8x64xbf16>
    %50 = vector.extract_strided_slice %1 {offsets = [4, 3, 0], sizes = [8, 8, 64], strides = [1, 1, 1]} : vector<12x12x64xbf16> to vector<8x8x64xbf16>
    %51 = vector.extract_strided_slice %1 {offsets = [4, 4, 0], sizes = [8, 8, 64], strides = [1, 1, 1]} : vector<12x12x64xbf16> to vector<8x8x64xbf16>
    %52 = tpu.concatenate %47, %48, %49, %50, %51 in 2 : vector<8x8x64xbf16>, vector<8x8x64xbf16>, vector<8x8x64xbf16>, vector<8x8x64xbf16>, vector<8x8x64xbf16> -> vector<8x8x320xbf16>
    %53 = vector.shape_cast %52 : vector<8x8x320xbf16> to vector<64x320xbf16>
    %c4 = arith.constant 4 : index
    %c0_16 = arith.constant 0 : index
    %c0_17 = arith.constant 0 : index
    %54 = vector.load %arg3[%c4, %c0_16, %c0_17] : memref<5x320x128xbf16, #tpu.memory_space<vmem>>, vector<1x320x128xbf16>
    %55 = vector.shape_cast %54 : vector<1x320x128xbf16> to vector<320x128xbf16>
    %cst_18 = arith.constant dense<0.000000e+00> : vector<64x128xf32>
    %56 = tpu.matmul %53, %55, %cst_18 {dimension_numbers = #tpu.dot_dimension_numbers<[1], [0], [0], [1], [0, 0, 1, 1], [], []>} : vector<64x320xbf16>, vector<320x128xbf16>, vector<64x128xf32> -> vector<64x128xf32>
    %57 = arith.addf %46, %56 : vector<64x128xf32>
    %c0_19 = arith.constant 0 : index
    %c0_20 = arith.constant 0 : index
    %58 = vector.load %arg4[%c0_19, %c0_20] : memref<1x128xf32, #tpu.memory_space<vmem>>, vector<1x128xf32>
    %59 = vector.broadcast %58 : vector<1x128xf32> to vector<64x128xf32>
    %60 = arith.addf %57, %59 : vector<64x128xf32>
    %cst_21 = arith.constant 0.000000e+00 : f32
    %61 = vector.broadcast %cst_21 : f32 to vector<64x128xf32>
    %62 = arith.maximumf %60, %61 : vector<64x128xf32>
    %63 = arith.truncf %62 : vector<64x128xf32> to vector<64x128xbf16>
    %c0_22 = arith.constant 0 : index
    %c0_23 = arith.constant 0 : index
    %64 = vector.load %arg5[%c0_22, %c0_23] : memref<64x128xbf16, #tpu.memory_space<vmem>>, vector<64x128xbf16>
    tpu.vector_store %arg5[%c0_22, %c0_23], %63 {strides = array<i32>} : memref<64x128xbf16, #tpu.memory_space<vmem>>, vector<64x128xbf16>,
    %cst_24 = arith.constant dense<0.000000e+00> : vector<128xf32>
    %65 = vector.multi_reduction <add>, %62, %cst_24 [0] : vector<64x128xf32> to vector<128xf32>
    %66 = vector.shape_cast %65 : vector<128xf32> to vector<1x128xf32>
    %67 = arith.mulf %62, %62 : vector<64x128xf32>
    %cst_25 = arith.constant dense<0.000000e+00> : vector<128xf32>
    %68 = vector.multi_reduction <add>, %67, %cst_25 [0] : vector<64x128xf32> to vector<128xf32>
    %69 = vector.shape_cast %68 : vector<128xf32> to vector<1x128xf32>
    %70 = tpu.concatenate %66, %69 in 0 : vector<1x128xf32>, vector<1x128xf32> -> vector<2x128xf32>
    %c0_26 = arith.constant 0 : index
    %c0_27 = arith.constant 0 : index
    %c0_28 = arith.constant 0 : index
    %71 = vector.load %arg6[%c0_26, %c0_27, %c0_28] : memref<1x2x128xf32, #tpu.memory_space<vmem>>, vector<1x2x128xf32>
    %72 = vector.shape_cast %71 : vector<1x2x128xf32> to vector<2x128xf32>
    %73 = vector.shape_cast %70 : vector<2x128xf32> to vector<1x2x128xf32>
    tpu.vector_store %arg6[%c0_26, %c0_27, %c0_28], %73 {strides = array<i32>} : memref<1x2x128xf32, #tpu.memory_space<vmem>>, vector<1x2x128xf32>,
    return
  }
  func.func @transform_0(%arg0: i32, %arg1: i32) -> (i32, i32, i32, i32) {
    %c0_i32 = arith.constant 0 : i32
    %c0_i32_0 = arith.constant 0 : i32
    %c0_i32_1 = arith.constant 0 : i32
    %c0_i32_2 = arith.constant 0 : i32
    return %arg0, %c0_i32, %c0_i32_0, %c0_i32_1 : i32, i32, i32, i32
  }
  func.func @transform_1(%arg0: i32, %arg1: i32) -> (i32, i32, i32) {
    %c0_i32 = arith.constant 0 : i32
    %c0_i32_0 = arith.constant 0 : i32
    %c0_i32_1 = arith.constant 0 : i32
    %c0_i32_2 = arith.constant 0 : i32
    return %c0_i32, %c0_i32_0, %c0_i32_1 : i32, i32, i32
  }
  func.func @transform_2(%arg0: i32, %arg1: i32) -> (i32, i32) {
    %c0_i32 = arith.constant 0 : i32
    %c0_i32_0 = arith.constant 0 : i32
    %c0_i32_1 = arith.constant 0 : i32
    return %c0_i32, %c0_i32_0 : i32, i32
  }
  func.func @transform_3(%arg0: i32, %arg1: i32) -> (i32, i32) {
    %c1_i32 = arith.constant 1 : i32
    %0 = arith.muli %arg0, %c1_i32 : i32
    %1 = arith.addi %0, %arg1 : i32
    %c0_i32 = arith.constant 0 : i32
    %c0_i32_0 = arith.constant 0 : i32
    return %1, %c0_i32 : i32, i32
  }
  func.func @transform_4(%arg0: i32, %arg1: i32) -> (i32, i32, i32) {
    %c1_i32 = arith.constant 1 : i32
    %0 = arith.muli %arg0, %c1_i32 : i32
    %1 = arith.addi %0, %arg1 : i32
    %c0_i32 = arith.constant 0 : i32
    %c0_i32_0 = arith.constant 0 : i32
    %c0_i32_1 = arith.constant 0 : i32
    return %1, %c0_i32, %c0_i32_0 : i32, i32, i32
  }
}

module attributes {stable_mosaic.version = 11 : i64} {
  func.func @kernel(%arg0: i32, %arg1: memref<8x2x4x256xbf16, #tpu.memory_space<vmem>>, %arg2: memref<1x128xf32, #tpu.memory_space<vmem>>, %arg3: memref<1x128xf32, #tpu.memory_space<vmem>>, %arg4: memref<8x512xbf16, #tpu.memory_space<vmem>>) attributes {dimension_semantics = [#tpu.dimension_semantics<parallel>], iteration_bounds = array<i64: 1>, scalar_prefetch = 0 : i64, scratch_operands = 0 : i64, tpu.core_type = #tpu.core_type<tc>, window_params = [{transform_indices = @transform_0, window_bounds = array<i64: 8, 2, 4, 256>}, {pipeline_mode = #tpu.pipeline_mode<synchronous>, transform_indices = @transform_1, window_bounds = array<i64: 1, 128>}, {pipeline_mode = #tpu.pipeline_mode<synchronous>, transform_indices = @transform_2, window_bounds = array<i64: 1, 128>}, {transform_indices = @transform_3, window_bounds = array<i64: 8, 512>}]} {
    %c0 = arith.constant 0 : index
    %c0_0 = arith.constant 0 : index
    %c0_1 = arith.constant 0 : index
    %c0_2 = arith.constant 0 : index
    %0 = vector.load %arg1[%c0, %c0_0, %c0_1, %c0_2] : memref<8x2x4x256xbf16, #tpu.memory_space<vmem>>, vector<8x2x4x256xbf16>
    %1 = arith.extf %0 : vector<8x2x4x256xbf16> to vector<8x2x4x256xf32>
    %c0_3 = arith.constant 0 : index
    %c0_4 = arith.constant 0 : index
    %2 = vector.load %arg2[%c0_3, %c0_4] : memref<1x128xf32, #tpu.memory_space<vmem>>, vector<1x128xf32>
    %c0_5 = arith.constant 0 : index
    %c0_6 = arith.constant 0 : index
    %3 = vector.load %arg3[%c0_5, %c0_6] : memref<1x128xf32, #tpu.memory_space<vmem>>, vector<1x128xf32>
    %4 = vector.extract_strided_slice %1 {offsets = [0, 0, 0, 0], sizes = [8, 2, 4, 128], strides = [1, 1, 1, 1]} : vector<8x2x4x256xf32> to vector<8x2x4x128xf32>
    %5 = vector.shape_cast %2 : vector<1x128xf32> to vector<1x1x1x128xf32>
    %6 = vector.broadcast %5 : vector<1x1x1x128xf32> to vector<8x2x4x128xf32>
    %7 = arith.mulf %4, %6 : vector<8x2x4x128xf32>
    %8 = vector.shape_cast %3 : vector<1x128xf32> to vector<1x1x1x128xf32>
    %9 = vector.broadcast %8 : vector<1x1x1x128xf32> to vector<8x2x4x128xf32>
    %10 = arith.addf %7, %9 : vector<8x2x4x128xf32>
    %11 = vector.extract_strided_slice %1 {offsets = [0, 0, 0, 128], sizes = [8, 2, 4, 128], strides = [1, 1, 1, 1]} : vector<8x2x4x256xf32> to vector<8x2x4x128xf32>
    %12 = vector.shape_cast %2 : vector<1x128xf32> to vector<1x1x1x128xf32>
    %13 = vector.broadcast %12 : vector<1x1x1x128xf32> to vector<8x2x4x128xf32>
    %14 = arith.mulf %11, %13 : vector<8x2x4x128xf32>
    %15 = vector.shape_cast %3 : vector<1x128xf32> to vector<1x1x1x128xf32>
    %16 = vector.broadcast %15 : vector<1x1x1x128xf32> to vector<8x2x4x128xf32>
    %17 = arith.addf %14, %16 : vector<8x2x4x128xf32>
    %18 = arith.maximumf %10, %17 : vector<8x2x4x128xf32>
    %19 = vector.extract_strided_slice %18 {offsets = [0, 0, 0, 0], sizes = [8, 1, 4, 128], strides = [1, 1, 1, 1]} : vector<8x2x4x128xf32> to vector<8x1x4x128xf32>
    %20 = vector.shape_cast %19 : vector<8x1x4x128xf32> to vector<8x4x128xf32>
    %21 = vector.extract_strided_slice %18 {offsets = [0, 1, 0, 0], sizes = [8, 1, 4, 128], strides = [1, 1, 1, 1]} : vector<8x2x4x128xf32> to vector<8x1x4x128xf32>
    %22 = vector.shape_cast %21 : vector<8x1x4x128xf32> to vector<8x4x128xf32>
    %23 = arith.maximumf %20, %22 : vector<8x4x128xf32>
    %24 = vector.shape_cast %23 : vector<8x4x128xf32> to vector<8x512xf32>
    %25 = arith.truncf %24 : vector<8x512xf32> to vector<8x512xbf16>
    %c0_7 = arith.constant 0 : index
    %c0_8 = arith.constant 0 : index
    %26 = vector.load %arg4[%c0_7, %c0_8] : memref<8x512xbf16, #tpu.memory_space<vmem>>, vector<8x512xbf16>
    tpu.vector_store %arg4[%c0_7, %c0_8], %25 {strides = array<i32>} : memref<8x512xbf16, #tpu.memory_space<vmem>>, vector<8x512xbf16>,
    return
  }
  func.func @transform_0(%arg0: i32) -> (i32, i32, i32, i32) {
    %c0_i32 = arith.constant 0 : i32
    %c0_i32_0 = arith.constant 0 : i32
    %c0_i32_1 = arith.constant 0 : i32
    %c0_i32_2 = arith.constant 0 : i32
    return %arg0, %c0_i32, %c0_i32_0, %c0_i32_1 : i32, i32, i32, i32
  }
  func.func @transform_1(%arg0: i32) -> (i32, i32) {
    %c0_i32 = arith.constant 0 : i32
    %c0_i32_0 = arith.constant 0 : i32
    %c0_i32_1 = arith.constant 0 : i32
    return %c0_i32, %c0_i32_0 : i32, i32
  }
  func.func @transform_2(%arg0: i32) -> (i32, i32) {
    %c0_i32 = arith.constant 0 : i32
    %c0_i32_0 = arith.constant 0 : i32
    %c0_i32_1 = arith.constant 0 : i32
    return %c0_i32, %c0_i32_0 : i32, i32
  }
  func.func @transform_3(%arg0: i32) -> (i32, i32) {
    %c0_i32 = arith.constant 0 : i32
    %c0_i32_0 = arith.constant 0 : i32
    return %arg0, %c0_i32 : i32, i32
  }
}

module attributes {stable_mosaic.version = 11 : i64} {
  func.func @kernel(%arg0: i32, %arg1: i32, %arg2: memref<1x6x6x128xbf16, #tpu.memory_space<vmem>>, %arg3: memref<3x384x256xbf16, #tpu.memory_space<vmem>>, %arg4: memref<1x256xf32, #tpu.memory_space<vmem>>, %arg5: memref<16x256xbf16, #tpu.memory_space<vmem>>, %arg6: memref<1x2x256xf32, #tpu.memory_space<vmem>>) attributes {dimension_semantics = [#tpu.dimension_semantics<parallel>, #tpu.dimension_semantics<arbitrary>], iteration_bounds = array<i64: 2, 1>, scalar_prefetch = 0 : i64, scratch_operands = 0 : i64, tpu.core_type = #tpu.core_type<tc>, window_params = [{transform_indices = @transform_0, window_bounds = array<i64: 1, 6, 6, 128>}, {pipeline_mode = #tpu.pipeline_mode<synchronous>, transform_indices = @transform_1, window_bounds = array<i64: 3, 384, 256>}, {pipeline_mode = #tpu.pipeline_mode<synchronous>, transform_indices = @transform_2, window_bounds = array<i64: 1, 256>}, {transform_indices = @transform_3, window_bounds = array<i64: 16, 256>}, {transform_indices = @transform_4, window_bounds = array<i64: 1, 2, 256>}]} {
    %c0 = arith.constant 0 : index
    %c0_0 = arith.constant 0 : index
    %c0_1 = arith.constant 0 : index
    %c0_2 = arith.constant 0 : index
    %0 = vector.load %arg2[%c0, %c0_0, %c0_1, %c0_2] : memref<1x6x6x128xbf16, #tpu.memory_space<vmem>>, vector<1x6x6x128xbf16>
    %1 = vector.shape_cast %0 : vector<1x6x6x128xbf16> to vector<6x6x128xbf16>
    %cst = arith.constant 0.000000e+00 : f32
    %2 = vector.broadcast %cst : f32 to vector<16x256xf32>
    %3 = vector.extract_strided_slice %1 {offsets = [0, 0, 0], sizes = [4, 4, 128], strides = [1, 1, 1]} : vector<6x6x128xbf16> to vector<4x4x128xbf16>
    %4 = vector.extract_strided_slice %1 {offsets = [0, 1, 0], sizes = [4, 4, 128], strides = [1, 1, 1]} : vector<6x6x128xbf16> to vector<4x4x128xbf16>
    %5 = vector.extract_strided_slice %1 {offsets = [0, 2, 0], sizes = [4, 4, 128], strides = [1, 1, 1]} : vector<6x6x128xbf16> to vector<4x4x128xbf16>
    %6 = tpu.concatenate %3, %4, %5 in 2 : vector<4x4x128xbf16>, vector<4x4x128xbf16>, vector<4x4x128xbf16> -> vector<4x4x384xbf16>
    %7 = vector.shape_cast %6 : vector<4x4x384xbf16> to vector<16x384xbf16>
    %c0_3 = arith.constant 0 : index
    %c0_4 = arith.constant 0 : index
    %c0_5 = arith.constant 0 : index
    %8 = vector.load %arg3[%c0_3, %c0_4, %c0_5] : memref<3x384x256xbf16, #tpu.memory_space<vmem>>, vector<1x384x256xbf16>
    %9 = vector.shape_cast %8 : vector<1x384x256xbf16> to vector<384x256xbf16>
    %cst_6 = arith.constant dense<0.000000e+00> : vector<16x256xf32>
    %10 = tpu.matmul %7, %9, %cst_6 {dimension_numbers = #tpu.dot_dimension_numbers<[1], [0], [0], [1], [0, 0, 1, 1], [], []>} : vector<16x384xbf16>, vector<384x256xbf16>, vector<16x256xf32> -> vector<16x256xf32>
    %11 = arith.addf %2, %10 : vector<16x256xf32>
    %12 = vector.extract_strided_slice %1 {offsets = [1, 0, 0], sizes = [4, 4, 128], strides = [1, 1, 1]} : vector<6x6x128xbf16> to vector<4x4x128xbf16>
    %13 = vector.extract_strided_slice %1 {offsets = [1, 1, 0], sizes = [4, 4, 128], strides = [1, 1, 1]} : vector<6x6x128xbf16> to vector<4x4x128xbf16>
    %14 = vector.extract_strided_slice %1 {offsets = [1, 2, 0], sizes = [4, 4, 128], strides = [1, 1, 1]} : vector<6x6x128xbf16> to vector<4x4x128xbf16>
    %15 = tpu.concatenate %12, %13, %14 in 2 : vector<4x4x128xbf16>, vector<4x4x128xbf16>, vector<4x4x128xbf16> -> vector<4x4x384xbf16>
    %16 = vector.shape_cast %15 : vector<4x4x384xbf16> to vector<16x384xbf16>
    %c1 = arith.constant 1 : index
    %c0_7 = arith.constant 0 : index
    %c0_8 = arith.constant 0 : index
    %17 = vector.load %arg3[%c1, %c0_7, %c0_8] : memref<3x384x256xbf16, #tpu.memory_space<vmem>>, vector<1x384x256xbf16>
    %18 = vector.shape_cast %17 : vector<1x384x256xbf16> to vector<384x256xbf16>
    %cst_9 = arith.constant dense<0.000000e+00> : vector<16x256xf32>
    %19 = tpu.matmul %16, %18, %cst_9 {dimension_numbers = #tpu.dot_dimension_numbers<[1], [0], [0], [1], [0, 0, 1, 1], [], []>} : vector<16x384xbf16>, vector<384x256xbf16>, vector<16x256xf32> -> vector<16x256xf32>
    %20 = arith.addf %11, %19 : vector<16x256xf32>
    %21 = vector.extract_strided_slice %1 {offsets = [2, 0, 0], sizes = [4, 4, 128], strides = [1, 1, 1]} : vector<6x6x128xbf16> to vector<4x4x128xbf16>
    %22 = vector.extract_strided_slice %1 {offsets = [2, 1, 0], sizes = [4, 4, 128], strides = [1, 1, 1]} : vector<6x6x128xbf16> to vector<4x4x128xbf16>
    %23 = vector.extract_strided_slice %1 {offsets = [2, 2, 0], sizes = [4, 4, 128], strides = [1, 1, 1]} : vector<6x6x128xbf16> to vector<4x4x128xbf16>
    %24 = tpu.concatenate %21, %22, %23 in 2 : vector<4x4x128xbf16>, vector<4x4x128xbf16>, vector<4x4x128xbf16> -> vector<4x4x384xbf16>
    %25 = vector.shape_cast %24 : vector<4x4x384xbf16> to vector<16x384xbf16>
    %c2 = arith.constant 2 : index
    %c0_10 = arith.constant 0 : index
    %c0_11 = arith.constant 0 : index
    %26 = vector.load %arg3[%c2, %c0_10, %c0_11] : memref<3x384x256xbf16, #tpu.memory_space<vmem>>, vector<1x384x256xbf16>
    %27 = vector.shape_cast %26 : vector<1x384x256xbf16> to vector<384x256xbf16>
    %cst_12 = arith.constant dense<0.000000e+00> : vector<16x256xf32>
    %28 = tpu.matmul %25, %27, %cst_12 {dimension_numbers = #tpu.dot_dimension_numbers<[1], [0], [0], [1], [0, 0, 1, 1], [], []>} : vector<16x384xbf16>, vector<384x256xbf16>, vector<16x256xf32> -> vector<16x256xf32>
    %29 = arith.addf %20, %28 : vector<16x256xf32>
    %c0_13 = arith.constant 0 : index
    %c0_14 = arith.constant 0 : index
    %30 = vector.load %arg4[%c0_13, %c0_14] : memref<1x256xf32, #tpu.memory_space<vmem>>, vector<1x256xf32>
    %31 = vector.broadcast %30 : vector<1x256xf32> to vector<16x256xf32>
    %32 = arith.addf %29, %31 : vector<16x256xf32>
    %cst_15 = arith.constant 0.000000e+00 : f32
    %33 = vector.broadcast %cst_15 : f32 to vector<16x256xf32>
    %34 = arith.maximumf %32, %33 : vector<16x256xf32>
    %35 = arith.truncf %34 : vector<16x256xf32> to vector<16x256xbf16>
    %c0_16 = arith.constant 0 : index
    %c0_17 = arith.constant 0 : index
    %36 = vector.load %arg5[%c0_16, %c0_17] : memref<16x256xbf16, #tpu.memory_space<vmem>>, vector<16x256xbf16>
    tpu.vector_store %arg5[%c0_16, %c0_17], %35 {strides = array<i32>} : memref<16x256xbf16, #tpu.memory_space<vmem>>, vector<16x256xbf16>,
    %cst_18 = arith.constant dense<0.000000e+00> : vector<256xf32>
    %37 = vector.multi_reduction <add>, %34, %cst_18 [0] : vector<16x256xf32> to vector<256xf32>
    %38 = vector.shape_cast %37 : vector<256xf32> to vector<1x256xf32>
    %39 = arith.mulf %34, %34 : vector<16x256xf32>
    %cst_19 = arith.constant dense<0.000000e+00> : vector<256xf32>
    %40 = vector.multi_reduction <add>, %39, %cst_19 [0] : vector<16x256xf32> to vector<256xf32>
    %41 = vector.shape_cast %40 : vector<256xf32> to vector<1x256xf32>
    %42 = tpu.concatenate %38, %41 in 0 : vector<1x256xf32>, vector<1x256xf32> -> vector<2x256xf32>
    %c0_20 = arith.constant 0 : index
    %c0_21 = arith.constant 0 : index
    %c0_22 = arith.constant 0 : index
    %43 = vector.load %arg6[%c0_20, %c0_21, %c0_22] : memref<1x2x256xf32, #tpu.memory_space<vmem>>, vector<1x2x256xf32>
    %44 = vector.shape_cast %43 : vector<1x2x256xf32> to vector<2x256xf32>
    %45 = vector.shape_cast %42 : vector<2x256xf32> to vector<1x2x256xf32>
    tpu.vector_store %arg6[%c0_20, %c0_21, %c0_22], %45 {strides = array<i32>} : memref<1x2x256xf32, #tpu.memory_space<vmem>>, vector<1x2x256xf32>,
    return
  }
  func.func @transform_0(%arg0: i32, %arg1: i32) -> (i32, i32, i32, i32) {
    %c0_i32 = arith.constant 0 : i32
    %c0_i32_0 = arith.constant 0 : i32
    %c0_i32_1 = arith.constant 0 : i32
    %c0_i32_2 = arith.constant 0 : i32
    return %arg0, %c0_i32, %c0_i32_0, %c0_i32_1 : i32, i32, i32, i32
  }
  func.func @transform_1(%arg0: i32, %arg1: i32) -> (i32, i32, i32) {
    %c0_i32 = arith.constant 0 : i32
    %c0_i32_0 = arith.constant 0 : i32
    %c0_i32_1 = arith.constant 0 : i32
    %c0_i32_2 = arith.constant 0 : i32
    return %c0_i32, %c0_i32_0, %c0_i32_1 : i32, i32, i32
  }
  func.func @transform_2(%arg0: i32, %arg1: i32) -> (i32, i32) {
    %c0_i32 = arith.constant 0 : i32
    %c0_i32_0 = arith.constant 0 : i32
    %c0_i32_1 = arith.constant 0 : i32
    return %c0_i32, %c0_i32_0 : i32, i32
  }
  func.func @transform_3(%arg0: i32, %arg1: i32) -> (i32, i32) {
    %c1_i32 = arith.constant 1 : i32
    %0 = arith.muli %arg0, %c1_i32 : i32
    %1 = arith.addi %0, %arg1 : i32
    %c0_i32 = arith.constant 0 : i32
    %c0_i32_0 = arith.constant 0 : i32
    return %1, %c0_i32 : i32, i32
  }
  func.func @transform_4(%arg0: i32, %arg1: i32) -> (i32, i32, i32) {
    %c1_i32 = arith.constant 1 : i32
    %0 = arith.muli %arg0, %c1_i32 : i32
    %1 = arith.addi %0, %arg1 : i32
    %c0_i32 = arith.constant 0 : i32
    %c0_i32_0 = arith.constant 0 : i32
    %c0_i32_1 = arith.constant 0 : i32
    return %1, %c0_i32, %c0_i32_0 : i32, i32, i32
  }
}

module attributes {stable_mosaic.version = 11 : i64} {
  func.func @kernel(%arg0: i32, %arg1: memref<4x2x2x512xbf16, #tpu.memory_space<vmem>>, %arg2: memref<1x256xf32, #tpu.memory_space<vmem>>, %arg3: memref<1x256xf32, #tpu.memory_space<vmem>>, %arg4: memref<4x512xf32, #tpu.memory_space<vmem>>) attributes {dimension_semantics = [#tpu.dimension_semantics<parallel>], iteration_bounds = array<i64: 1>, scalar_prefetch = 0 : i64, scratch_operands = 0 : i64, tpu.core_type = #tpu.core_type<tc>, window_params = [{transform_indices = @transform_0, window_bounds = array<i64: 4, 2, 2, 512>}, {pipeline_mode = #tpu.pipeline_mode<synchronous>, transform_indices = @transform_1, window_bounds = array<i64: 1, 256>}, {pipeline_mode = #tpu.pipeline_mode<synchronous>, transform_indices = @transform_2, window_bounds = array<i64: 1, 256>}, {transform_indices = @transform_3, window_bounds = array<i64: 4, 512>}]} {
    %c0 = arith.constant 0 : index
    %c0_0 = arith.constant 0 : index
    %c0_1 = arith.constant 0 : index
    %c0_2 = arith.constant 0 : index
    %0 = vector.load %arg1[%c0, %c0_0, %c0_1, %c0_2] : memref<4x2x2x512xbf16, #tpu.memory_space<vmem>>, vector<4x2x2x512xbf16>
    %1 = arith.extf %0 : vector<4x2x2x512xbf16> to vector<4x2x2x512xf32>
    %c0_3 = arith.constant 0 : index
    %c0_4 = arith.constant 0 : index
    %2 = vector.load %arg2[%c0_3, %c0_4] : memref<1x256xf32, #tpu.memory_space<vmem>>, vector<1x256xf32>
    %c0_5 = arith.constant 0 : index
    %c0_6 = arith.constant 0 : index
    %3 = vector.load %arg3[%c0_5, %c0_6] : memref<1x256xf32, #tpu.memory_space<vmem>>, vector<1x256xf32>
    %4 = vector.extract_strided_slice %1 {offsets = [0, 0, 0, 0], sizes = [4, 2, 2, 256], strides = [1, 1, 1, 1]} : vector<4x2x2x512xf32> to vector<4x2x2x256xf32>
    %5 = vector.shape_cast %2 : vector<1x256xf32> to vector<1x1x1x256xf32>
    %6 = vector.broadcast %5 : vector<1x1x1x256xf32> to vector<4x2x2x256xf32>
    %7 = arith.mulf %4, %6 : vector<4x2x2x256xf32>
    %8 = vector.shape_cast %3 : vector<1x256xf32> to vector<1x1x1x256xf32>
    %9 = vector.broadcast %8 : vector<1x1x1x256xf32> to vector<4x2x2x256xf32>
    %10 = arith.addf %7, %9 : vector<4x2x2x256xf32>
    %11 = vector.extract_strided_slice %1 {offsets = [0, 0, 0, 256], sizes = [4, 2, 2, 256], strides = [1, 1, 1, 1]} : vector<4x2x2x512xf32> to vector<4x2x2x256xf32>
    %12 = vector.shape_cast %2 : vector<1x256xf32> to vector<1x1x1x256xf32>
    %13 = vector.broadcast %12 : vector<1x1x1x256xf32> to vector<4x2x2x256xf32>
    %14 = arith.mulf %11, %13 : vector<4x2x2x256xf32>
    %15 = vector.shape_cast %3 : vector<1x256xf32> to vector<1x1x1x256xf32>
    %16 = vector.broadcast %15 : vector<1x1x1x256xf32> to vector<4x2x2x256xf32>
    %17 = arith.addf %14, %16 : vector<4x2x2x256xf32>
    %18 = arith.maximumf %10, %17 : vector<4x2x2x256xf32>
    %19 = vector.extract_strided_slice %18 {offsets = [0, 0, 0, 0], sizes = [4, 1, 2, 256], strides = [1, 1, 1, 1]} : vector<4x2x2x256xf32> to vector<4x1x2x256xf32>
    %20 = vector.shape_cast %19 : vector<4x1x2x256xf32> to vector<4x2x256xf32>
    %21 = vector.extract_strided_slice %18 {offsets = [0, 1, 0, 0], sizes = [4, 1, 2, 256], strides = [1, 1, 1, 1]} : vector<4x2x2x256xf32> to vector<4x1x2x256xf32>
    %22 = vector.shape_cast %21 : vector<4x1x2x256xf32> to vector<4x2x256xf32>
    %23 = arith.maximumf %20, %22 : vector<4x2x256xf32>
    %24 = vector.shape_cast %23 : vector<4x2x256xf32> to vector<4x512xf32>
    %c0_7 = arith.constant 0 : index
    %c0_8 = arith.constant 0 : index
    %25 = vector.load %arg4[%c0_7, %c0_8] : memref<4x512xf32, #tpu.memory_space<vmem>>, vector<4x512xf32>
    tpu.vector_store %arg4[%c0_7, %c0_8], %24 {strides = array<i32>} : memref<4x512xf32, #tpu.memory_space<vmem>>, vector<4x512xf32>,
    return
  }
  func.func @transform_0(%arg0: i32) -> (i32, i32, i32, i32) {
    %c0_i32 = arith.constant 0 : i32
    %c0_i32_0 = arith.constant 0 : i32
    %c0_i32_1 = arith.constant 0 : i32
    %c0_i32_2 = arith.constant 0 : i32
    return %arg0, %c0_i32, %c0_i32_0, %c0_i32_1 : i32, i32, i32, i32
  }
  func.func @transform_1(%arg0: i32) -> (i32, i32) {
    %c0_i32 = arith.constant 0 : i32
    %c0_i32_0 = arith.constant 0 : i32
    %c0_i32_1 = arith.constant 0 : i32
    return %c0_i32, %c0_i32_0 : i32, i32
  }
  func.func @transform_2(%arg0: i32) -> (i32, i32) {
    %c0_i32 = arith.constant 0 : i32
    %c0_i32_0 = arith.constant 0 : i32
    %c0_i32_1 = arith.constant 0 : i32
    return %c0_i32, %c0_i32_0 : i32, i32
  }
  func.func @transform_3(%arg0: i32) -> (i32, i32) {
    %c0_i32 = arith.constant 0 : i32
    %c0_i32_0 = arith.constant 0 : i32
    return %arg0, %c0_i32 : i32, i32
  }
}

</mosaic_0001>

<bundles_post_ra>
// kernel: fully_cnn_forward.7
= control target key start
LH: loop header
LB: loop body
LE: loop exit
PB: predicated region body
PF: predicated region fallthrough
CT: control target
= control target key end

     0   :  { %s721_s12 = smov 0   ;;  %s915_s0 = inlined_call_operand.vmem [shape: bf16[16,2,8,128], index: 0, kind: input, shape index: {}]   ;;  %s916_s1 = inlined_call_operand.vmem [shape: f32[1,64], index: 1, kind: input, shape index: {}]   ;;  %s917_s2 = inlined_call_operand.vmem [shape: f32[1,64], index: 2, kind: input, shape index: {}]   ;;  %s918_s3 = inlined_call_operand.vmem [shape: bf16[16,512], index: 3, kind: output, shape index: {}]  }
   0x1 LB: > { %s727_s13 = sadd.s32 4294967295, %s696_s12   ;;  %p614_p0 = scmp.ge.s32.totalorder %s696_s12, 1  ;;  %s696_s12 = sphi %s721_s12, %s13_s12  }
   0x2   : > { %p139_p1 = scmp.lt.s32.totalorder %s696_s12, 3 }
   0x4   : > { %p140_p2 = pnand %p614_p0, %p139_p1 }
   0x5   : > { %v734_v0 = vld [vmem:[%s916_s1] ss:$0 sm:$0xff] (!%p140_p2)  ;;  %s698_s16 = smov (!%p140_p2), 64   ;;  %s615_s19 = sshll.u32 (!%p140_p2), %s727_s13, 3  ;;  %vm532_vm0 = vcmask (!%p140_p2), 523264  }
   0x6   : > { %143 = sbr.rel (%p140_p2) target bundleno = 411 (0x19b), region = 32  ;;  %254 = vrot.lane.b32.xlu0 (!%p140_p2), %v734_v0, %s698_s16  ;;  %v741_v1 = vld [vmem:[%s917_s2] ss:$0 sm:$0xff] (!%p140_p2)  ;;  %p165_p3 = scmp.lt.s32.totalorder (!%p140_p2), %s615_s19, 15 }
   0x7   : > { %p171_p4 = scmp.lt.s32.totalorder (!%p140_p2), %s727_s13, 1 }
   0xa   : > { %273 = vrot.lane.b32.xlu0 (!%p140_p2), %v741_v1, %s698_s16 }
   0xd   : > { %s920_s19 = smov (!%p165_p3, %s615_s19), 15  ;;  %s922_s13 = smov (!%p171_p4, %s727_s13), 1 }
   0xe   : > { %s626_s20 = sshll.u32 %s920_s19, 3  ;;  %s627_s24 = sshll.u32 %s922_s13, 4 }
   0xf   : > { %s749_s23 = scalar_lea.vmem %s915_s0, %s626_s20  ;;  %s175_s27 = scalar_lea.vmem %s918_s3, %s627_s24 }
  0x10   : > { %v752_v2 = vld [vmem:[%s749_s23 + $0x8] sm:$0xff]   ;;  %v755_v3 = vld [vmem:[%s749_s23] sm:$0xff]   ;;  %v762_v7 = vld [vmem:[%s749_s23 + $0x10] sm:$0xff]  }
  0x11   : > { %v636_v4 = vunpack.c.l.bf16 %v752_v2  ;;  %v632_v5 = vunpack.c.l.bf16 %v755_v3  ;;  %v633_v9 = vunpack.c.h.bf16 %v755_v3  ;;  %v640_v11 = vunpack.c.l.bf16 %v762_v7  ;;  %v773_v13 = vld [vmem:[%s749_s23 + $0x18] sm:$0xff]   ;;  %v786_v20 = vld [vmem:[%s749_s23 + $0x20] sm:$0xff]   ;;  %v797_v27 = vld [vmem:[%s749_s23 + $0x28] sm:$0xff]  }
  0x12   : > { %v644_v18 = vunpack.c.l.bf16 %v773_v13  ;;  %v637_v19 = vunpack.c.h.bf16 %v752_v2  ;;  %v648_v25 = vunpack.c.l.bf16 %v786_v20  ;;  %v641_v26 = vunpack.c.h.bf16 %v762_v7  ;;  %v808_v34 = vld [vmem:[%s749_s23 + $0x30] sm:$0xff]   ;;  %v819_v41 = vld [vmem:[%s749_s23 + $0x38] sm:$0xff]  }
  0x13   : > { %v652_v32 = vunpack.c.l.bf16 %v797_v27  ;;  %v645_v33 = vunpack.c.h.bf16 %v773_v13  ;;  %v656_v39 = vunpack.c.l.bf16 %v808_v34  ;;  %v649_v40 = vunpack.c.h.bf16 %v786_v20 }
  0x14   : > { %v660_v46 = vunpack.c.l.bf16 %v819_v41  ;;  %v653_v47 = vunpack.c.h.bf16 %v797_v27  ;;  %v657_v52 = vunpack.c.h.bf16 %v808_v34  ;;  %v661_v56 = vunpack.c.h.bf16 %v819_v41 }
  0x15   : > { %v216_v60 = vmul.f32 %v632_v5, %v734_v0  ;;  %v217_v61 = vmul.f32 %v633_v9, %v734_v0  ;;  %v218_v63 = vmul.f32 %v636_v4, %v734_v0  ;;  %v225_v13 = vmul.f32 %v649_v40, %v734_v0 }
  0x16   : > { %v230_v34 = vmul.f32 %v660_v46, %v734_v0 }
  0x78   : > { %v759_v6 = vpop.permute.xlu0 %254 }
  0x79   : > { %v259_v8 = vmul.f32 %v636_v4, %v759_v6  ;;  %v257_v10 = vmul.f32 %v632_v5, %v759_v6  ;;  %v261_v16 = vmul.f32 %v640_v11, %v759_v6  ;;  %v258_v17 = vmul.f32 %v633_v9, %v759_v6 }
  0x7a   : > { %v263_v23 = vmul.f32 %v644_v18, %v759_v6  ;;  %v260_v24 = vmul.f32 %v637_v19, %v759_v6  ;;  %v265_v30 = vmul.f32 %v648_v25, %v759_v6  ;;  %v262_v31 = vmul.f32 %v641_v26, %v759_v6 }
  0x7b   : > { %v267_v37 = vmul.f32 %v652_v32, %v759_v6  ;;  %v264_v38 = vmul.f32 %v645_v33, %v759_v6  ;;  %v269_v44 = vmul.f32 %v656_v39, %v759_v6  ;;  %v266_v45 = vmul.f32 %v649_v40, %v759_v6 }
  0x7c   : > { %v274_v12 = vpop.permute.xlu0 %273  ;;  %v271_v50 = vmul.f32 %v660_v46, %v759_v6  ;;  %v268_v51 = vmul.f32 %v653_v47, %v759_v6  ;;  %v270_v55 = vmul.f32 %v657_v52, %v759_v6  ;;  %v272_v58 = vmul.f32 %v661_v56, %v759_v6 }
  0x7d   : > { %v278_v14 = vadd.f32 %v274_v12, %v259_v8  ;;  %v276_v15 = vadd.f32 %v274_v12, %v257_v10  ;;  %v280_v21 = vadd.f32 %v274_v12, %v261_v16  ;;  %v277_v22 = vadd.f32 %v274_v12, %v258_v17 }
  0x7e   : > { %v282_v28 = vadd.f32 %v274_v12, %v263_v23  ;;  %v279_v29 = vadd.f32 %v274_v12, %v260_v24  ;;  %v284_v35 = vadd.f32 %v274_v12, %v265_v30  ;;  %v281_v36 = vadd.f32 %v274_v12, %v262_v31 }
  0x7f   : > { %312 = vrot.lane.b32.xlu0 %v278_v14, %s698_s16  ;;  %308 = vrot.lane.b32.xlu1 %v276_v15, %s698_s16  ;;  %v286_v42 = vadd.f32 %v274_v12, %v267_v37  ;;  %v283_v43 = vadd.f32 %v274_v12, %v264_v38  ;;  %v288_v48 = vadd.f32 %v274_v12, %v269_v44  ;;  %v385_v31 = vlaneseq }
  0x80   : > { %v285_v49 = vadd.f32 %v274_v12, %v266_v45  ;;  %v290_v53 = vadd.f32 %v274_v12, %v271_v50  ;;  %v287_v54 = vadd.f32 %v274_v12, %v268_v51  ;;  %v289_v57 = vadd.f32 %v274_v12, %v270_v55 }
  0x81   : > { %v291_v59 = vadd.f32 %v274_v12, %v272_v58  ;;  %v238_v10 = vadd.f32 %v741_v1, %v216_v60  ;;  %v239_v6 = vadd.f32 %v741_v1, %v217_v61  ;;  %v219_v12 = vmul.f32 %v637_v19, %v734_v0 }
  0x82   : > { %v240_v14 = vadd.f32 %v741_v1, %v218_v63  ;;  %v220_v5 = vmul.f32 %v640_v11, %v734_v0  ;;  %v221_v4 = vmul.f32 %v641_v26, %v734_v0  ;;  %v222_v19 = vmul.f32 %v644_v18, %v734_v0 }
  0x83   : > { %316 = vrot.lane.b32.xlu0 %v280_v21, %s698_s16  ;;  %310 = vrot.lane.b32.xlu1 %v277_v22, %s698_s16  ;;  %v241_v2 = vadd.f32 %v741_v1, %v219_v12  ;;  %v224_v26 = vmul.f32 %v648_v25, %v734_v0  ;;  %v247_v50 = vadd.f32 %v741_v1, %v225_v13 }
  0x84   : > { %v242_v21 = vadd.f32 %v741_v1, %v220_v5  ;;  %v243_v11 = vadd.f32 %v741_v1, %v221_v4  ;;  %v244_v38 = vadd.f32 %v741_v1, %v222_v19  ;;  %v226_v40 = vmul.f32 %v652_v32, %v734_v0 }
  0x85   : > { %v229_v61 = vmul.f32 %v657_v52, %v734_v0 }
  0x87   : > { %320 = vrot.lane.b32.xlu0 %v282_v28, %s698_s16  ;;  %314 = vrot.lane.b32.xlu1 %v279_v29, %s698_s16  ;;  %v223_v28 = vmul.f32 %v645_v33, %v734_v0  ;;  %v699_v29 = vmov 1983009808   ;;  %v386_v33 = vshrl.u32 %v385_v31, 7 }
  0x88   : > { %v383_v30 = vunpack.c.l.s4 %v699_v29  ;;  %v700_v29 = vmov 1934713408  }
  0x8a   : > { %v384_v44 = vunpack.c.0.s8 %v383_v30  ;;  %v447_v30 = vunpack.c.l.s4 %v700_v29 }
  0x8b   : > { %324 = vrot.lane.b32.xlu0 %v284_v35, %s698_s16  ;;  %318 = vrot.lane.b32.xlu1 %v281_v36, %s698_s16 }
  0x8f   : > { %328 = vrot.lane.b32.xlu0 %v286_v42, %s698_s16  ;;  %322 = vrot.lane.b32.xlu1 %v283_v43, %s698_s16  ;;  %v245_v43 = vadd.f32 %v741_v1, %v223_v28 }
  0x93   : > { %332 = vrot.lane.b32.xlu0 %v288_v48, %s698_s16  ;;  %326 = vrot.lane.b32.xlu1 %v285_v49, %s698_s16  ;;  %v246_v48 = vadd.f32 %v741_v1, %v224_v26 }
  0x97   : > { %336 = vrot.lane.b32.xlu0 %v290_v53, %s698_s16  ;;  %330 = vrot.lane.b32.xlu1 %v287_v54, %s698_s16  ;;  %v387_v54 = vsub.s32 %v384_v44, %v386_v33 }
  0x9b   : > { %334 = vrot.lane.b32.xlu1 %v289_v57, %s698_s16  ;;  %v227_v57 = vmul.f32 %v653_v47, %v734_v0 }
  0x9d   : > { %v249_v27 = vadd.f32 %v741_v1, %v227_v57 }
  0x9f   : > { %338 = vrot.lane.b32.xlu1 %v291_v59, %s698_s16  ;;  %v228_v59 = vmul.f32 %v656_v39, %v734_v0 }
  0xa1   : > { %v250_v39 = vadd.f32 %v741_v1, %v228_v59 }
  0xf1   : > { %v313_v62 = vpop.permute.xlu0 %312  ;;  %v309_v8 = vpop.permute.xlu1 %308 }
  0xf2   : > { %v356_v15 = vmax.f32 %v238_v10, %v309_v8  ;;  %v358_v24 = vmax.f32 %v240_v14, %v313_v62 }
  0xf5   : > { %v317_v3 = vpop.permute.xlu0 %316  ;;  %v311_v9 = vpop.permute.xlu1 %310 }
  0xf6   : > { %v357_v16 = vmax.f32 %v239_v6, %v311_v9  ;;  %v360_v18 = vmax.f32 %v242_v21, %v317_v3  ;;  %v248_v6 = vadd.f32 %v741_v1, %v226_v40  ;;  %v251_v9 = vadd.f32 %v741_v1, %v229_v61 }
  0xf8   : > { %v372_v17 = vmax.f32 %v356_v15, %v357_v16  ;;  %v231_v15 = vmul.f32 %v661_v56, %v734_v0 }
  0xf9   : > { %v321_v22 = vpop.permute.xlu0 %320  ;;  %v315_v23 = vpop.permute.xlu1 %314 }
  0xfa   : > { %v359_v7 = vmax.f32 %v241_v2, %v315_v23  ;;  %v362_v20 = vmax.f32 %v244_v38, %v321_v22  ;;  %v253_v46 = vadd.f32 %v741_v1, %v231_v15 }
  0xfc   : > { %v373_v35 = vmax.f32 %v358_v24, %v359_v7  ;;  %v252_v7 = vadd.f32 %v741_v1, %v230_v34 }
  0xfd   : > { %v325_v36 = vpop.permute.xlu0 %324  ;;  %v319_v37 = vpop.permute.xlu1 %318 }
  0xfe   : > { %v361_v42 = vmax.f32 %v243_v11, %v319_v37  ;;  %v364_v62 = vmax.f32 %v246_v48, %v325_v36  ;;  %v448_v36 = vunpack.c.0.s8 %v447_v30 }
 0x100   : > { %v374_v45 = vmax.f32 %v360_v18, %v361_v42  ;;  %v451_v38 = vsub.s32 %v448_v36, %v386_v33 }
 0x101   : > { %v323_v49 = vpop.permute.xlu1 %322  ;;  %v329_v55 = vpop.permute.xlu0 %328 }
 0x102   : > { %v380_v25 = vcombine.low %v372_v17, %v374_v45  ;;  %v381_v51 = vcombine.high %v372_v17, %v374_v45  ;;  %v363_v53 = vmax.f32 %v245_v43, %v323_v49  ;;  %v366_v21 = vmax.f32 %v248_v6, %v329_v55 }
 0x104   : > { %v375_v58 = vmax.f32 %v362_v20, %v363_v53  ;;  %v388_v32 = vrot.slane %v380_v25, %v387_v54  ;;  %v395_v47 = vrot.slane %v381_v51, %v387_v54 }
 0x105   : > { %v327_v60 = vpop.permute.xlu1 %326  ;;  %v333_v3 = vpop.permute.xlu0 %332 }
 0x106   : > { %v396_v63 = vcombine.low %v373_v35, %v375_v58  ;;  %v397_v8 = vcombine.high %v373_v35, %v375_v58  ;;  %v365_v10 = vmax.f32 %v247_v50, %v327_v60  ;;  %v368_v24 = vmax.f32 %v250_v39, %v333_v3 }
 0x108   : > { %v404_v12 = vrot.slane %v396_v63, %v387_v54  ;;  %v411_v14 = vrot.slane %v397_v8, %v387_v54  ;;  %v376_v5 = vmax.f32 %v364_v62, %v365_v10 }
 0x109   : > { %v331_v52 = vpop.permute.xlu1 %330  ;;  %v337_v28 = vpop.permute.xlu0 %336 }
 0x10a   : > { %v444_v16 = vcombine.low %v388_v32, %v404_v12  ;;  %v445_v2 = vcombine.high %v388_v32, %v404_v12  ;;  %v460_v4 = vcombine.low %v395_v47, %v411_v14  ;;  %v461_v17 = vcombine.high %v395_v47, %v411_v14 }
 0x10b   : > { %v367_v19 = vmax.f32 %v249_v27, %v331_v52  ;;  %v370_v0 = vmax.f32 %v252_v7, %v337_v28 }
 0x10c   : > { %v468_v20 = vrot.slane %v460_v4, %v451_v38  ;;  %v475_v25 = vrot.slane %v461_v17, %v451_v38  ;;  %v452_v51 = vrot.slane %v444_v16, %v451_v38  ;;  %v459_v53 = vrot.slane %v445_v2, %v451_v38 }
 0x10d   : > { %v377_v22 = vmax.f32 %v366_v21, %v367_v19  ;;  %v335_v23 = vpop.permute.xlu1 %334 }
 0x10e   : > { %v369_v11 = vmax.f32 %v251_v9, %v335_v23 }
 0x110   : > { %v378_v31 = vmax.f32 %v368_v24, %v369_v11 }
 0x111   : > { %v339_v41 = vpop.permute.xlu1 %338 }
 0x112   : > { %v412_v56 = vcombine.low %v376_v5, %v378_v31  ;;  %v413_v35 = vcombine.high %v376_v5, %v378_v31  ;;  %v371_v26 = vmax.f32 %v253_v46, %v339_v41 }
 0x114   : > { %v379_v37 = vmax.f32 %v370_v0, %v371_v26  ;;  %v420_v42 = vrot.slane %v412_v56, %v387_v54  ;;  %v427_v43 = vrot.slane %v413_v35, %v387_v54 }
 0x116   : > { %v428_v13 = vcombine.low %v377_v22, %v379_v37  ;;  %v429_v18 = vcombine.high %v377_v22, %v379_v37 }
 0x118   : > { %v436_v44 = vrot.slane %v428_v13, %v387_v54  ;;  %v443_v45 = vrot.slane %v429_v18, %v387_v54 }
 0x11a   : > { %v476_v48 = vcombine.low %v420_v42, %v436_v44  ;;  %v477_v1 = vcombine.high %v420_v42, %v436_v44  ;;  %v492_v49 = vcombine.low %v427_v43, %v443_v45  ;;  %v493_v50 = vcombine.high %v427_v43, %v443_v45 }
 0x11c   : > { %v500_v40 = vrot.slane %v492_v49, %v451_v38  ;;  %v507_v55 = vrot.slane %v493_v50, %v451_v38  ;;  %v484_v57 = vrot.slane %v476_v48, %v451_v38  ;;  %v491_v58 = vrot.slane %v477_v1, %v451_v38 }
 0x11e   : > { %v513_v59 = vcombine.high %v468_v20, %v500_v40  ;;  %v515_v33 = vcombine.high %v475_v25, %v507_v55  ;;  %v509_v60 = vcombine.high %v452_v51, %v484_v57  ;;  %v511_v61 = vcombine.high %v459_v53, %v491_v58 }
 0x11f   : > { %v514_v62 = vcombine.low %v475_v25, %v507_v55  ;;  %v512_v54 = vcombine.low %v468_v20, %v500_v40  ;;  %v510_v63 = vcombine.low %v459_v53, %v491_v58  ;;  %v508_v8 = vcombine.low %v452_v51, %v484_v57 }
 0x120   : > { %v685_v10 = vpack.i.bf16 %v515_v33, %v513_v59  ;;  %v680_v32 = vpack.i.bf16 %v511_v61, %v509_v60 }
 0x122   : > { %686 = vrot.lane.b32.xlu1 %v685_v10, %s698_s16  ;;  %681 = vrot.lane.b32.xlu0 %v680_v32, %s698_s16 }
 0x194   : > { %v687_v6 = vpop.permute.xlu1 %686  ;;  %v682_v27 = vpop.permute.xlu0 %681 }
 0x195   : > { %v689_v47 = vunpack.i.h.bf16 %v687_v6  ;;  %v688_v12 = vunpack.i.l.bf16 %v687_v6  ;;  %v684_v14 = vunpack.i.h.bf16 %v682_v27  ;;  %v683_v5 = vunpack.i.l.bf16 %v682_v27 }
 0x197   : > { %v536_v39 = vsel %vm532_vm0, %v514_v62, %v689_v47  ;;  %v535_v3 = vsel %vm532_vm0, %v512_v54, %v688_v12  ;;  %v534_v34 = vsel %vm532_vm0, %v510_v63, %v684_v14  ;;  %v533_v52 = vsel %vm532_vm0, %v508_v8, %v683_v5 }
 0x198   : > { %v629_v9 = vpack.c.bf16 %v536_v39, %v535_v3  ;;  %v628_v15 = vpack.c.bf16 %v534_v34, %v533_v52 }
 0x19a   : > { %554 = vst [vmem:[%s175_s27 + $0x8] sm:$0xff] %v629_v9  ;;  %553 = vst [vmem:[%s175_s27] sm:$0xff] %v628_v15 }
 0x19b PF: > { %s13_s12 = sadd.s32 1, %s696_s12  }
 0x19c   : > { %p10_p5 = scmp.ge.s32.totalorder %s13_s12, 4  }
 0x19e   :  { %12 = sbr.rel (!%p10_p5) target bundleno = 1 (0x1), region = 62 }

// kernel: fully_cnn_forward.9
= control target key start
LH: loop header
LB: loop body
LE: loop exit
PB: predicated region body
PF: predicated region fallthrough
CT: control target
= control target key end

     0   :  { %v351_v3 = vmov 1983009808   ;;  %v200_v5 = vlaneseq  ;;  %v352_v6 = vmov 1934713408   ;;  %s544_s0 = inlined_call_operand.vmem [shape: bf16[8,2,4,256], index: 0, kind: input, shape index: {}]   ;;  %s545_s1 = inlined_call_operand.vmem [shape: f32[1,128], index: 1, kind: input, shape index: {}]   ;;  %s546_s2 = inlined_call_operand.vmem [shape: f32[1,128], index: 2, kind: input, shape index: {}]   ;;  %s547_s3 = inlined_call_operand.vmem [shape: bf16[8,512], index: 3, kind: output, shape index: {}]  }
   0x1   :  { %v376_v0 = vld [vmem:[%s544_s0] sm:$0xff]   ;;  %v381_v1 = vld [vmem:[%s544_s0 + $0x8] sm:$0xff]   ;;  %v386_v2 = vld [vmem:[%s544_s0 + $0x10] sm:$0xff]   ;;  %v388_v4 = vunpack.c.l.s4 %v351_v3  ;;  %v390_v7 = vunpack.c.l.s4 %v352_v6 }
   0x2   :  { %v312_v8 = vunpack.c.l.bf16 %v376_v0  ;;  %v313_v9 = vunpack.c.h.bf16 %v376_v0  ;;  %v316_v10 = vunpack.c.l.bf16 %v381_v1  ;;  %v317_v11 = vunpack.c.h.bf16 %v381_v1  ;;  %v344_v12 = vld [vmem:[%s544_s0 + $0x18] sm:$0xff]   ;;  %v345_v13 = vld [vmem:[%s544_s0 + $0x20] sm:$0xff]   ;;  %v346_v14 = vld [vmem:[%s544_s0 + $0x28] sm:$0xff]  }
   0x3   :  { %v320_v15 = vunpack.c.l.bf16 %v386_v2  ;;  %v321_v16 = vunpack.c.h.bf16 %v386_v2  ;;  %v324_v17 = vunpack.c.l.bf16 %v344_v12  ;;  %v325_v18 = vunpack.c.h.bf16 %v344_v12  ;;  %v347_v19 = vld [vmem:[%s544_s0 + $0x30] sm:$0xff]   ;;  %v348_v20 = vld [vmem:[%s544_s0 + $0x38] sm:$0xff]   ;;  %v416_v21 = vld [vmem:[%s545_s1] ss:$0 sm:$0xff] }
   0x4   :  { %v328_v22 = vunpack.c.l.bf16 %v345_v13  ;;  %v329_v23 = vunpack.c.h.bf16 %v345_v13  ;;  %v332_v24 = vunpack.c.l.bf16 %v346_v14  ;;  %v333_v25 = vunpack.c.h.bf16 %v346_v14  ;;  %v425_v34 = vld [vmem:[%s546_s2] ss:$0 sm:$0xff] }
   0x5   :  { %v336_v26 = vunpack.c.l.bf16 %v347_v19  ;;  %v337_v27 = vunpack.c.h.bf16 %v347_v19  ;;  %v340_v28 = vunpack.c.l.bf16 %v348_v20  ;;  %v341_v29 = vunpack.c.h.bf16 %v348_v20 }
   0x6   :  { %v54_v30 = vmul.f32 %v312_v8, %v416_v21  ;;  %v55_v31 = vmul.f32 %v313_v9, %v416_v21  ;;  %v56_v32 = vmul.f32 %v316_v10, %v416_v21  ;;  %v57_v33 = vmul.f32 %v317_v11, %v416_v21 }
   0x7   :  { %v58_v35 = vmul.f32 %v320_v15, %v416_v21  ;;  %v59_v36 = vmul.f32 %v321_v16, %v416_v21  ;;  %v60_v37 = vmul.f32 %v324_v17, %v416_v21  ;;  %v61_v38 = vmul.f32 %v325_v18, %v416_v21 }
   0x8   :  { %v62_v39 = vmul.f32 %v328_v22, %v416_v21  ;;  %v63_v40 = vmul.f32 %v329_v23, %v416_v21  ;;  %v64_v41 = vmul.f32 %v332_v24, %v416_v21  ;;  %v65_v42 = vmul.f32 %v333_v25, %v416_v21 }
   0x9   :  { %v66_v43 = vmul.f32 %v336_v26, %v416_v21  ;;  %v67_v44 = vmul.f32 %v337_v27, %v416_v21  ;;  %v68_v45 = vmul.f32 %v340_v28, %v416_v21  ;;  %v69_v46 = vmul.f32 %v341_v29, %v416_v21 }
   0xa   :  { %v440_v47 = vadd.f32 %v425_v34, %v54_v30  ;;  %v443_v48 = vadd.f32 %v425_v34, %v55_v31  ;;  %v446_v49 = vadd.f32 %v425_v34, %v56_v32  ;;  %v449_v50 = vadd.f32 %v425_v34, %v57_v33 }
   0xb   :  { %v452_v51 = vadd.f32 %v425_v34, %v58_v35  ;;  %v455_v52 = vadd.f32 %v425_v34, %v59_v36  ;;  %v458_v53 = vadd.f32 %v425_v34, %v60_v37  ;;  %v461_v54 = vadd.f32 %v425_v34, %v61_v38 }
   0xc   :  { %v464_v55 = vadd.f32 %v425_v34, %v62_v39  ;;  %v467_v56 = vadd.f32 %v425_v34, %v63_v40  ;;  %v470_v57 = vadd.f32 %v425_v34, %v64_v41  ;;  %v473_v58 = vadd.f32 %v425_v34, %v65_v42 }
   0xd   :  { %v476_v59 = vadd.f32 %v425_v34, %v66_v43  ;;  %v479_v60 = vadd.f32 %v425_v34, %v67_v44  ;;  %v482_v61 = vadd.f32 %v425_v34, %v68_v45  ;;  %v485_v62 = vadd.f32 %v425_v34, %v69_v46 }
   0xe   :  { %v108_v63 = vrot.slane %v312_v8, 4  ;;  %v109_v0 = vrot.slane %v313_v9, 4  ;;  %v110_v1 = vrot.slane %v316_v10, 4  ;;  %v111_v2 = vrot.slane %v317_v11, 4 }
   0xf   :  { %v112_v3 = vrot.slane %v320_v15, 4  ;;  %v113_v6 = vrot.slane %v321_v16, 4  ;;  %v114_v12 = vrot.slane %v324_v17, 4  ;;  %v115_v13 = vrot.slane %v325_v18, 4 }
  0x10   :  { %v116_v14 = vrot.slane %v328_v22, 4  ;;  %v117_v19 = vrot.slane %v329_v23, 4  ;;  %v118_v20 = vrot.slane %v332_v24, 4  ;;  %v119_v30 = vrot.slane %v333_v25, 4 }
  0x11   :  { %v120_v31 = vrot.slane %v336_v26, 4  ;;  %v121_v32 = vrot.slane %v337_v27, 4  ;;  %v122_v33 = vrot.slane %v340_v28, 4  ;;  %v123_v35 = vrot.slane %v341_v29, 4 }
  0x12   :  { %v140_v36 = vmul.f32 %v416_v21, %v108_v63  ;;  %v141_v37 = vmul.f32 %v416_v21, %v109_v0  ;;  %v142_v8 = vmul.f32 %v416_v21, %v110_v1  ;;  %v143_v9 = vmul.f32 %v416_v21, %v111_v2 }
  0x13   :  { %v144_v10 = vmul.f32 %v416_v21, %v112_v3  ;;  %v145_v11 = vmul.f32 %v416_v21, %v113_v6  ;;  %v146_v15 = vmul.f32 %v416_v21, %v114_v12  ;;  %v147_v16 = vmul.f32 %v416_v21, %v115_v13 }
  0x14   :  { %v148_v17 = vmul.f32 %v416_v21, %v116_v14  ;;  %v149_v18 = vmul.f32 %v416_v21, %v117_v19  ;;  %v150_v22 = vmul.f32 %v416_v21, %v118_v20  ;;  %v151_v23 = vmul.f32 %v416_v21, %v119_v30 }
  0x15   :  { %v152_v24 = vmul.f32 %v416_v21, %v120_v31  ;;  %v153_v25 = vmul.f32 %v416_v21, %v121_v32  ;;  %v154_v26 = vmul.f32 %v416_v21, %v122_v33  ;;  %v155_v27 = vmul.f32 %v416_v21, %v123_v35 }
  0x16   :  { %v156_v28 = vadd.f32 %v425_v34, %v140_v36  ;;  %v157_v29 = vadd.f32 %v425_v34, %v141_v37  ;;  %v158_v38 = vadd.f32 %v425_v34, %v142_v8  ;;  %v159_v39 = vadd.f32 %v425_v34, %v143_v9 }
  0x17   :  { %v160_v40 = vadd.f32 %v425_v34, %v144_v10  ;;  %v161_v41 = vadd.f32 %v425_v34, %v145_v11  ;;  %v162_v42 = vadd.f32 %v425_v34, %v146_v15  ;;  %v163_v43 = vadd.f32 %v425_v34, %v147_v16 }
  0x18   :  { %v164_v44 = vadd.f32 %v425_v34, %v148_v17  ;;  %v165_v21 = vadd.f32 %v425_v34, %v149_v18  ;;  %v166_v45 = vadd.f32 %v425_v34, %v150_v22  ;;  %v167_v46 = vadd.f32 %v425_v34, %v151_v23 }
  0x19   :  { %v168_v63 = vadd.f32 %v425_v34, %v152_v24  ;;  %v169_v0 = vadd.f32 %v425_v34, %v153_v25  ;;  %v170_v1 = vadd.f32 %v425_v34, %v154_v26  ;;  %v171_v2 = vadd.f32 %v425_v34, %v155_v27 }
  0x1a   :  { %v172_v3 = vmax.f32 %v440_v47, %v156_v28  ;;  %v173_v6 = vmax.f32 %v443_v48, %v157_v29  ;;  %v174_v12 = vmax.f32 %v446_v49, %v158_v38  ;;  %v175_v13 = vmax.f32 %v449_v50, %v159_v39 }
  0x1b   :  { %v176_v14 = vmax.f32 %v452_v51, %v160_v40  ;;  %v177_v19 = vmax.f32 %v455_v52, %v161_v41  ;;  %v178_v20 = vmax.f32 %v458_v53, %v162_v42  ;;  %v179_v30 = vmax.f32 %v461_v54, %v163_v43 }
  0x1c   :  { %v180_v31 = vmax.f32 %v464_v55, %v164_v44  ;;  %v181_v34 = vmax.f32 %v467_v56, %v165_v21  ;;  %v182_v47 = vmax.f32 %v470_v57, %v166_v45  ;;  %v183_v48 = vmax.f32 %v473_v58, %v167_v46 }
  0x1d   :  { %v184_v49 = vmax.f32 %v476_v59, %v168_v63  ;;  %v185_v50 = vmax.f32 %v479_v60, %v169_v0  ;;  %v186_v51 = vmax.f32 %v482_v61, %v170_v1  ;;  %v187_v52 = vmax.f32 %v485_v62, %v171_v2 }
  0x1e   :  { %v188_v32 = vmax.f32 %v172_v3, %v173_v6  ;;  %v189_v53 = vmax.f32 %v174_v12, %v175_v13  ;;  %v190_v33 = vmax.f32 %v176_v14, %v177_v19  ;;  %v191_v54 = vmax.f32 %v178_v20, %v179_v30 }
  0x1f   :  { %v192_v35 = vmax.f32 %v180_v31, %v181_v34  ;;  %v193_v55 = vmax.f32 %v182_v47, %v183_v48  ;;  %v194_v36 = vmax.f32 %v184_v49, %v185_v50  ;;  %v195_v56 = vmax.f32 %v186_v51, %v187_v52 }
  0x20   :  { %v196_v37 = vcombine.low %v188_v32, %v190_v33  ;;  %v199_v57 = vunpack.c.0.s8 %v388_v4  ;;  %v201_v58 = vshrl.u32 %v200_v5, 7  ;;  %v204_v59 = vcombine.low %v189_v53, %v191_v54 }
  0x21   :  { %v216_v60 = vunpack.c.0.s8 %v390_v7  ;;  %v230_v8 = vcombine.low %v192_v35, %v194_v36  ;;  %v238_v61 = vcombine.low %v193_v55, %v195_v56 }
  0x22   :  { %v202_v9 = vsub.s32 %v199_v57, %v201_v58 }
  0x23   :  { %v219_v62 = vsub.s32 %v216_v60, %v201_v58 }
  0x24   :  { %v203_v10 = vrot.slane %v196_v37, %v202_v9  ;;  %v211_v11 = vrot.slane %v204_v59, %v202_v9  ;;  %v237_v15 = vrot.slane %v230_v8, %v202_v9  ;;  %v245_v16 = vrot.slane %v238_v61, %v202_v9 }
  0x26   :  { %v212_v17 = vcombine.low %v203_v10, %v211_v11  ;;  %v213_v18 = vcombine.high %v203_v10, %v211_v11  ;;  %v246_v22 = vcombine.low %v237_v15, %v245_v16  ;;  %v247_v23 = vcombine.high %v237_v15, %v245_v16 }
  0x28   :  { %v220_v24 = vrot.slane %v212_v17, %v219_v62  ;;  %v227_v25 = vrot.slane %v213_v18, %v219_v62  ;;  %v254_v4 = vrot.slane %v246_v22, %v219_v62  ;;  %v261_v26 = vrot.slane %v247_v23, %v219_v62 }
  0x2a   :  { %v266_v5 = vcombine.low %v220_v24, %v254_v4  ;;  %v304_v27 = vcombine.high %v220_v24, %v254_v4  ;;  %v274_v28 = vcombine.low %v227_v25, %v261_v26  ;;  %v305_v7 = vcombine.high %v227_v25, %v261_v26 }
  0x2c   :  { %v308_v29 = vpack.c.bf16 %v304_v27, %v266_v5  ;;  %v309_v38 = vpack.c.bf16 %v305_v7, %v274_v28 }
  0x2e   :  { %296 = vst [vmem:[%s547_s3] sm:$0xff] %v308_v29  ;;  %297 = vst [vmem:[%s547_s3 + $0x8] sm:$0xff] %v309_v38 }

// kernel: fully_cnn_forward.8
= control target key start
LH: loop header
LB: loop body
LE: loop exit
PB: predicated region body
PF: predicated region fallthrough
CT: control target
= control target key end

     0   :  { %s3368_s15 = smov 0   ;;  %s3370_s16 = smov 0   ;;  %s4123_s0 = inlined_call_operand.vmem [shape: bf16[2,12,12,64], index: 0, kind: input, shape index: {}]   ;;  %s4124_s1 = inlined_call_operand.vmem [shape: bf16[5,320,128], index: 1, kind: input, shape index: {}]   ;;  %s4125_s2 = inlined_call_operand.vmem [shape: f32[1,128], index: 2, kind: input, shape index: {}]   ;;  %s4126_s3 = inlined_call_operand.vmem [shape: bf16[128,128], index: 3, kind: output, shape index: {0}]   ;;  %s4127_s4 = inlined_call_operand.vmem [shape: f32[2,2,128], index: 4, kind: output, shape index: {1}]  }
   0x1   :  { %s3372_s17 = smov 0  }
   0x2 LB: > { %s27_s18 = sadd.s32 1, %s3336_s16  ;;  %p2414_p0 = scmp.ge.s32.totalorder %s3340_s17, 1  ;;  %s3340_s17 = sphi %s3372_s17, %s15_s17   ;;  %s3336_s16 = sphi %s3370_s16, %s4129_s16   ;;  %s3332_s15 = sphi %s3368_s15, %s4128_s15  }
   0x3   : > { %p29_p1 = scmp.ge.s32.totalorder %s27_s18, 2  ;;  %p181_p2 = scmp.lt.s32.totalorder %s3340_s17, 3 }
   0x5   : > { %s4131_s18 = smov (%p29_p1, %s27_s18), 0  ;;  %p182_p3 = pnand %p2414_p0, %p181_p2 }
   0x6   : > { %p213_p4 = scmp.lt.s32.totalorder (!%p182_p3), %s3332_s15, 1  ;;  %v3215_v0 = vld [vmem:[%s4124_s1 + $0xe0] sm:$0xff] (!%p182_p3)   ;;  %v3218_v2 = vld [vmem:[%s4124_s1 + $0xe8] sm:$0xff] (!%p182_p3)   ;;  %v3220_v4 = vld [vmem:[%s4124_s1 + $0xf0] sm:$0xff] (!%p182_p3)   ;;  %s3342_s10 = smov (!%p182_p3), 64   ;;  %vm425_vm0 = vcmask (!%p182_p3), 523264  }
   0x7   : > { %185 = sbr.rel (%p182_p3) target bundleno = 514 (0x202), region = 32  ;;  %v3216_v1 = vld [vmem:[%s4124_s1 + $0xa0] sm:$0xff] (!%p182_p3)   ;;  %2786 = vmatprep.subr.bf16.mxu0 (!%p182_p3), %v3215_v0  ;;  %v3219_v3 = vld [vmem:[%s4124_s1 + $0xa8] sm:$0xff] (!%p182_p3)   ;;  %v3221_v5 = vld [vmem:[%s4124_s1 + $0xb0] sm:$0xff] (!%p182_p3)   ;;  %vm2305_vm1 = vcmask (!%p182_p3), 1040384  }
   0x8   : > { %2787 = vmatpush3.bf16.msra.mxu0 (!%p182_p3), %v3216_v1  ;;  %v3222_v51 = vld [vmem:[%s4124_s1 + $0xf8] sm:$0xff] (!%p182_p3)   ;;  %v3224_v63 = vld [vmem:[%s4124_s1 + $0x120] sm:$0xff] (!%p182_p3)  }
   0x9   : > { %2788 = vmatprep.subr.bf16.mxu0 (!%p182_p3), %v3218_v2  ;;  %v3223_v52 = vld [vmem:[%s4124_s1 + $0xb8] sm:$0xff] (!%p182_p3)   ;;  %v3225_v0 = vld [vmem:[%s4124_s1 + $0x100] sm:$0xff] (!%p182_p3)   ;;  %3026 = vmatprep.subr.bf16.mxu1 (!%p182_p3), %v3224_v63 }
   0xa   : > { %3027 = vmatpush3.bf16.msra.mxu1 (!%p182_p3), %v3224_v63 }
   0xc   : > { %2789 = vmatpush3.bf16.msra.mxu0 (!%p182_p3), %v3219_v3 }
   0xd   : > { %2790 = vmatprep.subr.bf16.mxu0 (!%p182_p3), %v3220_v4 }
   0xe   : > { %s3393_s21 = scalar_select %p213_p4, %s3332_s15, 1 }
  0x10   : > { %s3178_s26 = smul.u32 96, %s3393_s21  ;;  %2791 = vmatpush3.bf16.msra.mxu0 %v3221_v5  ;;  %s2418_s5 = sshll.u32 %s3393_s21, 1 }
  0x11   : > { %2792 = vmatprep.subr.bf16.mxu0 %v3222_v51  ;;  %s230_s9 = scalar_lea.vmem %s4127_s4, %s2418_s5 }
  0x12   : > { %s3411_s7 = scalar_lea.vmem %s4123_s0, %s3178_s26 }
  0x13   : > { %v3417_v6 = vld [vmem:[%s3411_s7 + $0x8] sm:$0xf]  ;;  %v236_v7 = vld [vmem:[%s3411_s7 + $0xc] sm:$0x3]  ;;  %v3421_v8 = vld [vmem:[%s3411_s7 + $0x10] sm:$0xf] }
  0x14   : > { %v3424_v9 = vcombine.low %v3417_v6, %v236_v7  ;;  %v238_v10 = vld [vmem:[%s3411_s7 + $0x14] sm:$0x3]  ;;  %v3428_v11 = vld [vmem:[%s3411_s7 + $0x18] sm:$0xf]  ;;  %v240_v12 = vld [vmem:[%s3411_s7 + $0x1c] sm:$0x3]  ;;  %2793 = vmatpush3.bf16.msra.mxu0 %v3223_v52 }
  0x15   : > { %v3432_v13 = vcombine.low %v3421_v8, %v238_v10  ;;  %v3435_v14 = vcombine.low %v3428_v11, %v240_v12  ;;  %v3438_v15 = vld [vmem:[%s3411_s7 + $0x20] sm:$0xf]  ;;  %v242_v16 = vld [vmem:[%s3411_s7 + $0x24] sm:$0x3]  ;;  %v3452_v28 = vld [vmem:[%s3411_s7 + $0x28] sm:$0xf]  ;;  %2794 = vmatprep.subr.bf16.mxu0 %v3225_v0 }
  0x16   : > { %v305_v17 = vshrl.u32 %v3424_v9, 16  ;;  %v307_v18 = vshll.u32 %v3424_v9, 16  ;;  %v3444_v19 = vcombine.low %v3438_v15, %v242_v16  ;;  %v244_v32 = vld [vmem:[%s3411_s7 + $0x2c] sm:$0x3]  ;;  %v3457_v36 = vld [vmem:[%s3411_s7 + $0x30] sm:$0xf] }
  0x17   : > { %v312_v20 = vshrl.u32 %v3432_v13, 16  ;;  %v314_v21 = vshll.u32 %v3432_v13, 16  ;;  %v319_v22 = vshrl.u32 %v3435_v14, 16  ;;  %v321_v23 = vshll.u32 %v3435_v14, 16  ;;  %v246_v37 = vld [vmem:[%s3411_s7 + $0x34] sm:$0x3] }
  0x18   : > { %v380_v24 = vrot.slane %v305_v17, 1  ;;  %v381_v25 = vrot.slane %v307_v18, 2  ;;  %v309_v26 = vrot.slane %v307_v18, 1  ;;  %v326_v27 = vshrl.u32 %v3444_v19, 16  ;;  %v3461_v41 = vld [vmem:[%s3411_s7 + $0x38] sm:$0xf] }
  0x19   : > { %v383_v29 = vrot.slane %v312_v20, 1  ;;  %v384_v30 = vrot.slane %v314_v21, 2  ;;  %v316_v31 = vrot.slane %v314_v21, 1  ;;  %v328_v35 = vshll.u32 %v3444_v19, 16  ;;  %v248_v42 = vld [vmem:[%s3411_s7 + $0x3c] sm:$0x3] }
  0x1a   : > { %v382_v33 = vor.u32 %v381_v25, %v380_v24  ;;  %v310_v34 = vor.u32 %v309_v26, %v305_v17  ;;  %v386_v39 = vrot.slane %v319_v22, 1  ;;  %v387_v40 = vrot.slane %v321_v23, 2  ;;  %v3473_v48 = vld [vmem:[%s3411_s7 + $0x40] sm:$0xf]  ;;  %v250_v50 = vld [vmem:[%s3411_s7 + $0x44] sm:$0x3] }
  0x1b   : > { %v385_v38 = vor.u32 %v384_v30, %v383_v29  ;;  %v317_v43 = vor.u32 %v316_v31, %v312_v20  ;;  %v389_v44 = vrot.slane %v326_v27, 1  ;;  %v390_v45 = vrot.slane %v328_v35, 2  ;;  %v3502_v3 = vld [vmem:[%s3411_s7] sm:$0xf]  ;;  %v234_v4 = vld [vmem:[%s3411_s7 + $0x4] sm:$0x3] }
  0x1c   : > { %403 = vrot.lane.b32.xlu0 %v382_v33, %s3342_s10  ;;  %355 = vrot.lane.b32.xlu1 %v310_v34, %s3342_s10  ;;  %v3467_v46 = vcombine.low %v3452_v28, %v244_v32  ;;  %v3470_v47 = vcombine.low %v3457_v36, %v246_v37  ;;  %v3476_v49 = vcombine.low %v3461_v41, %v248_v42  ;;  %v323_v54 = vrot.slane %v321_v23, 1  ;;  %v3508_v16 = vld [vmem:[%s3411_s7 + $0x48] sm:$0xf]  ;;  %v252_v17 = vld [vmem:[%s3411_s7 + $0x4c] sm:$0x3] }
  0x1d   : > { %v388_v53 = vor.u32 %v387_v40, %v386_v39  ;;  %v391_v57 = vor.u32 %v390_v45, %v389_v44  ;;  %v330_v58 = vrot.slane %v328_v35, 1  ;;  %v3493_v62 = vcombine.low %v3473_v48, %v250_v50  ;;  %v3226_v20 = vld [vmem:[%s4124_s1 + $0xc0] sm:$0xff]   ;;  %v3228_v23 = vld [vmem:[%s4124_s1 + $0x108] sm:$0xff]   ;;  %v253_v31 = vld [vmem:[%s3411_s7 + $0x50] sm:$0xf] }
  0x1e   : > { %v333_v55 = vshrl.u32 %v3467_v46, 16  ;;  %v335_v56 = vshll.u32 %v3467_v46, 16  ;;  %v340_v59 = vshrl.u32 %v3470_v47, 16  ;;  %v342_v60 = vshll.u32 %v3470_v47, 16  ;;  %2795 = vmatpush3.bf16.msra.mxu0 %v3226_v20  ;;  %v254_v35 = vld [vmem:[%s3411_s7 + $0x54] sm:$0x3] }
  0x1f   : > { %v347_v61 = vshrl.u32 %v3476_v49, 16  ;;  %v324_v5 = vor.u32 %v323_v54, %v319_v22  ;;  %v331_v7 = vor.u32 %v330_v58, %v326_v27  ;;  %v349_v18 = vshll.u32 %v3476_v49, 16  ;;  %v3227_v22 = vld [vmem:[%s4124_s1 + $0x128] sm:$0xff]   ;;  %2796 = vmatprep.subr.bf16.mxu0 %v3228_v23  ;;  %v3230_v40 = vld [vmem:[%s4124_s1 + $0x130] sm:$0xff]   ;;  %v3233_v0 = vld [vmem:[%s4124_s1 + $0x138] sm:$0xff]  }
  0x20   : > { %405 = vrot.lane.b32.xlu0 %v385_v38, %s3342_s10  ;;  %357 = vrot.lane.b32.xlu1 %v317_v43, %s3342_s10  ;;  %v392_v1 = vrot.slane %v333_v55, 1  ;;  %v393_v2 = vrot.slane %v335_v56, 2  ;;  %v395_v10 = vrot.slane %v340_v59, 1  ;;  %v396_v12 = vrot.slane %v342_v60, 2  ;;  %v3229_v39 = vld [vmem:[%s4124_s1 + $0xc8] sm:$0xff]   ;;  %v3231_v52 = vld [vmem:[%s4124_s1 + $0x110] sm:$0xff]  }
  0x21   : > { %v560_v21 = vshrl.u32 %v3493_v62, 16  ;;  %v337_v24 = vrot.slane %v335_v56, 1  ;;  %v344_v25 = vrot.slane %v342_v60, 1  ;;  %v562_v26 = vshll.u32 %v3493_v62, 16  ;;  %3028 = vmatprep.subr.bf16.mxu1 %v3227_v22  ;;  %v3235_v20 = vld [vmem:[%s4124_s1 + $0xd8] sm:$0xff]  }
  0x22   : > { %v394_v27 = vor.u32 %v393_v2, %v392_v1  ;;  %v397_v29 = vor.u32 %v396_v12, %v395_v10  ;;  %v3526_v30 = vcombine.low %v3502_v3, %v234_v4  ;;  %v398_v32 = vrot.slane %v347_v61, 1  ;;  %3029 = vmatpush3.bf16.msra.mxu1 %v3227_v22  ;;  %2797 = vmatpush3.bf16.msra.mxu0 %v3229_v39 }
  0x23   : > { %v399_v33 = vrot.slane %v349_v18, 2  ;;  %v3532_v34 = vcombine.low %v3508_v16, %v252_v17  ;;  %v569_v37 = vrot.slane %v560_v21, 1  ;;  %v351_v38 = vrot.slane %v349_v18, 1  ;;  %3030 = vmatprep.subr.bf16.mxu1 %v3230_v40  ;;  %2798 = vmatprep.subr.bf16.mxu0 %v3231_v52  ;;  %v255_v17 = vld [vmem:[%s3411_s7 + $0x58] sm:$0xf] }
  0x24   : > { %407 = vrot.lane.b32.xlu0 %v388_v53, %s3342_s10  ;;  %409 = vrot.lane.b32.xlu1 %v391_v57, %s3342_s10  ;;  %v338_v42 = vor.u32 %v337_v24, %v333_v55  ;;  %v345_v43 = vor.u32 %v344_v25, %v340_v59  ;;  %v570_v44 = vrot.slane %v562_v26, 2  ;;  %v564_v45 = vrot.slane %v562_v26, 1  ;;  %v3232_v57 = vld [vmem:[%s4124_s1 + $0xd0] sm:$0xff]   ;;  %v256_v18 = vld [vmem:[%s3411_s7 + $0x5c] sm:$0x3] }
  0x25   : > { %v298_v50 = vshrl.u32 %v3526_v30, 16  ;;  %v3546_v51 = vcombine.low %v253_v31, %v254_v35  ;;  %v417_v53 = vrot.slane %v3526_v30, 2  ;;  %v418_v54 = vrot.slane %v3424_v9, 2  ;;  %v3236_v24 = vld [vmem:[%s4124_s1 + $0x40] sm:$0xff]  }
  0x26   : > { %v300_v55 = vshll.u32 %v3526_v30, 16  ;;  %v1197_v56 = vshrl.u32 %v3532_v34, 16  ;;  %3031 = vmatpush3.bf16.msra.mxu1 %v3230_v40  ;;  %v419_v58 = vrot.slane %v3432_v13, 2  ;;  %v400_v60 = vor.u32 %v399_v33, %v398_v32  ;;  %2799 = vmatpush3.bf16.msra.mxu0 %v3232_v57 }
  0x27   : > { %v3559_v59 = vcombine.low %v417_v53, %v418_v54  ;;  %v571_v63 = vor.u32 %v570_v44, %v569_v37  ;;  %v420_v1 = vrot.slane %v3435_v14, 2  ;;  %v1199_v2 = vshll.u32 %v3532_v34, 16  ;;  %3032 = vmatprep.subr.bf16.mxu1 %v3233_v0  ;;  %v3239_v37 = vld [vmem:[%s4124_s1 + $0x48] sm:$0xff]  }
  0x28   : > { %359 = vrot.lane.b32.xlu0 %v324_v5, %s3342_s10  ;;  %361 = vrot.lane.b32.xlu1 %v331_v7, %s3342_s10  ;;  %v1536_v4 = vshrl.u32 %v3546_v51, 16  ;;  %v3234_v5 = vld [vmem:[%s4124_s1 + $0x118] sm:$0xff]   ;;  %v2470_v7 = vcombine.low %v418_v54, %v419_v58  ;;  %v421_v10 = vrot.slane %v3444_v19, 2  ;;  %v1538_v12 = vshll.u32 %v3546_v51, 16 }
  0x29   : > { %v3579_v22 = vcombine.low %v419_v58, %v420_v1  ;;  %v377_v23 = vrot.slane %v298_v50, 1  ;;  %2800 = vmatprep.subr.bf16.mxu0 %v3234_v5  ;;  %v352_v26 = vor.u32 %v351_v38, %v347_v61  ;;  %v565_v31 = vor.u32 %v564_v45, %v560_v21  ;;  %v3238_v61 = vld [vmem:[%s4124_s1 + $0x180] sm:$0xff]   ;;  %v3247_v5 = vld [vmem:[%s4124_s1 + $0x58] sm:$0xff]  }
  0x2a   : > { %3033 = vmatpush3.bf16.msra.mxu1 %v3233_v0  ;;  %v3588_v25 = vcombine.low %v420_v1, %v421_v10  ;;  %3034 = vmatprep.mubr.msk.bf16.mxu1 %vm425_vm0, %v2470_v7  ;;  %v302_v32 = vrot.slane %v300_v55, 1  ;;  %v1206_v33 = vrot.slane %v1197_v56, 1  ;;  %v1207_v35 = vrot.slane %v1199_v2, 2 }
  0x2b   : > { %2801 = vmatpush3.bf16.msra.mxu0 %v3235_v20  ;;  %2834 = vmatprep.subr.bf16.mxu1 %v3236_v24  ;;  %v422_v38 = vrot.slane %v3467_v46, 2  ;;  %v1201_v39 = vrot.slane %v1199_v2, 1  ;;  %v3609_v40 = vcombine.low %v255_v17, %v256_v18  ;;  %v423_v21 = vrot.slane %v3470_v47, 2  ;;  %v3245_v2 = vld [vmem:[%s4124_s1 + $0x10] sm:$0xff]   ;;  %v3249_v20 = vld [vmem:[%s4124_s1 + $0x18] sm:$0xff]  }
  0x2c   : > { %411 = vrot.lane.b32.xlu0 %v394_v27, %s3342_s10  ;;  %413 = vrot.lane.b32.xlu1 %v397_v29, %s3342_s10  ;;  %v378_v27 = vrot.slane %v300_v55, 2  ;;  %v3237_v29 = vld [vmem:[%s4124_s1] sm:$0xff]   ;;  %v303_v45 = vor.u32 %v302_v32, %v298_v50  ;;  %v574_v53 = vrot.slane %v3493_v62, 2  ;;  %v3243_v55 = vld [vmem:[%s4124_s1 + $0x50] sm:$0xff]   ;;  %v1545_v57 = vrot.slane %v1536_v4, 1 }
  0x2d   : > { %3035 = vmatmul.mubr.msk.bf16.vlgmr.msra.gmra.mrb[0].mxu1 %vm425_vm0, %v3588_v25  ;;  %2882 = vmatprep.subr.bf16.mxu0 %v3238_v61  ;;  %v3626_v52 = vcombine.low %v422_v38, %v423_v21  ;;  %v1875_v54 = vshrl.u32 %v3609_v40, 16  ;;  %v1546_v58 = vrot.slane %v1538_v12, 2  ;;  %v1540_v0 = vrot.slane %v1538_v12, 1  ;;  %v3261_v32 = vld [vmem:[%s4124_s1 + $0x30] sm:$0xff]   ;;  %v3692_v61 = vld [vmem:[%s4124_s1 + $0x80] sm:$0xff]  }
  0x2e   : > { %2835 = vmatpush3.bf16.msra.mxu1 %v3237_v29  ;;  %v379_v44 = vor.u32 %v378_v27, %v377_v23  ;;  %v1877_v1 = vshll.u32 %v3609_v40, 16  ;;  %v3251_v23 = vld [vmem:[%s4124_s1 + $0x60] sm:$0xff]   ;;  %v3255_v27 = vld [vmem:[%s4124_s1 + $0x68] sm:$0xff]  }
  0x2f   : > { %2836 = vmatprep.subr.bf16.mxu1 %v3239_v37  ;;  %3038 = vmatprep.mubr.msk.bf16.mxu1 %vm425_vm0, %v3626_v52  ;;  %v1884_v7 = vrot.slane %v1875_v54, 1  ;;  %v1541_v12 = vor.u32 %v1540_v0, %v1536_v4  ;;  %v3253_v4 = vld [vmem:[%s4124_s1 + $0x20] sm:$0xff]   ;;  %v3257_v29 = vld [vmem:[%s4124_s1 + $0x28] sm:$0xff]   ;;  %v3699_v37 = vcombine.low %v421_v10, %v422_v38 }
  0x30   : > { %363 = vrot.lane.b32.xlu0 %v338_v42, %s3342_s10  ;;  %365 = vrot.lane.b32.xlu1 %v345_v43, %s3342_s10  ;;  %v3241_v42 = vld [vmem:[%s4124_s1 + $0x8] sm:$0xff]   ;;  %v424_v43 = vrot.slane %v3476_v49, 2  ;;  %v1885_v17 = vrot.slane %v1877_v1, 2  ;;  %v1879_v18 = vrot.slane %v1877_v1, 1 }
  0x32   : > { %v3637_v50 = vcombine.low %v424_v43, %v574_v53  ;;  %2837 = vmatpush3.bf16.msra.mxu1 %v3241_v42  ;;  %v1886_v24 = vor.u32 %v1885_v17, %v1884_v7  ;;  %v3246_v7 = vld [vmem:[%s4124_s1 + $0x190] sm:$0xff]  }
  0x33   : > { %2838 = vmatprep.subr.bf16.mxu1 %v3243_v55 }
  0x34   : > { %415 = vrot.lane.b32.xlu0 %v400_v60, %s3342_s10  ;;  %572 = vrot.lane.b32.xlu1 %v571_v63, %s3342_s10  ;;  %v1208_v60 = vor.u32 %v1207_v35, %v1206_v33  ;;  %v1202_v63 = vor.u32 %v1201_v39, %v1197_v56  ;;  %v1547_v56 = vor.u32 %v1546_v58, %v1545_v57  ;;  %v3263_v33 = vld [vmem:[%s4124_s1 + $0x78] sm:$0xff]   ;;  %v372_v58 = vrot.slane %v3435_v14, 1 }
  0x35   : > { %3039 = vmatmul.mubr.msk.bf16.gmra.mrb[4].mxu1 %vm425_vm0, %v3637_v50  ;;  %v3265_v35 = vld [vmem:[%s4124_s1 + $0x38] sm:$0xff]   ;;  %v3703_v39 = vcombine.low %v423_v21, %v424_v43 }
  0x36   : > { %2839 = vmatpush3.bf16.msra.mxu1 %v3245_v2 }
  0x37   : > { %2840 = vmatprep.subr.bf16.mxu1 %v3247_v5  ;;  %v3244_v5 = vld [vmem:[%s4124_s1 + $0x148] sm:$0xff]  }
  0x38   : > { %367 = vrot.lane.b32.xlu0 %v352_v26, %s3342_s10  ;;  %566 = vrot.lane.b32.xlu1 %v565_v31, %s3342_s10  ;;  %v1880_v26 = vor.u32 %v1879_v18, %v1875_v54  ;;  %v3259_v31 = vld [vmem:[%s4124_s1 + $0x70] sm:$0xff]   ;;  %v371_v54 = vrot.slane %v3432_v13, 1 }
  0x3a   : > { %2841 = vmatpush3.bf16.msra.mxu1 %v3249_v20  ;;  %v374_v20 = vrot.slane %v3467_v46, 1 }
  0x3b   : > { %2842 = vmatprep.subr.bf16.mxu1 %v3251_v23  ;;  %v375_v23 = vrot.slane %v3470_v47, 1 }
  0x3c   : > { %401 = vrot.lane.b32.xlu0 %v379_v44, %s3342_s10  ;;  %353 = vrot.lane.b32.xlu1 %v303_v45, %s3342_s10  ;;  %v370_v45 = vrot.slane %v3424_v9, 1 }
  0x3e   : > { %2843 = vmatpush3.bf16.msra.mxu1 %v3253_v4 }
  0x3f   : > { %2844 = vmatprep.subr.bf16.mxu1 %v3255_v27 }
  0x40   : > { %1209 = vrot.lane.b32.xlu0 %v1208_v60, %s3342_s10  ;;  %1203 = vrot.lane.b32.xlu1 %v1202_v63, %s3342_s10  ;;  %v373_v60 = vrot.slane %v3444_v19, 1  ;;  %v3240_v19 = vld [vmem:[%s4124_s1 + $0x140] sm:$0xff]  }
  0x42   : > { %2845 = vmatpush3.bf16.msra.mxu1 %v3257_v29 }
  0x43   : > { %2846 = vmatprep.subr.bf16.mxu1 %v3259_v31  ;;  %v3252_v31 = vld [vmem:[%s4124_s1 + $0x158] sm:$0xff]  }
  0x44   : > { %1548 = vrot.lane.b32.xlu0 %v1547_v56, %s3342_s10  ;;  %1542 = vrot.lane.b32.xlu1 %v1541_v12, %s3342_s10 }
  0x46   : > { %2847 = vmatpush3.bf16.msra.mxu1 %v3261_v32  ;;  %v3254_v32 = vld [vmem:[%s4124_s1 + $0x1a0] sm:$0xff]  }
  0x47   : > { %2848 = vmatprep.subr.bf16.mxu1 %v3263_v33 }
  0x48   : > { %1887 = vrot.lane.b32.xlu0 %v1886_v24, %s3342_s10  ;;  %1881 = vrot.lane.b32.xlu1 %v1880_v26, %s3342_s10  ;;  %v3248_v26 = vld [vmem:[%s4124_s1 + $0x150] sm:$0xff]  }
  0x4a   : > { %2849 = vmatpush3.bf16.msra.mxu1 %v3265_v35 }
  0x4b   : > { %3042 = vmatprep.subr.bf16.mxu1 %v3692_v61 }
  0x8e   : > { %v404_v42 = vpop.permute.xlu0 %403  ;;  %v356_v44 = vpop.permute.xlu1 %355 }
  0x8f   : > { %v3711_v10 = vsel %vm425_vm0, %v3417_v6, %v356_v44  ;;  %v3718_v21 = vsel %vm425_vm0, %v370_v45, %v404_v42  ;;  %v3242_v6 = vld [vmem:[%s4124_s1 + $0x188] sm:$0xff]   ;;  %v376_v45 = vrot.slane %v3476_v49, 1 }
  0x92   : > { %v406_v55 = vpop.permute.xlu0 %405  ;;  %v358_v57 = vpop.permute.xlu1 %357 }
  0x93   : > { %v3715_v38 = vsel %vm425_vm0, %v3421_v8, %v358_v57  ;;  %v458_v9 = vsel %vm425_vm0, %v371_v54, %v406_v55  ;;  %v568_v54 = vrot.slane %v3493_v62, 1  ;;  %v3256_v57 = vld [vmem:[%s4124_s1 + $0x160] sm:$0xff]   ;;  %v3308_v62 = vld [vmem:[%s4124_s1 + $0x278] sm:$0xff]  }
  0x94   : > { %v2468_v13 = vcombine.low %v3711_v10, %v3715_v38  ;;  %v2469_v14 = vcombine.low %v3718_v21, %v458_v9 }
  0x96   : > { %811 = vmatprep.mubr.bf16.mxu0 %v2469_v14  ;;  %v408_v8 = vpop.permute.xlu0 %407  ;;  %v410_v43 = vpop.permute.xlu1 %409  ;;  %v3260_v14 = vld [vmem:[%s4124_s1 + $0x168] sm:$0xff]  }
  0x97   : > { %v461_v63 = vsel %vm425_vm0, %v372_v58, %v408_v8  ;;  %v464_v0 = vsel %vm425_vm0, %v373_v60, %v410_v43  ;;  %812 = vmatmul.mubr.bf16.vlgmr.msra.gmra.mrb[0].mxu0 %v2468_v13 }
  0x98   : > { %v3732_v1 = vcombine.low %v458_v9, %v461_v63  ;;  %v3734_v2 = vcombine.low %v461_v63, %v464_v0  ;;  %2883 = vmatpush3.bf16.msra.mxu0 %v3240_v19  ;;  %v3262_v19 = vld [vmem:[%s4124_s1 + $0x1b0] sm:$0xff]  }
  0x99   : > { %2884 = vmatprep.subr.bf16.mxu0 %v3242_v6 }
  0x9a   : > { %v360_v56 = vpop.permute.xlu0 %359  ;;  %v362_v12 = vpop.permute.xlu1 %361  ;;  %819 = vmatprep.mubr.bf16.mxu0 %v3734_v2 }
  0x9b   : > { %v3745_v17 = vsel %vm425_vm0, %v3428_v11, %v360_v56  ;;  %v3749_v18 = vsel %vm425_vm0, %v3438_v15, %v362_v12  ;;  %v3250_v11 = vld [vmem:[%s4124_s1 + $0x198] sm:$0xff]  }
  0x9c   : > { %v3755_v24 = vcombine.low %v3745_v17, %v3749_v18  ;;  %2885 = vmatpush3.bf16.msra.mxu0 %v3244_v5 }
  0x9d   : > { %2886 = vmatprep.subr.bf16.mxu0 %v3246_v7  ;;  %v3264_v7 = vld [vmem:[%s4124_s1 + $0x170] sm:$0xff]  }
  0x9e   : > { %v412_v15 = vpop.permute.xlu0 %411  ;;  %v414_v4 = vpop.permute.xlu1 %413 }
  0x9f   : > { %v467_v46 = vsel %vm425_vm0, %v374_v20, %v412_v15  ;;  %v470_v47 = vsel %vm425_vm0, %v375_v23, %v414_v4  ;;  %820 = vmatmul.mubr.bf16.gmra.mrb[4].mxu0 %v3755_v24  ;;  %v3271_v15 = vld [vmem:[%s4124_s1 + $0x228] sm:$0xff]   ;;  %v3278_v4 = vld [vmem:[%s4124_s1 + $0x90] sm:$0xff]  }
  0xa0   : > { %v3766_v27 = vcombine.low %v464_v0, %v467_v46  ;;  %v3768_v29 = vcombine.low %v467_v46, %v470_v47  ;;  %2887 = vmatpush3.bf16.msra.mxu0 %v3248_v26  ;;  %v369_v0 = vrot.slane %v3526_v30, 1  ;;  %v3267_v26 = vld [vmem:[%s4124_s1 + $0x178] sm:$0xff]  }
  0xa1   : > { %2888 = vmatprep.subr.bf16.mxu0 %v3250_v11  ;;  %v3269_v11 = vld [vmem:[%s4124_s1 + $0x220] sm:$0xff]  }
  0xa2   : > { %v364_v33 = vpop.permute.xlu0 %363  ;;  %v366_v35 = vpop.permute.xlu1 %365  ;;  %827 = vmatprep.mubr.bf16.mxu0 %v3768_v29 }
  0xa3   : > { %v3779_v42 = vsel %vm425_vm0, %v3452_v28, %v364_v33  ;;  %v3783_v44 = vsel %vm425_vm0, %v3457_v36, %v366_v35  ;;  %v3258_v28 = vld [vmem:[%s4124_s1 + $0x1a8] sm:$0xff]   ;;  %v3279_v35 = vld [vmem:[%s4124_s1 + $0x240] sm:$0xff]  }
  0xa4   : > { %v3789_v55 = vcombine.low %v3779_v42, %v3783_v44  ;;  %2889 = vmatpush3.bf16.msra.mxu0 %v3252_v31  ;;  %v3878_v46 = vcombine.low %v3749_v18, %v3779_v42  ;;  %v3287_v31 = vld [vmem:[%s4124_s1 + $0x1c0] sm:$0xff]   ;;  %v3277_v18 = vld [vmem:[%s4124_s1 + $0x1f8] sm:$0xff]  }
  0xa5   : > { %2890 = vmatprep.subr.bf16.mxu0 %v3254_v32  ;;  %v1205_v32 = vrot.slane %v3532_v34, 1 }
  0xa6   : > { %v416_v36 = vpop.permute.xlu0 %415  ;;  %v573_v58 = vpop.permute.xlu1 %572 }
  0xa7   : > { %v473_v49 = vsel %vm425_vm0, %v376_v45, %v416_v36  ;;  %v3799_v60 = vsel %vm425_vm0, %v568_v54, %v573_v58  ;;  %828 = vmatmul.mubr.bf16.gmra.mrb[8].mxu0 %v3789_v55  ;;  %v3280_v45 = vld [vmem:[%s4124_s1 + $0x200] sm:$0xff]   ;;  %v3284_v58 = vld [vmem:[%s4124_s1 + $0x250] sm:$0xff]  }
  0xa8   : > { %v3802_v9 = vcombine.low %v470_v47, %v473_v49  ;;  %v3805_v13 = vcombine.low %v473_v49, %v3799_v60  ;;  %2891 = vmatpush3.bf16.msra.mxu0 %v3256_v57  ;;  %v3276_v47 = vld [vmem:[%s4124_s1 + $0x238] sm:$0xff]   ;;  %v3281_v57 = vld [vmem:[%s4124_s1 + $0x248] sm:$0xff]  }
  0xa9   : > { %2892 = vmatprep.subr.bf16.mxu0 %v3258_v28 }
  0xaa   : > { %v368_v6 = vpop.permute.xlu0 %367  ;;  %v567_v8 = vpop.permute.xlu1 %566  ;;  %835 = vmatprep.mubr.bf16.mxu0 %v3805_v13 }
  0xab   : > { %v3816_v43 = vsel %vm425_vm0, %v3461_v41, %v368_v6  ;;  %v3820_v63 = vsel %vm425_vm0, %v3473_v48, %v567_v8  ;;  %v3266_v41 = vld [vmem:[%s4124_s1 + $0x1b8] sm:$0xff]   ;;  %v3290_v6 = vld [vmem:[%s4124_s1 + $0x1c8] sm:$0xff]  }
  0xac   : > { %v3825_v5 = vcombine.low %v3816_v43, %v3820_v63  ;;  %2893 = vmatpush3.bf16.msra.mxu0 %v3260_v14  ;;  %v3905_v54 = vcombine.low %v3783_v44, %v3816_v43  ;;  %v3282_v44 = vld [vmem:[%s4124_s1 + $0x208] sm:$0xff]   ;;  %v3293_v43 = vld [vmem:[%s4124_s1 + $0x1d0] sm:$0xff]  }
  0xad   : > { %2894 = vmatprep.subr.bf16.mxu0 %v3262_v19  ;;  %v3288_v19 = vld [vmem:[%s4124_s1 + $0x218] sm:$0xff]   ;;  %v3292_v8 = vld [vmem:[%s4124_s1 + $0x2c8] sm:$0xff]  }
  0xae   : > { %v402_v56 = vpop.permute.xlu0 %401  ;;  %v354_v12 = vpop.permute.xlu1 %353 }
  0xaf   : > { %v452_v48 = vsel %vm425_vm0, %v369_v0, %v402_v56  ;;  %v428_v30 = vsel %vm425_vm0, %v3502_v3, %v354_v12  ;;  %836 = vmatmul.mubr.bf16.gmra.mrb[12].mxu0 %v3825_v5  ;;  %v3273_v3 = vld [vmem:[%s4124_s1 + $0x88] sm:$0xff]   ;;  %v3295_v0 = vld [vmem:[%s4124_s1 + $0x2d0] sm:$0xff]   ;;  %v1544_v56 = vrot.slane %v3546_v51, 1 }
  0xb0   : > { %v2505_v20 = vcombine.low %v452_v48, %v3718_v21  ;;  %v2504_v23 = vcombine.low %v428_v30, %v3711_v10  ;;  %2895 = vmatpush3.bf16.msra.mxu0 %v3264_v7  ;;  %1424 = vmatprep.mubr.bf16.mxu0 %v3732_v1  ;;  %v3270_v10 = vld [vmem:[%s4124_s1 + $0x1e0] sm:$0xff]   ;;  %v2507_v21 = vcombine.low %v3715_v38, %v3745_v17  ;;  %v3272_v38 = vld [vmem:[%s4124_s1 + $0x1e8] sm:$0xff]   ;;  %v3275_v17 = vld [vmem:[%s4124_s1 + $0x1f0] sm:$0xff]  }
  0xb1   : > { %2896 = vmatprep.subr.bf16.mxu0 %v3266_v41  ;;  %v3296_v7 = vld [vmem:[%s4124_s1 + $0x1d8] sm:$0xff]   ;;  %v3299_v41 = vld [vmem:[%s4124_s1 + $0x260] sm:$0xff]   ;;  %v3302_v30 = vld [vmem:[%s4124_s1 + $0x268] sm:$0xff]  }
  0xb2   : > { %1093 = vmatprep.mubr.bf16.mxu1 %v2505_v20  ;;  %v1210_v33 = vpop.permute.xlu0 %1209  ;;  %v1204_v36 = vpop.permute.xlu1 %1203  ;;  %v3300_v48 = vld [vmem:[%s4124_s1 + $0x298] sm:$0xff]   ;;  %v1211_v20 = vrot.slane %v3532_v34, 2  ;;  %v3305_v34 = vld [vmem:[%s4124_s1 + $0x270] sm:$0xff]  }
  0xb3   : > { %1094 = vmatmul.mubr.bf16.vlgmr.msra.gmra.mrb[8].mxu1 %v2504_v23  ;;  %v3896_v42 = vsel %vm425_vm0, %v1205_v32, %v1210_v33  ;;  %v3924_v49 = vsel %vm425_vm0, %v3508_v16, %v1204_v36  ;;  %v3286_v16 = vld [vmem:[%s4124_s1 + $0x258] sm:$0xff]   ;;  %v3304_v23 = vld [vmem:[%s4124_s1 + $0x2e8] sm:$0xff]  }
  0xb4   : > { %2897 = vmatpush3.bf16.msra.mxu0 %v3267_v26  ;;  %1101 = vmatprep.mubr.bf16.mxu1 %v3732_v1  ;;  %v3283_v1 = vld [vmem:[%s4124_s1 + $0x98] sm:$0xff]   ;;  %v3912_v28 = vcombine.low %v3799_v60, %v3896_v42  ;;  %v3285_v60 = vld [vmem:[%s4124_s1 + $0x210] sm:$0xff]   ;;  %v3934_v14 = vcombine.low %v3820_v63, %v3924_v49  ;;  %v3294_v63 = vld [vmem:[%s4124_s1 + $0x288] sm:$0xff]  }
  0xb5   : > { %2930 = vmatprep.subr.bf16.mxu0 %v3269_v11  ;;  %3043 = vmatpush3.bf16.msra.mxu1 %v3692_v61  ;;  %v3274_v61 = vld [vmem:[%s4124_s1 + $0x230] sm:$0xff]   ;;  %v3317_v33 = vld [vmem:[%s3411_s7 + $0x58] sm:$0xf] }
  0xb6   : > { %3044 = vmatprep.subr.bf16.mxu1 %v3273_v3  ;;  %v1549_v12 = vpop.permute.xlu0 %1548  ;;  %v1543_v11 = vpop.permute.xlu1 %1542 }
  0xb7   : > { %1425 = vmatmul.mubr.bf16.vlgmr.msra.gmra.mrb[16].mxu0 %v2507_v21 }
  0xb8   : > { %2931 = vmatpush3.bf16.msra.mxu0 %v3270_v10  ;;  %1432 = vmatprep.mubr.bf16.mxu0 %v3766_v27  ;;  %v3306_v10 = vld [vmem:[%s4124_s1 + $0x2a8] sm:$0xff]  }
  0xb9   : > { %2932 = vmatprep.subr.bf16.mxu0 %v3271_v15  ;;  %3045 = vmatpush3.bf16.msra.mxu1 %v3273_v3  ;;  %v2583_v3 = vcombine.low %v574_v53, %v1211_v20  ;;  %v3316_v15 = vld [vmem:[%s3411_s7 + $0x50] sm:$0xf]  ;;  %s2416_s7 = sshll.u32 %s3332_s15, 3 }
  0xba   : > { %3046 = vmatprep.subr.bf16.mxu1 %v3278_v4  ;;  %v3309_v53 = vld [vmem:[%s4124_s1 + $0x2b0] sm:$0xff]   ;;  %p220_p5 = scmp.lt.s32.totalorder %s2416_s7, 15 }
  0xbb   : > { %1102 = vmatmul.mubr.bf16.gmra.mrb[12].mxu1 %v2507_v21  ;;  %v3307_v21 = vld [vmem:[%s4124_s1 + $0x2f0] sm:$0xff]  }
  0xbc   : > { %2933 = vmatpush3.bf16.msra.mxu0 %v3272_v38  ;;  %1109 = vmatprep.mubr.bf16.mxu1 %v3766_v27  ;;  %v3310_v38 = vld [vmem:[%s4124_s1 + $0x2f8] sm:$0xff]   ;;  %s4133_s7 = smov (!%p220_p5, %s2416_s7), 15 }
  0xbd   : > { %2934 = vmatprep.subr.bf16.mxu0 %v3274_v61  ;;  %3047 = vmatpush3.bf16.msra.mxu1 %v3278_v4  ;;  %v1553_v4 = vsel %vm425_vm0, %v3316_v15, %v1543_v11  ;;  %v3312_v61 = vld [vmem:[%s4124_s1 + $0x300] sm:$0xff]   ;;  %s2417_s15 = sshll.u32 %s4133_s7, 2 }
  0xbe   : > { %3048 = vmatprep.subr.bf16.mxu1 %v3283_v1  ;;  %s4098_s30 = scalar_lea.vmem %s4126_s3, %s2417_s15 }
  0xbf   : > { %1433 = vmatmul.mubr.bf16.gmra.mrb[20].mxu0 %v3878_v46 }
  0xc0   : > { %2935 = vmatpush3.bf16.msra.mxu0 %v3275_v17  ;;  %1440 = vmatprep.mubr.bf16.mxu0 %v3802_v9  ;;  %v1550_v17 = vrot.slane %v3546_v51, 2  ;;  %v3315_v51 = vld [vmem:[%s4124_s1 + $0x318] sm:$0xff]  }
  0xc1   : > { %2936 = vmatprep.subr.bf16.mxu0 %v3276_v47  ;;  %3049 = vmatpush3.bf16.msra.mxu1 %v3283_v1  ;;  %v3313_v1 = vld [vmem:[%s4124_s1 + $0x308] sm:$0xff]  }
  0xc2   : > { %3058 = vmatprep.subr.bf16.mxu1 %v3287_v31  ;;  %v2651_v47 = vcombine.low %v1211_v20, %v1550_v17 }
  0xc3   : > { %1110 = vmatmul.mubr.bf16.gmra.mrb[16].mxu1 %v3878_v46 }
  0xc4   : > { %2937 = vmatpush3.bf16.msra.mxu0 %v3277_v18  ;;  %1117 = vmatprep.mubr.bf16.mxu1 %v3802_v9 }
  0xc5   : > { %2938 = vmatprep.subr.bf16.mxu0 %v3279_v35 }
  0xc7   : > { %1441 = vmatmul.mubr.bf16.gmra.mrb[24].mxu0 %v3905_v54 }
  0xc8   : > { %2939 = vmatpush3.bf16.msra.mxu0 %v3280_v45  ;;  %1448 = vmatprep.mubr.bf16.mxu0 %v3912_v28 }
  0xc9   : > { %2940 = vmatprep.subr.bf16.mxu0 %v3281_v57 }
  0xcb   : > { %1118 = vmatmul.mubr.bf16.gmra.mrb[20].mxu1 %v3905_v54 }
  0xcc   : > { %2941 = vmatpush3.bf16.msra.mxu0 %v3282_v44  ;;  %3050 = vmatprep.mubr.msk.bf16.mxu1 %vm425_vm0, %v3559_v59  ;;  %v3289_v59 = vld [vmem:[%s4124_s1 + $0x2c0] sm:$0xff]  }
  0xcd   : > { %2942 = vmatprep.subr.bf16.mxu0 %v3284_v58 }
  0xcf   : > { %1449 = vmatmul.mubr.bf16.gmra.mrb[28].mxu0 %v3934_v14 }
  0xd0   : > { %2943 = vmatpush3.bf16.msra.mxu0 %v3285_v60  ;;  %1763 = vmatprep.mubr.bf16.mxu0 %v3734_v2  ;;  %v3291_v2 = vld [vmem:[%s4124_s1 + $0x280] sm:$0xff]  }
  0xd1   : > { %2944 = vmatprep.subr.bf16.mxu0 %v3286_v16 }
  0xd3   : > { %3051 = vmatmul.mubr.msk.bf16.vlgmr.msra.gmra.mrb[0].mxu1 %vm425_vm0, %v3579_v22 }
  0xd4   : > { %2945 = vmatpush3.bf16.msra.mxu0 %v3288_v19  ;;  %3059 = vmatpush3.bf16.msra.mxu1 %v3287_v31  ;;  %v1882_v31 = vpop.permute.xlu1 %1881 }
  0xd5   : > { %2978 = vmatprep.subr.bf16.mxu0 %v3289_v59  ;;  %3060 = vmatprep.subr.bf16.mxu1 %v3290_v6  ;;  %v1892_v18 = vsel %vm425_vm0, %v3317_v33, %v1882_v31 }
  0xd6   : > { %3054 = vmatprep.mubr.msk.bf16.mxu1 %vm425_vm0, %v3699_v37  ;;  %v2717_v35 = vcombine.low %v1553_v4, %v1892_v18 }
  0xd7   : > { %1764 = vmatmul.mubr.bf16.vlgmr.msra.gmra.mrb[32].mxu0 %v3755_v24  ;;  %v3297_v24 = vld [vmem:[%s4124_s1 + $0x290] sm:$0xff]  }
  0xd8   : > { %2979 = vmatpush3.bf16.msra.mxu0 %v3291_v2  ;;  %3061 = vmatpush3.bf16.msra.mxu1 %v3290_v6 }
  0xd9   : > { %1771 = vmatprep.mubr.bf16.mxu0 %v3768_v29  ;;  %2980 = vmatprep.subr.bf16.mxu0 %v3292_v8  ;;  %v3298_v29 = vld [vmem:[%s4124_s1 + $0x2d8] sm:$0xff]  }
  0xda   : > { %3062 = vmatprep.subr.bf16.mxu1 %v3293_v43 }
  0xdb   : > { %3055 = vmatmul.mubr.msk.bf16.gmra.mrb[4].mxu1 %vm425_vm0, %v3703_v39 }
  0xdc   : > { %2981 = vmatpush3.bf16.msra.mxu0 %v3294_v63  ;;  %3063 = vmatpush3.bf16.msra.mxu1 %v3293_v43 }
  0xdd   : > { %2982 = vmatprep.subr.bf16.mxu0 %v3295_v0  ;;  %3064 = vmatprep.subr.bf16.mxu1 %v3296_v7 }
  0xde   : > { %3066 = vmatprep.mubr.msk.bf16.mxu1 %vm425_vm0, %v3579_v22  ;;  %v3301_v22 = vld [vmem:[%s4124_s1 + $0x2e0] sm:$0xff]  }
  0xdf   : > { %1772 = vmatmul.mubr.bf16.gmra.mrb[36].mxu0 %v3789_v55  ;;  %v4000_v55 = vsel %vm425_vm0, %v1544_v56, %v1549_v12 }
  0xe0   : > { %2983 = vmatpush3.bf16.msra.mxu0 %v3297_v24  ;;  %3065 = vmatpush3.bf16.msra.mxu1 %v3296_v7  ;;  %v2650_v26 = vcombine.low %v3896_v42, %v4000_v55 }
  0xe1   : > { %1779 = vmatprep.mubr.bf16.mxu0 %v3805_v13  ;;  %2984 = vmatprep.subr.bf16.mxu0 %v3298_v29  ;;  %v3303_v13 = vld [vmem:[%s4124_s1 + $0x2a0] sm:$0xff]  }
  0xe2   : > { %3074 = vmatprep.subr.bf16.mxu1 %v3299_v41 }
  0xe3   : > { %3067 = vmatmul.mubr.msk.bf16.vlgmr.msra.gmra.mrb[0].mxu1 %vm425_vm0, %v3699_v37 }
  0xe4   : > { %2985 = vmatpush3.bf16.msra.mxu0 %v3300_v48  ;;  %3075 = vmatpush3.bf16.msra.mxu1 %v3299_v41 }
  0xe5   : > { %2986 = vmatprep.subr.bf16.mxu0 %v3301_v22  ;;  %3076 = vmatprep.subr.bf16.mxu1 %v3302_v30 }
  0xe6   : > { %3070 = vmatprep.mubr.msk.bf16.mxu1 %vm425_vm0, %v3703_v39 }
  0xe7   : > { %1780 = vmatmul.mubr.bf16.gmra.mrb[40].mxu0 %v3825_v5  ;;  %v2649_v5 = vcombine.low %v3924_v49, %v1553_v4 }
  0xe8   : > { %2987 = vmatpush3.bf16.msra.mxu0 %v3303_v13  ;;  %1787 = vmatprep.mubr.bf16.mxu0 %v2650_v26 }
  0xe9   : > { %3077 = vmatpush3.bf16.msra.mxu1 %v3302_v30  ;;  %2988 = vmatprep.subr.bf16.mxu0 %v3304_v23 }
  0xea   : > { %3078 = vmatprep.subr.bf16.mxu1 %v3305_v34 }
  0xeb   : > { %3071 = vmatmul.mubr.msk.bf16.gmra.mrb[4].mxu1 %vm425_vm0, %v2583_v3 }
  0xec   : > { %2989 = vmatpush3.bf16.msra.mxu0 %v3306_v10  ;;  %3082 = vmatprep.mubr.msk.bf16.mxu1 %vm425_vm0, %v3588_v25  ;;  %v3311_v25 = vld [vmem:[%s4124_s1 + $0x2b8] sm:$0xff]  }
  0xed   : > { %3079 = vmatpush3.bf16.msra.mxu1 %v3305_v34  ;;  %2990 = vmatprep.subr.bf16.mxu0 %v3307_v21 }
  0xee   : > { %3080 = vmatprep.subr.bf16.mxu1 %v3308_v62 }
  0xef   : > { %1788 = vmatmul.mubr.bf16.gmra.mrb[44].mxu0 %v2649_v5 }
  0xf0   : > { %2991 = vmatpush3.bf16.msra.mxu0 %v3309_v53  ;;  %2102 = vmatprep.mubr.bf16.mxu0 %v3766_v27  ;;  %v3314_v27 = vld [vmem:[%s4124_s1 + $0x310] sm:$0xff]  }
  0xf1   : > { %3081 = vmatpush3.bf16.msra.mxu1 %v3308_v62  ;;  %2992 = vmatprep.subr.bf16.mxu0 %v3310_v38 }
  0xf2   : > { %3090 = vmatprep.subr.bf16.mxu1 %v3312_v61 }
  0xf4   : > { %3083 = vmatmul.mubr.msk.bf16.vlgmr.msra.gmra.mrb[0].mxu1 %vm425_vm0, %v3626_v52  ;;  %2993 = vmatpush3.bf16.msra.mxu0 %v3311_v25  ;;  %v1883_v52 = vrot.slane %v3609_v40, 1 }
  0xf5   : > { %3091 = vmatpush3.bf16.msra.mxu1 %v3312_v61  ;;  %3086 = vmatprep.mubr.msk.bf16.mxu1 %vm425_vm0, %v3637_v50  ;;  %v1888_v50 = vpop.permute.xlu0 %1887 }
  0xf6   : > { %3092 = vmatprep.subr.bf16.mxu1 %v3313_v1 }
  0xf7   : > { %2103 = vmatmul.mubr.bf16.vlgmr.msra.gmra.mrb[48].mxu0 %v3878_v46  ;;  %v1889_v46 = vrot.slane %v3609_v40, 2 }
  0xf8   : > { %2110 = vmatprep.mubr.bf16.mxu0 %v3802_v9  ;;  %v1895_v9 = vsel %vm425_vm0, %v1883_v52, %v1888_v50 }
  0xf9   : > { %3093 = vmatpush3.bf16.msra.mxu1 %v3313_v1  ;;  %v2719_v32 = vcombine.low %v1550_v17, %v1889_v46 }
  0xfa   : > { %3094 = vmatprep.subr.bf16.mxu1 %v3314_v27 }
  0xfc   : > { %3087 = vmatmul.mubr.msk.bf16.gmra.mrb[4].mxu1 %vm425_vm0, %v2651_v47 }
  0xfd   : > { %3095 = vmatpush3.bf16.msra.mxu1 %v3314_v27  ;;  %3098 = vmatprep.mubr.msk.bf16.mxu1 %vm425_vm0, %v3699_v37  ;;  %v2718_v37 = vcombine.low %v4000_v55, %v1895_v9 }
  0xfe   : > { %3096 = vmatprep.subr.bf16.mxu1 %v3315_v51 }
  0xff   : > { %2111 = vmatmul.mubr.bf16.gmra.mrb[52].mxu0 %v3905_v54 }
 0x100   : > { %2118 = vmatprep.mubr.bf16.mxu0 %v3912_v28 }
 0x101   : > { %3097 = vmatpush3.bf16.msra.mxu1 %v3315_v51 }
 0x104   : > { %3099 = vmatmul.mubr.msk.bf16.vlgmr.msra.gmra.mrb[0].mxu1 %vm425_vm0, %v3703_v39 }
 0x105   : > { %3102 = vmatprep.mubr.msk.bf16.mxu1 %vm425_vm0, %v2583_v3 }
 0x107   : > { %2119 = vmatmul.mubr.bf16.gmra.mrb[56].mxu0 %v3934_v14 }
 0x108   : > { %2126 = vmatprep.mubr.bf16.mxu0 %v2718_v37 }
 0x10c   : > { %3103 = vmatmul.mubr.msk.bf16.gmra.mrb[4].mxu1 %vm425_vm0, %v2719_v32 }
 0x10f   : > { %2127 = vmatmul.mubr.bf16.gmra.mrb[60].mxu0 %v2717_v35 }
 0x16a   : > { %v2802_v42 = vpop.f32.mrb[0].mxu0 }
 0x16b   : > { %v2803_v39 = vpop.f32.mrb[1].mxu0 }
 0x16c   : > { %v2804_v45 = vadd.f32 %v2803_v39, %v2802_v42  ;;  %v2805_v40 = vpop.f32.mrb[2].mxu0 }
 0x16d   : > { %v2806_v54 = vpop.f32.mrb[3].mxu0 }
 0x16e   : > { %v2807_v57 = vadd.f32 %v2806_v54, %v2805_v40 }
 0x172   : > { %v2808_v28 = vpop.f32.mrb[4].mxu0 }
 0x173   : > { %v2809_v36 = vpop.f32.mrb[5].mxu0 }
 0x174   : > { %v2810_v44 = vadd.f32 %v2809_v36, %v2808_v28  ;;  %v2811_v58 = vpop.f32.mrb[6].mxu0 }
 0x175   : > { %v2812_v49 = vpop.f32.mrb[7].mxu0 }
 0x176   : > { %v2813_v60 = vadd.f32 %v2812_v49, %v2811_v58 }
 0x17a   : > { %v2814_v14 = vpop.f32.mrb[8].mxu0 }
 0x17b   : > { %v2815_v16 = vpop.f32.mrb[9].mxu0 }
 0x17c   : > { %v2816_v19 = vadd.f32 %v2815_v16, %v2814_v14  ;;  %v2817_v59 = vpop.f32.mrb[10].mxu0 }
 0x17d   : > { %v2818_v6 = vpop.f32.mrb[11].mxu0 }
 0x17e   : > { %v2819_v2 = vadd.f32 %v2818_v6, %v2817_v59 }
 0x182   : > { %v2820_v8 = vpop.f32.mrb[12].mxu0 }
 0x183   : > { %v2821_v43 = vpop.f32.mrb[13].mxu0 }
 0x184   : > { %v2822_v63 = vadd.f32 %v2821_v43, %v2820_v8  ;;  %v2823_v0 = vpop.f32.mrb[14].mxu0 }
 0x185   : > { %v2824_v7 = vpop.f32.mrb[15].mxu0 }
 0x186   : > { %v2825_v24 = vadd.f32 %v2824_v7, %v2823_v0  ;;  %v2850_v29 = vpop.f32.mrb[8].mxu1 }
 0x187   : > { %v2851_v41 = vpop.f32.mrb[9].mxu1 }
 0x188   : > { %v2852_v56 = vadd.f32 %v2851_v41, %v2850_v29  ;;  %v2853_v12 = vpop.f32.mrb[10].mxu1 }
 0x189   : > { %v2854_v48 = vpop.f32.mrb[11].mxu1 }
 0x18a   : > { %v3111_v22 = vadd.f32 %v2852_v56, %v2804_v45  ;;  %v2855_v30 = vadd.f32 %v2854_v48, %v2853_v12  ;;  %v2898_v55 = vpop.f32.mrb[16].mxu0 }
 0x18b   : > { %v2899_v20 = vpop.f32.mrb[17].mxu0 }
 0x18c   : > { %v3121_v13 = vadd.f32 %v2855_v30, %v2807_v57  ;;  %v2900_v23 = vadd.f32 %v2899_v20, %v2898_v55  ;;  %v2901_v26 = vpop.f32.mrb[18].mxu0 }
 0x18d   : > { %v2902_v34 = vpop.f32.mrb[19].mxu0 }
 0x18e   : > { %v3112_v11 = vadd.f32 %v3111_v22, %v2900_v23  ;;  %v2903_v3 = vadd.f32 %v2902_v34, %v2901_v26  ;;  %v2856_v10 = vpop.f32.mrb[12].mxu1 }
 0x18f   : > { %v2857_v21 = vpop.f32.mrb[13].mxu1 }
 0x190   : > { %v3122_v15 = vadd.f32 %v3121_v13, %v2903_v3  ;;  %v2858_v4 = vadd.f32 %v2857_v21, %v2856_v10  ;;  %v2859_v62 = vpop.f32.mrb[14].mxu1 }
 0x191   : > { %v2860_v53 = vpop.f32.mrb[15].mxu1 }
 0x192   : > { %v3106_v5 = vadd.f32 %v2858_v4, %v2810_v44  ;;  %v2861_v38 = vadd.f32 %v2860_v53, %v2859_v62  ;;  %v2904_v61 = vpop.f32.mrb[20].mxu0 }
 0x193   : > { %v2905_v25 = vpop.f32.mrb[21].mxu0 }
 0x194   : > { %v3116_v1 = vadd.f32 %v2861_v38, %v2813_v60  ;;  %v2906_v17 = vadd.f32 %v2905_v25, %v2904_v61  ;;  %v2907_v27 = vpop.f32.mrb[22].mxu0 }
 0x195   : > { %v2908_v47 = vpop.f32.mrb[23].mxu0 }
 0x196   : > { %v3107_v51 = vadd.f32 %v3106_v5, %v2906_v17  ;;  %v2909_v52 = vadd.f32 %v2908_v47, %v2907_v27  ;;  %v2862_v50 = vpop.f32.mrb[16].mxu1 }
 0x197   : > { %v2863_v9 = vpop.f32.mrb[17].mxu1 }
 0x198   : > { %v3117_v46 = vadd.f32 %v3116_v1, %v2909_v52  ;;  %v2864_v37 = vadd.f32 %v2863_v9, %v2862_v50  ;;  %v2865_v31 = vpop.f32.mrb[18].mxu1 }
 0x199   : > { %v2866_v32 = vpop.f32.mrb[19].mxu1 }
 0x19a   : > { %v3131_v33 = vadd.f32 %v2864_v37, %v2816_v19  ;;  %v2867_v18 = vadd.f32 %v2866_v32, %v2865_v31  ;;  %v2910_v35 = vpop.f32.mrb[24].mxu0 }
 0x19b   : > { %v2911_v42 = vpop.f32.mrb[25].mxu0 }
 0x19c   : > { %v3141_v39 = vadd.f32 %v2867_v18, %v2819_v2  ;;  %v2912_v45 = vadd.f32 %v2911_v42, %v2910_v35  ;;  %v2913_v40 = vpop.f32.mrb[26].mxu0 }
 0x19d   : > { %v2914_v54 = vpop.f32.mrb[27].mxu0 }
 0x19e   : > { %v3132_v57 = vadd.f32 %v3131_v33, %v2912_v45  ;;  %v2915_v28 = vadd.f32 %v2914_v54, %v2913_v40  ;;  %v2868_v36 = vpop.f32.mrb[20].mxu1 }
 0x19f   : > { %v2869_v44 = vpop.f32.mrb[21].mxu1 }
 0x1a0   : > { %v3142_v58 = vadd.f32 %v3141_v39, %v2915_v28  ;;  %v2870_v49 = vadd.f32 %v2869_v44, %v2868_v36  ;;  %v2871_v60 = vpop.f32.mrb[22].mxu1  ;;  %v4089_v44 = vld [vmem:[%s4125_s2] ss:$0 sm:$0xff] }
 0x1a1   : > { %v2872_v14 = vpop.f32.mrb[23].mxu1 }
 0x1a2   : > { %v3126_v16 = vadd.f32 %v2870_v49, %v2822_v63  ;;  %v2873_v59 = vadd.f32 %v2872_v14, %v2871_v60  ;;  %v2916_v6 = vpop.f32.mrb[28].mxu0 }
 0x1a3   : > { %v2917_v8 = vpop.f32.mrb[29].mxu0 }
 0x1a4   : > { %v3136_v19 = vadd.f32 %v2873_v59, %v2825_v24  ;;  %v2918_v43 = vadd.f32 %v2917_v8, %v2916_v6  ;;  %v2919_v0 = vpop.f32.mrb[30].mxu0 }
 0x1a5   : > { %v2920_v7 = vpop.f32.mrb[31].mxu0 }
 0x1a6   : > { %v3127_v2 = vadd.f32 %v3126_v16, %v2918_v43  ;;  %v2921_v29 = vadd.f32 %v2920_v7, %v2919_v0 }
 0x1a8   : > { %v3137_v41 = vadd.f32 %v3136_v19, %v2921_v29 }
 0x1aa   : > { %v2946_v56 = vpop.f32.mrb[32].mxu0 }
 0x1ab   : > { %v2947_v12 = vpop.f32.mrb[33].mxu0 }
 0x1ac   : > { %v2948_v48 = vadd.f32 %v2947_v12, %v2946_v56  ;;  %v2949_v22 = vpop.f32.mrb[34].mxu0 }
 0x1ad   : > { %v2950_v30 = vpop.f32.mrb[35].mxu0 }
 0x1ae   : > { %v3113_v55 = vadd.f32 %v3112_v11, %v2948_v48  ;;  %v2951_v20 = vadd.f32 %v2950_v30, %v2949_v22 }
 0x1b0   : > { %v3123_v13 = vadd.f32 %v3122_v15, %v2951_v20 }
 0x1b2   : > { %v2952_v23 = vpop.f32.mrb[36].mxu0 }
 0x1b3   : > { %v2953_v63 = vpop.f32.mrb[37].mxu0 }
 0x1b4   : > { %v2954_v26 = vadd.f32 %v2953_v63, %v2952_v23  ;;  %v2955_v34 = vpop.f32.mrb[38].mxu0 }
 0x1b5   : > { %v2956_v3 = vpop.f32.mrb[39].mxu0 }
 0x1b6   : > { %v3108_v24 = vadd.f32 %v3107_v51, %v2954_v26  ;;  %v2957_v10 = vadd.f32 %v2956_v3, %v2955_v34 }
 0x1b8   : > { %v3118_v21 = vadd.f32 %v3117_v46, %v2957_v10 }
 0x1ba   : > { %v2958_v4 = vpop.f32.mrb[40].mxu0 }
 0x1bb   : > { %v2959_v62 = vpop.f32.mrb[41].mxu0 }
 0x1bc   : > { %v2960_v53 = vadd.f32 %v2959_v62, %v2958_v4  ;;  %v2961_v5 = vpop.f32.mrb[42].mxu0 }
 0x1bd   : > { %v2962_v38 = vpop.f32.mrb[43].mxu0 }
 0x1be   : > { %v3133_v61 = vadd.f32 %v3132_v57, %v2960_v53  ;;  %v2963_v25 = vadd.f32 %v2962_v38, %v2961_v5 }
 0x1c0   : > { %v3143_v1 = vadd.f32 %v3142_v58, %v2963_v25 }
 0x1c2   : > { %v2964_v17 = vpop.f32.mrb[44].mxu0 }
 0x1c3   : > { %v2965_v11 = vpop.f32.mrb[45].mxu0 }
 0x1c4   : > { %v2966_v15 = vadd.f32 %v2965_v11, %v2964_v17  ;;  %v2967_v27 = vpop.f32.mrb[46].mxu0 }
 0x1c5   : > { %v2968_v47 = vpop.f32.mrb[47].mxu0 }
 0x1c6   : > { %v4081_v52 = vadd.f32 %v3127_v2, %v2966_v15  ;;  %v2969_v50 = vadd.f32 %v2968_v47, %v2967_v27 }
 0x1c8   : > { %v4083_v51 = vadd.f32 %v3137_v41, %v2969_v50 }
 0x1ca   : > { %v2994_v9 = vpop.f32.mrb[48].mxu0 }
 0x1cb   : > { %v2995_v46 = vpop.f32.mrb[49].mxu0 }
 0x1cc   : > { %v2996_v37 = vadd.f32 %v2995_v46, %v2994_v9  ;;  %v2997_v31 = vpop.f32.mrb[50].mxu0 }
 0x1cd   : > { %v2998_v32 = vpop.f32.mrb[51].mxu0 }
 0x1ce   : > { %v2999_v33 = vadd.f32 %v2998_v32, %v2997_v31  ;;  %v3114_v18 = vadd.f32 %v3113_v55, %v2996_v37 }
 0x1d0   : > { %v3124_v35 = vadd.f32 %v3123_v13, %v2999_v33 }
 0x1d2   : > { %v3000_v42 = vpop.f32.mrb[52].mxu0 }
 0x1d3   : > { %v3001_v39 = vpop.f32.mrb[53].mxu0 }
 0x1d4   : > { %v3002_v45 = vadd.f32 %v3001_v39, %v3000_v42  ;;  %v3003_v40 = vpop.f32.mrb[54].mxu0 }
 0x1d5   : > { %v3004_v54 = vpop.f32.mrb[55].mxu0 }
 0x1d6   : > { %v3005_v57 = vadd.f32 %v3004_v54, %v3003_v40  ;;  %v3109_v28 = vadd.f32 %v3108_v24, %v3002_v45 }
 0x1d7   : > { %v3100_v36 = vpop.f32.mrb[0].mxu1 }
 0x1d8   : > { %v3110_v58 = vadd.f32 %v3109_v28, %v3100_v36  ;;  %v2169_v49 = vpop.f32.mrb[1].mxu1  ;;  %v3119_v60 = vadd.f32 %v3118_v21, %v3005_v57 }
 0x1d9   : > { %v3115_v14 = vadd.f32 %v3114_v18, %v2169_v49  ;;  %v3101_v16 = vpop.f32.mrb[2].mxu1 }
 0x1da   : > { %v2217_v59 = vadd.f32 %v3110_v58, %v4089_v44  ;;  %v3120_v6 = vadd.f32 %v3119_v60, %v3101_v16  ;;  %v2172_v8 = vpop.f32.mrb[3].mxu1  ;;  %v3006_v19 = vpop.f32.mrb[56].mxu0 }
 0x1db   : > { %v2215_v43 = vadd.f32 %v3115_v14, %v4089_v44  ;;  %v3125_v0 = vadd.f32 %v3124_v35, %v2172_v8  ;;  %v3007_v7 = vpop.f32.mrb[57].mxu0 }
 0x1dc   : > { %v2218_v2 = vadd.f32 %v3120_v6, %v4089_v44  ;;  %v3008_v29 = vadd.f32 %v3007_v7, %v3006_v19  ;;  %v3009_v41 = vpop.f32.mrb[58].mxu0  ;;  %v2225_v22 = vmax.f32 %v2217_v59, 0.0 }
 0x1dd   : > { %v2223_v56 = vmax.f32 %v2215_v43, 0.0  ;;  %v2216_v12 = vadd.f32 %v3125_v0, %v4089_v44  ;;  %v3010_v48 = vpop.f32.mrb[59].mxu0 }
 0x1de   : > { %v2226_v30 = vmax.f32 %v2218_v2, 0.0  ;;  %v3011_v55 = vadd.f32 %v3010_v48, %v3009_v41  ;;  %v3134_v20 = vadd.f32 %v3133_v61, %v3008_v29  ;;  %v2286_v53 = vmul.f32 %v2225_v22, %v2225_v22 }
 0x1df   : > { %v2224_v13 = vmax.f32 %v2216_v12, 0.0  ;;  %v3104_v23 = vpop.f32.mrb[4].mxu1  ;;  %v2284_v63 = vmul.f32 %v2223_v56, %v2223_v56 }
 0x1e0   : > { %v2771_v26 = vpack.c.bf16 %v2226_v30, %v2225_v22  ;;  %v2185_v34 = vpop.f32.mrb[5].mxu1  ;;  %v3144_v3 = vadd.f32 %v3143_v1, %v3011_v55  ;;  %v2287_v27 = vmul.f32 %v2226_v30, %v2226_v30 }
 0x1e1   : > { %v2766_v24 = vpack.c.bf16 %v2224_v13, %v2223_v56  ;;  %v2271_v10 = vadd.f32 %v2224_v13, %v2223_v56  ;;  %v2285_v21 = vmul.f32 %v2224_v13, %v2224_v13  ;;  %v3135_v4 = vadd.f32 %v3134_v20, %v2185_v34  ;;  %v3105_v62 = vpop.f32.mrb[6].mxu1 }
 0x1e2   : > { %2783 = vst [vmem:[%s4098_s30 + $0x8] sm:$0xff] %v2771_v26   ;;  %v2188_v5 = vpop.f32.mrb[7].mxu1  ;;  %v3012_v38 = vpop.f32.mrb[60].mxu0 }
 0x1e3   : > { %2767 = vst [vmem:[%s4098_s30] sm:$0xff] %v2766_v24   ;;  %v2272_v61 = vadd.f32 %v2271_v10, %v2225_v22  ;;  %v2292_v25 = vadd.f32 %v2285_v21, %v2284_v63  ;;  %v2219_v17 = vadd.f32 %v3135_v4, %v4089_v44  ;;  %v3145_v11 = vadd.f32 %v3144_v3, %v2188_v5  ;;  %v3013_v15 = vpop.f32.mrb[61].mxu0 }
 0x1e4   : > { %v3014_v47 = vadd.f32 %v3013_v15, %v3012_v38  ;;  %v3015_v50 = vpop.f32.mrb[62].mxu0 }
 0x1e5   : > { %v2293_v1 = vadd.f32 %v2292_v25, %v2286_v53  ;;  %v2227_v9 = vmax.f32 %v2219_v17, 0.0  ;;  %v2273_v46 = vadd.f32 %v2272_v61, %v2226_v30  ;;  %v2220_v37 = vadd.f32 %v3145_v11, %v4089_v44  ;;  %v3016_v31 = vpop.f32.mrb[63].mxu0 }
 0x1e6   : > { %v3129_v32 = vadd.f32 %v4081_v52, %v3014_v47  ;;  %v3017_v33 = vadd.f32 %v3016_v31, %v3015_v50 }
 0x1e7   : > { %v2274_v18 = vadd.f32 %v2273_v46, %v2227_v9  ;;  %v2288_v35 = vmul.f32 %v2227_v9, %v2227_v9  ;;  %v2294_v42 = vadd.f32 %v2293_v1, %v2287_v27  ;;  %v2228_v39 = vmax.f32 %v2220_v37, 0.0 }
 0x1e8   : > { %v3130_v45 = vadd.f32 %v3129_v32, %v3104_v23  ;;  %v3139_v40 = vadd.f32 %v4083_v51, %v3017_v33 }
 0x1e9   : > { %v2295_v54 = vadd.f32 %v2294_v42, %v2288_v35  ;;  %v2776_v57 = vpack.c.bf16 %v2228_v39, %v2227_v9  ;;  %v2275_v28 = vadd.f32 %v2274_v18, %v2228_v39  ;;  %v2289_v36 = vmul.f32 %v2228_v39, %v2228_v39 }
 0x1ea   : > { %v2221_v58 = vadd.f32 %v3130_v45, %v4089_v44  ;;  %v3140_v49 = vadd.f32 %v3139_v40, %v3105_v62 }
 0x1eb   : > { %2784 = vst [vmem:[%s4098_s30 + $0x10] sm:$0xff] %v2776_v57   ;;  %v2296_v60 = vadd.f32 %v2295_v54, %v2289_v36 }
 0x1ec   : > { %v2229_v14 = vmax.f32 %v2221_v58, 0.0  ;;  %v2222_v52 = vadd.f32 %v3140_v49, %v4089_v44 }
 0x1ee   : > { %v2276_v16 = vadd.f32 %v2275_v28, %v2229_v14  ;;  %v2290_v59 = vmul.f32 %v2229_v14, %v2229_v14  ;;  %v2230_v6 = vmax.f32 %v2222_v52, 0.0 }
 0x1f0   : > { %v2297_v8 = vadd.f32 %v2296_v60, %v2290_v59  ;;  %v2781_v19 = vpack.c.bf16 %v2230_v6, %v2229_v14  ;;  %v2277_v51 = vadd.f32 %v2276_v16, %v2230_v6  ;;  %v2291_v43 = vmul.f32 %v2230_v6, %v2230_v6 }
 0x1f2   : > { %2785 = vst [vmem:[%s4098_s30 + $0x18] sm:$0xff] %v2781_v19   ;;  %v2278_v0 = vrot.slane %v2277_v51, 4  ;;  %v2298_v7 = vadd.f32 %v2297_v8, %v2291_v43 }
 0x1f4   : > { %v2279_v2 = vadd.f32 %v2278_v0, %v2277_v51  ;;  %v2299_v29 = vrot.slane %v2298_v7, 4 }
 0x1f6   : > { %v2280_v41 = vrot.slane %v2279_v2, 2  ;;  %v2300_v56 = vadd.f32 %v2299_v29, %v2298_v7 }
 0x1f8   : > { %v2281_v12 = vadd.f32 %v2280_v41, %v2279_v2  ;;  %v2301_v48 = vrot.slane %v2300_v56, 2 }
 0x1fa   : > { %v2282_v22 = vrot.slane %v2281_v12, 1  ;;  %v2302_v30 = vadd.f32 %v2301_v48, %v2300_v56 }
 0x1fc   : > { %v2303_v44 = vrot.slane %v2302_v30, 1  ;;  %v2283_v55 = vadd.f32 %v2282_v22, %v2281_v12 }
 0x1fe   : > { %v2304_v20 = vadd.f32 %v2303_v44, %v2302_v30 }
 0x200   : > { %v2306_v13 = vsel %vm2305_vm1, %v2283_v55, %v2304_v20 }
 0x201   : > { %2307 = vst [vmem:[%s230_s9] sm:$0x3] %v2306_v13 }
 0x202 PF: > { %s15_s17 = sadd.s32 1, %s3340_s17   ;;  %s4128_s15 = smov %s3336_s16 }
 0x203   : > { %p12_p6 = scmp.ge.s32.totalorder %s15_s17, 4   ;;  %s4129_s16 = smov %s4131_s18 }
 0x205   :  { %14 = sbr.rel (!%p12_p6) target bundleno = 2 (0x2), region = 78 }

// kernel: fully_cnn_forward.6
= control target key start
LH: loop header
LB: loop body
LE: loop exit
PB: predicated region body
PF: predicated region fallthrough
CT: control target
= control target key end

     0   :  { %10 = vsyncpa [#allocation3], 0  ;;  %s3631_s15 = smov 0   ;;  %s3633_s16 = smov 0   ;;  %s4650_s0 = inlined_call_operand.vmem [shape: bf16[2,20,20,3], index: 0, kind: input, shape index: {}]   ;;  %s4651_s1 = inlined_call_operand.vmem [shape: bf16[5,15,64], index: 1, kind: input, shape index: {}]   ;;  %s4652_s2 = inlined_call_operand.hbm [shape: f32[1,64], index: 2, kind: input, shape index: {}]   ;;  %s4653_s3 = inlined_call_operand.vmem [shape: bf16[512,64], index: 3, kind: output, shape index: {0}]   ;;  %s4654_s4 = inlined_call_operand.vmem [shape: f32[2,2,64], index: 4, kind: output, shape index: {1}]  }
   0x1   :  { %s3635_s17 = smov 0  }
   0x2 LB: > { %s2855_s18 = sadd.s32 4294967295, %s3598_s17   ;;  %s28_s19 = sadd.s32 1, %s3594_s16  ;;  %s3598_s17 = sphi %s3635_s17, %s16_s17   ;;  %s3594_s16 = sphi %s3633_s16, %s4664_s16   ;;  %s3590_s15 = sphi %s3631_s15, %s4663_s15  }
   0x3   : > { %p30_p0 = scmp.ge.s32.totalorder %s28_s19, 2  ;;  %p2857_p1 = scmp.ge.s32.totalorder %s3598_s17, 1 }
   0x4   : > { %p157_p2 = scmp.lt.s32.totalorder %s3598_s17, 3  ;;  %p3656_p4 = scmp.eq.s32.totalorder %s2855_s18, 0 }
   0x5   : > { %s4666_s19 = smov (%p30_p0, %s28_s19), 0  ;;  %s3600_s22 = smov [#allocation2]  }
   0x6   : > { %p3652_p3 = pnand %p2857_p1, %p157_p2  ;;  %s173_s23 = sshll.u32 %s3600_s22, 4  ;;  %s174_s23 = int_to_ptr.vmem [resolvable:$true] %s173_s23 }
   0x7   : > { %s4659_s21 = scalar_select %p3656_p4, 1, 0 }
   0x8   : > { %s4658_s20 = scalar_select %p3652_p3, 1, 0 }
   0x9   : > { %p3456_p5 = pneg %p3652_p3  ;;  %s3544_s27 = scalar_lea.hbm %s4652_s2, 16 }
   0xa   : > { %p3545_p7 = scmp.ne.s32.totalorder %s4652_s2, %s3544_s27  ;;  %p3551_p11 = scmp.lt.u32.totalorder %s3544_s27, %s4652_s2 }
   0xb   : > { %p3664_p6 = pnand %p3656_p4, %p3456_p5 }
   0xd   : > { %p3546_p8 = pneg %p3664_p6 }
   0xf   : > { %p3547_p9 = pnand %p3546_p8, %p3545_p7 }
  0x11   : > { %p3548_p10 = pneg %p3547_p9 }
  0x13   : > { %p3553_p12 = pnand %p3551_p11, %p3548_p10 }
  0x15   : > { %3556 = shalt.err (!%p3553_p12)
}
  0x16   : > { %s3557_s6 = scalar_lea.vmem %s174_s23, 16  ;;  %s3564_s7 = scalar_lea.vmem %s174_s23, 32 }
  0x17   : > { %p3558_p13 = scmp.ne.s32.totalorder %s174_s23, %s3557_s6  ;;  %p3565_p2 = scmp.lt.s32.totalorder %s174_s23, %s174_s23 }
  0x18   : > { %p3566_p5 = scmp.lt.s32.totalorder %s3564_s7, %s3557_s6 }
  0x19   : > { %p3560_p0 = pnand %p3558_p13, %p3546_p8 }
  0x1a   : > { %p3567_p4 = por %p3566_p5, %p3565_p2 }
  0x1b   : > { %p3561_p1 = pneg %p3560_p0 }
  0x1d   : > { %p3568_p3 = pnand %p3567_p4, %p3561_p1 }
  0x1f   : > { %3571 = shalt.err (!%p3568_p3)
}
  0x20   : > { %3459 = dma.hbm_to_vmem [thread:$0]  (!%p3664_p6), %s4652_s2, 16, %s174_s23, [#allocation3]  }
  0x21   : > { %p4661_p7 = scmp.ne.s32.totalorder %s4658_s20, 0 }
  0x22   : > { %p4662_p9 = scmp.ne.s32.totalorder (!%p4661_p7), %s4659_s21, 0 }
  0x23   : > { %194 = sbr.rel (%p4661_p7) target bundleno = 642 (0x282), region = 32 }
  0x2a   : > { %3585 = dma.done.wait (%p4662_p9), [#allocation3], 16  }
  0x2b   : > { %3587 = vsyncadd (%p4662_p9), [#allocation3], 4294967280  ;;  %p226_p8 = scmp.lt.s32.totalorder %s3590_s15, 1  ;;  %vm659_vm0 = vcmask 1046528   ;;  %vm434_vm1 = vsmask.f32 7424 }
  0x2c   : > { %vm917_vm2 = vcmask 1045504   ;;  %s3601_s18 = smov 6   ;;  %vm740_vm3 = vsmask.f32 6400  ;;  %s3602_s20 = smov 3   ;;  %vm1225_vm4 = vcmask 1047552  }
  0x2d   : > { %s3692_s10 = scalar_select %p226_p8, %s3590_s15, 1  ;;  %vm998_vm5 = vcmask 23552   ;;  %vm1031_vm6 = vcmask 48128   ;;  %vm1064_vm7 = vcmask 72704   ;;  %vm1097_vm8 = vcmask 97280  }
  0x2e   : > { %s3603_s21 = smov 12   ;;  %s3604_s22 = smov 9   ;;  %vm1191_vm9 = vcmask 121856   ;;  %vm2533_vm10 = vcmask 519168   ;;  %vm2566_vm11 = vcmask 523264   ;;  %vm2737_vm12 = vcmask 1040384  }
  0x2f   : > { %s3451_s11 = smul.u32 240, %s3692_s10  ;;  %s2863_s7 = sshll.u32 %s3590_s15, 5  ;;  %vm2739_vm13 = vcmask 517120  }
  0x30   : > { %p233_p3 = scmp.lt.s32.totalorder %s2863_s7, 63  ;;  %s2865_s12 = sshll.u32 %s3692_s10, 1 }
  0x31   : > { %s3698_s14 = scalar_lea.vmem %s4650_s0, %s3451_s11 }
  0x32   : > { %v3701_v0 = vld [vmem:[%s3698_s14 + $0x18] sm:$0xff]   ;;  %v3704_v1 = vld [vmem:[%s3698_s14 + $0x20] ss:$0 sps:$4 sm:$0x33]   ;;  %v3494_v2 = vld [vmem:[%s3698_s14 + $0xc] sm:$0xff]   ;;  %s4668_s7 = smov (!%p233_p3, %s2863_s7), 63 }
  0x33   : > { %v666_v3 = vrot.slane %v3701_v0, 1  ;;  %v667_v4 = vrot.slane %v3704_v1, 1  ;;  %v3495_v5 = vld [vmem:[%s3698_s14 + $0x14] ss:$0 sps:$4 sm:$0x33]   ;;  %v3711_v6 = vld [vmem:[%s3698_s14 + $0x24] sm:$0xff]  }
  0x34   : > { %v663_v7 = vrot.slane %v3494_v2, 1  ;;  %v448_v8 = vshrl.u32 %v3494_v2, 16  ;;  %v664_v10 = vrot.slane %v3495_v5, 1  ;;  %v3715_v11 = vld [vmem:[%s3698_s14 + $0x2c] ss:$0 sps:$4 sm:$0x33]  }
  0x35   : > { %v668_v9 = vsel %vm659_vm0, %v666_v3, %v667_v4  ;;  %v669_v12 = vrot.slane %v3711_v6, 1  ;;  %v450_v13 = vshll.u32 %v3494_v2, 16  ;;  %v455_v14 = vshll.u32 %v3495_v5, 16  ;;  %v3736_v48 = vld [vmem:[%s3698_s14 + $0x3c] sm:$0xff]   ;;  %v3746_v58 = vld [vmem:[%s3698_s14 + $0x30] sm:$0xff]   ;;  %s2864_s15 = sshll.u32 %s4668_s7, 2 }
  0x36   : > { %712 = vrot.lane.b32.xlu0 %v668_v9, %s3601_s18  ;;  %v921_v15 = vrot.slane %v3494_v2, 2  ;;  %v665_v16 = vsel %vm659_vm0, %v663_v7, %v664_v10  ;;  %v670_v17 = vrot.slane %v3715_v11, 1  ;;  %v922_v18 = vrot.slane %v3495_v5, 2  ;;  %v3741_v55 = vld [vmem:[%s3698_s14 + $0x44] ss:$0 sps:$4 sm:$0x33]   ;;  %s4467_s11 = scalar_lea.vmem %s4653_s3, %s2864_s15 }
  0x37   : > { %v460_v19 = vshrl.u32 %v3701_v0, 16  ;;  %710 = vrot.lane.b32.xlu1 %v665_v16, %s3601_s18  ;;  %v452_v20 = vrot.slane %v450_v13, 1  ;;  %v457_v21 = vrot.slane %v455_v14, 1  ;;  %v462_v22 = vshll.u32 %v3701_v0, 16 }
  0x38   : > { %v467_v23 = vshll.u32 %v3704_v1, 16  ;;  %v671_v24 = vsel %vm659_vm0, %v669_v12, %v670_v17  ;;  %v923_v25 = vsel %vm917_vm2, %v921_v15, %v922_v18  ;;  %v472_v26 = vshrl.u32 %v3711_v6, 16  ;;  %v3750_v63 = vld [vmem:[%s3698_s14 + $0x38] ss:$0 sps:$4 sm:$0x33]  }
  0x39   : > { %v474_v27 = vshll.u32 %v3711_v6, 16  ;;  %v453_v28 = vor.u32 %v452_v20, %v448_v8  ;;  %v464_v29 = vrot.slane %v462_v22, 1  ;;  %v479_v31 = vshll.u32 %v3715_v11, 16 }
  0x3a   : > { %v469_v30 = vrot.slane %v467_v23, 1  ;;  %v750_v33 = vrot.slane %v448_v8, 1  ;;  %v751_v34 = vrot.slane %v450_v13, 2  ;;  %v753_v35 = vshrl.u32 %v3495_v5, 16 }
  0x3b   : > { %v476_v32 = vrot.slane %v474_v27, 1  ;;  %714 = vrot.lane.b32.xlu1 %v671_v24, %s3601_s18  ;;  %v458_v36 = vsel %vm434_vm1, %v453_v28, %v457_v21  ;;  %v465_v37 = vor.u32 %v464_v29, %v460_v19  ;;  %v481_v38 = vrot.slane %v479_v31, 1 }
  0x3c   : > { %v756_v39 = vrot.slane %v455_v14, 2  ;;  %629 = vrot.lane.b32.xlu0 %v458_v36, %s3602_s20  ;;  %v752_v41 = vor.u32 %v751_v34, %v750_v33  ;;  %v755_v42 = vrot.slane %v753_v35, 1  ;;  %v759_v43 = vrot.slane %v460_v19, 1 }
  0x3d   : > { %v477_v40 = vor.u32 %v476_v32, %v472_v26  ;;  %v470_v44 = vsel %vm434_vm1, %v465_v37, %v469_v30  ;;  %v760_v45 = vrot.slane %v462_v22, 2  ;;  %v762_v46 = vshrl.u32 %v3704_v1, 16  ;;  %v3779_v30 = vld [vmem:[%s3698_s14 + $0x54] sm:$0xff]  }
  0x3e   : > { %v765_v47 = vrot.slane %v467_v23, 2  ;;  %v757_v49 = vor.u32 %v756_v39, %v755_v42  ;;  %v768_v50 = vrot.slane %v472_v26, 1  ;;  %v769_v51 = vrot.slane %v474_v27, 2  ;;  %v3788_v39 = vld [vmem:[%s3698_s14 + $0x5c] ss:$0 sps:$4 sm:$0x33]  }
  0x3f   : > { %968 = vrot.lane.b32.xlu1 %v923_v25, %s3603_s21  ;;  %v764_v52 = vrot.slane %v762_v46, 1  ;;  %v771_v53 = vshrl.u32 %v3715_v11, 16  ;;  %v774_v54 = vrot.slane %v479_v31, 2  ;;  %v482_v56 = vsel %vm434_vm1, %v477_v40, %v481_v38  ;;  %v3782_v31 = vld [vmem:[%s3698_s14 + $0x48] sm:$0xff]  }
  0x40   : > { %631 = vrot.lane.b32.xlu0 %v470_v44, %s3602_s20  ;;  %v761_v57 = vor.u32 %v760_v45, %v759_v43  ;;  %v758_v59 = vsel %vm740_vm3, %v752_v41, %v757_v49  ;;  %v770_v61 = vor.u32 %v769_v51, %v768_v50  ;;  %v927_v2 = vrot.slane %v3711_v6, 2 }
  0x41   : > { %v766_v60 = vor.u32 %v765_v47, %v764_v52  ;;  %v773_v62 = vrot.slane %v771_v53, 1  ;;  %v928_v3 = vrot.slane %v3715_v11, 2  ;;  %v498_v4 = vshll.u32 %v3736_v48, 16  ;;  %v3795_v47 = vld [vmem:[%s3698_s14 + $0x50] ss:$0 sps:$4 sm:$0x33]  }
  0x42   : > { %v496_v7 = vshrl.u32 %v3736_v48, 16  ;;  %v503_v8 = vshll.u32 %v3741_v55, 16  ;;  %v924_v10 = vrot.slane %v3701_v0, 2  ;;  %v486_v6 = vshll.u32 %v3746_v58, 16 }
  0x43   : > { %633 = vrot.lane.b32.xlu1 %v482_v56, %s3602_s20  ;;  %v775_v5 = vor.u32 %v774_v54, %v773_v62  ;;  %v767_v9 = vsel %vm740_vm3, %v761_v57, %v766_v60  ;;  %v500_v12 = vrot.slane %v498_v4, 1  ;;  %v925_v13 = vrot.slane %v3704_v1, 2 }
  0x44   : > { %887 = vrot.lane.b32.xlu0 %v758_v59, %s3604_s22  ;;  %v484_v14 = vshrl.u32 %v3746_v58, 16  ;;  %v491_v15 = vshll.u32 %v3750_v63, 16  ;;  %v488_v16 = vrot.slane %v486_v6, 1  ;;  %v505_v18 = vrot.slane %v503_v8, 1 }
  0x45   : > { %v776_v11 = vsel %vm740_vm3, %v770_v61, %v775_v5  ;;  %v501_v17 = vor.u32 %v500_v12, %v496_v7  ;;  %v929_v0 = vsel %vm917_vm2, %v927_v2, %v928_v3  ;;  %v789_v19 = vshrl.u32 %v3741_v55, 16 }
  0x46   : > { %v926_v20 = vsel %vm917_vm2, %v924_v10, %v925_v13  ;;  %v489_v1 = vor.u32 %v488_v16, %v484_v14  ;;  %v493_v21 = vrot.slane %v491_v15, 1  ;;  %v675_v22 = vrot.slane %v3736_v48, 1 }
  0x47   : > { %889 = vrot.lane.b32.xlu1 %v767_v9, %s3604_s22  ;;  %v676_v23 = vrot.slane %v3741_v55, 1  ;;  %v672_v24 = vrot.slane %v3746_v58, 1  ;;  %v780_v25 = vshrl.u32 %v3750_v63, 16  ;;  %v506_v26 = vsel %vm434_vm1, %v501_v17, %v505_v18 }
  0x48   : > { %891 = vrot.lane.b32.xlu0 %v776_v11, %s3604_s22  ;;  %v673_v27 = vrot.slane %v3750_v63, 1  ;;  %v786_v28 = vrot.slane %v496_v7, 1  ;;  %v787_v29 = vrot.slane %v498_v4, 2  ;;  %v791_v32 = vrot.slane %v789_v19, 1 }
  0x49   : > { %v792_v33 = vrot.slane %v503_v8, 2  ;;  %v777_v34 = vrot.slane %v484_v14, 1  ;;  %v778_v35 = vrot.slane %v486_v6, 2  ;;  %v494_v36 = vsel %vm434_vm1, %v489_v1, %v493_v21  ;;  %v3823_v14 = vld [vmem:[%s3698_s14 + $0x6c] sm:$0xff]  }
  0x4a   : > { %v782_v37 = vrot.slane %v780_v25, 1  ;;  %v783_v38 = vrot.slane %v491_v15, 2  ;;  %v522_v40 = vshll.u32 %v3779_v30, 16  ;;  %v677_v41 = vsel %vm659_vm0, %v675_v22, %v676_v23  ;;  %v3826_v15 = vld [vmem:[%s3698_s14 + $0x60] sm:$0xff]  }
  0x4b   : > { %972 = vrot.lane.b32.xlu1 %v929_v0, %s3603_s21  ;;  %v788_v42 = vor.u32 %v787_v29, %v786_v28  ;;  %v793_v43 = vor.u32 %v792_v33, %v791_v32  ;;  %v674_v44 = vsel %vm659_vm0, %v672_v24, %v673_v27  ;;  %v779_v45 = vor.u32 %v778_v35, %v777_v34  ;;  %v3832_v21 = vld [vmem:[%s3698_s14 + $0x74] ss:$0 sps:$4 sm:$0x33]   ;;  %v3839_v29 = vld [vmem:[%s3698_s14 + $0x68] ss:$0 sps:$4 sm:$0x33]  }
  0x4c   : > { %970 = vrot.lane.b32.xlu0 %v926_v20, %s3603_s21  ;;  %v784_v46 = vor.u32 %v783_v38, %v782_v37  ;;  %v510_v49 = vshll.u32 %v3782_v31, 16  ;;  %v933_v50 = vrot.slane %v3736_v48, 2  ;;  %v520_v51 = vshrl.u32 %v3779_v30, 16 }
  0x4d   : > { %v524_v52 = vrot.slane %v522_v40, 1  ;;  %v527_v53 = vshll.u32 %v3788_v39, 16  ;;  %v794_v54 = vsel %vm740_vm3, %v788_v42, %v793_v43  ;;  %v934_v56 = vrot.slane %v3741_v55, 2 }
  0x4e   : > { %v930_v57 = vrot.slane %v3746_v58, 2  ;;  %v931_v59 = vrot.slane %v3750_v63, 2  ;;  %v785_v60 = vsel %vm740_vm3, %v779_v45, %v784_v46  ;;  %v508_v61 = vshrl.u32 %v3782_v31, 16 }
  0x4f   : > { %637 = vrot.lane.b32.xlu1 %v506_v26, %s3602_s20  ;;  %v512_v48 = vrot.slane %v510_v49, 1  ;;  %v515_v62 = vshll.u32 %v3795_v47, 16  ;;  %v525_v2 = vor.u32 %v524_v52, %v520_v51  ;;  %v529_v3 = vrot.slane %v527_v53, 1 }
  0x50   : > { %635 = vrot.lane.b32.xlu0 %v494_v36, %s3602_s20  ;;  %v935_v55 = vsel %vm917_vm2, %v933_v50, %v934_v56  ;;  %v807_v58 = vshrl.u32 %v3788_v39, 16  ;;  %v932_v63 = vsel %vm917_vm2, %v930_v57, %v931_v59  ;;  %v798_v7 = vshrl.u32 %v3795_v47, 16 }
  0x51   : > { %v513_v4 = vor.u32 %v512_v48, %v508_v61  ;;  %v517_v5 = vrot.slane %v515_v62, 1  ;;  %v681_v8 = vrot.slane %v3779_v30, 1  ;;  %v682_v9 = vrot.slane %v3788_v39, 1  ;;  %v3866_v48 = vld [vmem:[%s3698_s14 + $0x78] sm:$0xff]  }
  0x52   : > { %v678_v10 = vrot.slane %v3782_v31, 1  ;;  %v530_v12 = vsel %vm434_vm1, %v525_v2, %v529_v3  ;;  %v679_v6 = vrot.slane %v3795_v47, 1  ;;  %v804_v11 = vrot.slane %v520_v51, 1 }
  0x53   : > { %718 = vrot.lane.b32.xlu1 %v677_v41, %s3601_s18  ;;  %v805_v13 = vrot.slane %v522_v40, 2  ;;  %v809_v16 = vrot.slane %v807_v58, 1  ;;  %v810_v17 = vrot.slane %v527_v53, 2  ;;  %v795_v18 = vrot.slane %v508_v61, 1 }
  0x54   : > { %716 = vrot.lane.b32.xlu0 %v674_v44, %s3601_s18  ;;  %v796_v0 = vrot.slane %v510_v49, 2  ;;  %v518_v19 = vsel %vm434_vm1, %v513_v4, %v517_v5  ;;  %v800_v20 = vrot.slane %v798_v7, 1  ;;  %v801_v1 = vrot.slane %v515_v62, 2  ;;  %v3511_v4 = vld [vmem:[%s3698_s14 + $0x80] ss:$0 sps:$4 sm:$0x33]  }
  0x55   : > { %v683_v22 = vsel %vm659_vm0, %v681_v8, %v682_v9  ;;  %v806_v23 = vor.u32 %v805_v13, %v804_v11  ;;  %v811_v24 = vor.u32 %v810_v17, %v809_v16  ;;  %v546_v25 = vshll.u32 %v3823_v14, 16 }
  0x56   : > { %v680_v26 = vsel %vm659_vm0, %v678_v10, %v679_v6  ;;  %v797_v27 = vor.u32 %v796_v0, %v795_v18  ;;  %v802_v28 = vor.u32 %v801_v1, %v800_v20  ;;  %v534_v32 = vshll.u32 %v3826_v15, 16 }
  0x57   : > { %895 = vrot.lane.b32.xlu1 %v794_v54, %s3604_s22  ;;  %v939_v33 = vrot.slane %v3779_v30, 2  ;;  %v940_v34 = vrot.slane %v3788_v39, 2  ;;  %v936_v35 = vrot.slane %v3782_v31, 2  ;;  %v937_v36 = vrot.slane %v3795_v47, 2 }
  0x58   : > { %893 = vrot.lane.b32.xlu0 %v785_v60, %s3604_s22  ;;  %v812_v37 = vsel %vm740_vm3, %v806_v23, %v811_v24  ;;  %v544_v38 = vshrl.u32 %v3823_v14, 16  ;;  %v548_v40 = vrot.slane %v546_v25, 1  ;;  %v551_v41 = vshll.u32 %v3832_v21, 16 }
  0x59   : > { %v803_v42 = vsel %vm740_vm3, %v797_v27, %v802_v28  ;;  %v532_v30 = vshrl.u32 %v3826_v15, 16  ;;  %v536_v39 = vrot.slane %v534_v32, 1  ;;  %v539_v43 = vshll.u32 %v3839_v29, 16 }
  0x5a   : > { %v825_v31 = vshrl.u32 %v3832_v21, 16  ;;  %v941_v44 = vsel %vm917_vm2, %v939_v33, %v940_v34  ;;  %v549_v45 = vor.u32 %v548_v40, %v544_v38  ;;  %v553_v46 = vrot.slane %v551_v41, 1  ;;  %v3897_v34 = vld [vmem:[%s3698_s14 + $0x98] ss:$0 sps:$4 sm:$0x33]  }
  0x5b   : > { %976 = vrot.lane.b32.xlu1 %v935_v55, %s3603_s21  ;;  %v938_v47 = vsel %vm917_vm2, %v936_v35, %v937_v36  ;;  %v537_v49 = vor.u32 %v536_v39, %v532_v30  ;;  %v541_v50 = vrot.slane %v539_v43, 1  ;;  %v816_v51 = vshrl.u32 %v3839_v29, 16 }
  0x5c   : > { %974 = vrot.lane.b32.xlu0 %v932_v63, %s3603_s21  ;;  %v687_v52 = vrot.slane %v3823_v14, 1  ;;  %v688_v53 = vrot.slane %v3832_v21, 1  ;;  %v684_v54 = vrot.slane %v3826_v15, 1  ;;  %v685_v56 = vrot.slane %v3839_v29, 1 }
  0x5d   : > { %v822_v57 = vrot.slane %v544_v38, 1  ;;  %v823_v59 = vrot.slane %v546_v25, 2  ;;  %v827_v60 = vrot.slane %v825_v31, 1  ;;  %v828_v61 = vrot.slane %v551_v41, 2 }
  0x5e   : > { %v554_v62 = vsel %vm434_vm1, %v549_v45, %v553_v46  ;;  %v813_v2 = vrot.slane %v532_v30, 1  ;;  %v814_v3 = vrot.slane %v534_v32, 2  ;;  %v542_v55 = vsel %vm434_vm1, %v537_v49, %v541_v50  ;;  %v3902_v38 = vld [vmem:[%s3698_s14 + $0x8c] ss:$0 sps:$4 sm:$0x33]  }
  0x5f   : > { %641 = vrot.lane.b32.xlu1 %v530_v12, %s3602_s20  ;;  %v818_v58 = vrot.slane %v816_v51, 1  ;;  %v819_v63 = vrot.slane %v539_v43, 2  ;;  %v689_v5 = vsel %vm659_vm0, %v687_v52, %v688_v53  ;;  %v824_v7 = vor.u32 %v823_v59, %v822_v57 }
  0x60   : > { %639 = vrot.lane.b32.xlu0 %v518_v19, %s3602_s20  ;;  %v829_v8 = vor.u32 %v828_v61, %v827_v60  ;;  %v558_v9 = vshll.u32 %v3866_v48, 16  ;;  %v686_v10 = vsel %vm659_vm0, %v684_v54, %v685_v56  ;;  %v815_v12 = vor.u32 %v814_v3, %v813_v2  ;;  %v3884_v19 = vld [vmem:[%s3698_s14 + $0x90] sm:$0xff]  }
  0x61   : > { %v820_v6 = vor.u32 %v819_v63, %v818_v58  ;;  %v945_v11 = vrot.slane %v3823_v14, 2  ;;  %v946_v13 = vrot.slane %v3832_v21, 2  ;;  %v556_v17 = vshrl.u32 %v3866_v48, 16  ;;  %v3890_v21 = vld [vmem:[%s3698_s14 + $0x84] sm:$0xff]  }
  0x62   : > { %v830_v16 = vsel %vm740_vm3, %v824_v7, %v829_v8  ;;  %v560_v18 = vrot.slane %v558_v9, 1  ;;  %v563_v0 = vshll.u32 %v3511_v4, 16  ;;  %v942_v1 = vrot.slane %v3826_v15, 2  ;;  %v3928_v8 = vld [vmem:[%s3698_s14 + $0xa8] sm:$0xff]  }
  0x63   : > { %722 = vrot.lane.b32.xlu1 %v683_v22, %s3601_s18  ;;  %v821_v20 = vsel %vm740_vm3, %v815_v12, %v820_v6  ;;  %v943_v22 = vrot.slane %v3839_v29, 2  ;;  %v834_v23 = vshrl.u32 %v3511_v4, 16  ;;  %v947_v24 = vsel %vm917_vm2, %v945_v11, %v946_v13  ;;  %v3932_v11 = vld [vmem:[%s3698_s14 + $0x9c] sm:$0xff]  }
  0x64   : > { %720 = vrot.lane.b32.xlu0 %v680_v26, %s3601_s18  ;;  %v690_v25 = vrot.slane %v3866_v48, 1  ;;  %v691_v26 = vrot.slane %v3511_v4, 1  ;;  %v831_v27 = vrot.slane %v556_v17, 1  ;;  %v561_v28 = vor.u32 %v560_v18, %v556_v17  ;;  %v3936_v17 = vld [vmem:[%s3698_s14 + $0xb0] ss:$0 sps:$4 sm:$0x33]  }
  0x65   : > { %v565_v32 = vrot.slane %v563_v0, 1  ;;  %v832_v33 = vrot.slane %v558_v9, 2  ;;  %v582_v29 = vshll.u32 %v3884_v19, 16  ;;  %v944_v35 = vsel %vm917_vm2, %v942_v1, %v943_v22  ;;  %v3944_v22 = vld [vmem:[%s3698_s14 + $0xa4] ss:$0 sps:$4 sm:$0x33]  }
  0x66   : > { %v836_v36 = vrot.slane %v834_v23, 1  ;;  %v570_v40 = vshll.u32 %v3890_v21, 16  ;;  %v692_v41 = vsel %vm659_vm0, %v690_v25, %v691_v26  ;;  %v949_v30 = vrot.slane %v3511_v4, 2  ;;  %v3526_v26 = vld [vmem:[%s4651_s1 + $0x8] sm:$0xff]  }
  0x67   : > { %899 = vrot.lane.b32.xlu1 %v812_v37, %s3604_s22  ;;  %v837_v37 = vrot.slane %v563_v0, 2  ;;  %v580_v39 = vshrl.u32 %v3884_v19, 16  ;;  %v566_v43 = vsel %vm434_vm1, %v561_v28, %v565_v32  ;;  %v833_v31 = vor.u32 %v832_v33, %v831_v27  ;;  %v3527_v27 = vld [vmem:[%s4651_s1 + $0x10] sm:$0xff]  }
  0x68   : > { %897 = vrot.lane.b32.xlu0 %v803_v42, %s3604_s22  ;;  %v948_v42 = vrot.slane %v3866_v48, 2  ;;  %v587_v45 = vshll.u32 %v3897_v34, 16  ;;  %v572_v49 = vrot.slane %v570_v40, 1  ;;  %v575_v50 = vshll.u32 %v3902_v38, 16 }
  0x69   : > { %v838_v46 = vor.u32 %v837_v37, %v836_v36  ;;  %v852_v51 = vshrl.u32 %v3897_v34, 16  ;;  %v843_v60 = vshrl.u32 %v3902_v38, 16  ;;  %v696_v61 = vrot.slane %v3884_v19, 1 }
  0x6a   : > { %v950_v52 = vsel %vm917_vm2, %v948_v42, %v949_v30  ;;  %v589_v54 = vrot.slane %v587_v45, 1  ;;  %v577_v59 = vrot.slane %v575_v50, 1  ;;  %v849_v2 = vrot.slane %v580_v39, 1 }
  0x6b   : > { %980 = vrot.lane.b32.xlu1 %v941_v44, %s3603_s21  ;;  %v584_v44 = vrot.slane %v582_v29, 1  ;;  %v839_v56 = vsel %vm740_vm3, %v833_v31, %v838_v46  ;;  %v850_v3 = vrot.slane %v582_v29, 2  ;;  %v855_v58 = vrot.slane %v587_v45, 2 }
  0x6c   : > { %978 = vrot.lane.b32.xlu0 %v938_v47, %s3603_s21  ;;  %v568_v47 = vshrl.u32 %v3890_v21, 16  ;;  %v693_v4 = vrot.slane %v3890_v21, 1  ;;  %v845_v12 = vrot.slane %v843_v60, 1  ;;  %v846_v6 = vrot.slane %v575_v50, 2 }
  0x6d   : > { %v585_v53 = vor.u32 %v584_v44, %v580_v39  ;;  %v851_v13 = vor.u32 %v850_v3, %v849_v2  ;;  %v606_v1 = vshll.u32 %v3928_v8, 16  ;;  %v594_v25 = vshll.u32 %v3932_v11, 16 }
  0x6e   : > { %v573_v57 = vor.u32 %v572_v49, %v568_v47  ;;  %v840_v7 = vrot.slane %v568_v47, 1  ;;  %v955_v28 = vrot.slane %v3897_v34, 2  ;;  %v951_v32 = vrot.slane %v3890_v21, 2 }
  0x6f   : > { %645 = vrot.lane.b32.xlu1 %v554_v62, %s3602_s20  ;;  %v697_v62 = vrot.slane %v3897_v34, 1  ;;  %v590_v63 = vsel %vm434_vm1, %v585_v53, %v589_v54  ;;  %v952_v33 = vrot.slane %v3902_v38, 2  ;;  %v611_v36 = vshll.u32 %v3936_v17, 16 }
  0x70   : > { %643 = vrot.lane.b32.xlu0 %v542_v55, %s3602_s20  ;;  %v854_v55 = vrot.slane %v852_v51, 1  ;;  %v578_v9 = vsel %vm434_vm1, %v573_v57, %v577_v59  ;;  %v3605_v37 = vmov 65535   ;;  %v592_v34 = vshrl.u32 %v3932_v11, 16 }
  0x71   : > { %v698_v18 = vsel %vm659_vm0, %v696_v61, %v697_v62  ;;  %v599_v42 = vshll.u32 %v3944_v22, 16  ;;  %v596_v39 = vrot.slane %v594_v25, 1  ;;  %v613_v46 = vrot.slane %v611_v36, 1 }
  0x72   : > { %v870_v47 = vshrl.u32 %v3936_v17, 16  ;;  %v953_v49 = vsel %vm917_vm2, %v951_v32, %v952_v33  ;;  %v702_v53 = vrot.slane %v3928_v8, 1  ;;  %v703_v54 = vrot.slane %v3936_v17, 1 }
  0x73   : > { %726 = vrot.lane.b32.xlu1 %v689_v5, %s3601_s18  ;;  %v694_v5 = vrot.slane %v3902_v38, 1  ;;  %v597_v50 = vor.u32 %v596_v39, %v592_v34  ;;  %v601_v51 = vrot.slane %v599_v42, 1  ;;  %v700_v57 = vrot.slane %v3944_v22, 1 }
  0x74   : > { %724 = vrot.lane.b32.xlu0 %v686_v10, %s3601_s18  ;;  %v841_v10 = vrot.slane %v570_v40, 2  ;;  %v1226_v40 = vsel %vm659_vm0, 4294967295, %v3605_v37  ;;  %v868_v60 = vrot.slane %v606_v1, 2  ;;  %v872_v62 = vrot.slane %v870_v47, 1 }
  0x75   : > { %v695_v0 = vsel %vm659_vm0, %v693_v4, %v694_v5  ;;  %v3964_v30 = vsel %vm1225_vm4, %v1226_v40, 0  ;;  %v873_v2 = vrot.slane %v611_v36, 2  ;;  %v858_v3 = vrot.slane %v592_v34, 1 }
  0x76   : > { %v842_v23 = vor.u32 %v841_v10, %v840_v7  ;;  %v3969_v31 = vand.u32 %v3527_v27, %v3964_v30  ;;  %v864_v5 = vrot.slane %v599_v42, 2  ;;  %v3991_v7 = vld [vmem:[%s3698_s14 + $0xb4] sm:$0xff]   ;;  %v704_v10 = vsel %vm659_vm0, %v702_v53, %v703_v54 }
  0x77   : > { %903 = vrot.lane.b32.xlu1 %v830_v16, %s3604_s22  ;;  %v856_v16 = vor.u32 %v855_v58, %v854_v55  ;;  %v3532_v55 = vld [vmem:[%s4651_s1] sm:$0xff]   ;;  %v602_v58 = vsel %vm434_vm1, %v597_v50, %v601_v51  ;;  %v957_v27 = vrot.slane %v3932_v11, 2  ;;  %v616_v36 = vshrl.u32 %v3991_v7, 16 }
  0x78   : > { %901 = vrot.lane.b32.xlu0 %v821_v20, %s3604_s22  ;;  %v954_v20 = vrot.slane %v3884_v19, 2  ;;  %3219 = vmatprep.subr.bf16.mxu0 %v3969_v31 }
  0x79   : > { %v857_v29 = vsel %vm740_vm3, %v851_v13, %v856_v16  ;;  %3220 = vmatpush3.bf16.msra.mxu0 %v3969_v31  ;;  %v874_v13 = vor.u32 %v873_v2, %v872_v62  ;;  %v4001_v16 = vld [vmem:[%s3698_s14 + $0xbc] ss:$0 sps:$4 sm:$0x33]  }
  0x7a   : > { %v956_v44 = vsel %vm917_vm2, %v954_v20, %v955_v28  ;;  %v958_v28 = vrot.slane %v3944_v22, 2  ;;  %v623_v33 = vshll.u32 %v4001_v16, 16  ;;  %v706_v42 = vrot.slane %v4001_v16, 1 }
  0x7b   : > { %984 = vrot.lane.b32.xlu1 %v947_v24, %s3603_s21  ;;  %v847_v24 = vor.u32 %v846_v6, %v845_v12  ;;  %v964_v62 = vrot.slane %v4001_v16, 2 }
  0x7c   : > { %982 = vrot.lane.b32.xlu0 %v944_v35, %s3603_s21  ;;  %v604_v35 = vshrl.u32 %v3928_v8, 16  ;;  %v959_v34 = vsel %vm917_vm2, %v957_v27, %v958_v28  ;;  %v625_v39 = vrot.slane %v623_v33, 1 }
  0x7d   : > { %v848_v38 = vsel %vm740_vm3, %v842_v23, %v847_v24  ;;  %v4008_v23 = vld [vmem:[%s3698_s14 + $0xc0] sm:$0xff]  }
  0x7e   : > { %v867_v59 = vrot.slane %v604_v35, 1  ;;  %v1143_v40 = vshll.u32 %v4008_v23, 16  ;;  %v1141_v47 = vshrl.u32 %v4008_v23, 16 }
  0x7f   : > { %728 = vrot.lane.b32.xlu1 %v692_v41, %s3601_s18  ;;  %v608_v41 = vrot.slane %v606_v1, 1  ;;  %v618_v1 = vshll.u32 %v3991_v7, 16 }
  0x80   : > { %647 = vrot.lane.b32.xlu0 %v566_v43, %s3602_s20  ;;  %v1229_v43 = vand.u32 %v3526_v26, %v3964_v30  ;;  %v869_v6 = vor.u32 %v868_v60, %v867_v59  ;;  %v961_v26 = vrot.slane %v3936_v17, 2  ;;  %v3523_v17 = vld [vmem:[%s3698_s14 + $0xc8] ss:$0 sps:$4 sm:$0x33]   ;;  %v4040_v60 = vld [vmem:[%s3698_s14] sm:$0xff]   ;;  %v1159_v2 = vrot.slane %v1141_v47, 1 }
  0x81   : > { %v609_v45 = vor.u32 %v608_v41, %v604_v35  ;;  %v620_v37 = vrot.slane %v618_v1, 1  ;;  %v1148_v50 = vshll.u32 %v3523_v17, 16  ;;  %v1162_v54 = vshrl.u32 %v3523_v17, 16 }
  0x82   : > { %3151 = vmatprep.subr.bf16.mxu1 %v1229_v43  ;;  %v875_v32 = vsel %vm740_vm3, %v869_v6, %v874_v13  ;;  %v1155_v6 = vrot.slane %v3523_v17, 1  ;;  %v438_v13 = vshll.u32 %v4040_v60, 16 }
  0x83   : > { %986 = vrot.lane.b32.xlu1 %v950_v52, %s3603_s21  ;;  %3152 = vmatpush3.bf16.msra.mxu1 %v1229_v43  ;;  %v861_v52 = vshrl.u32 %v3944_v22, 16  ;;  %v614_v61 = vsel %vm434_vm1, %v609_v45, %v613_v46  ;;  %v705_v22 = vrot.slane %v3991_v7, 1  ;;  %v877_v43 = vrot.slane %v618_v1, 2 }
  0x84   : > { %905 = vrot.lane.b32.xlu0 %v839_v56, %s3604_s22  ;;  %v699_v56 = vrot.slane %v3932_v11, 1  ;;  %v882_v45 = vrot.slane %v623_v33, 2  ;;  %v621_v46 = vor.u32 %v620_v37, %v616_v36  ;;  %v1150_v59 = vrot.slane %v1148_v50, 1 }
  0x85   : > { %v863_v4 = vrot.slane %v861_v52, 1  ;;  %v707_v51 = vsel %vm659_vm0, %v705_v22, %v706_v42  ;;  %v440_v33 = vrot.slane %v438_v13, 1  ;;  %v4072_v22 = vld [vmem:[%s3698_s14 + $0xd4] ss:$0 sps:$4 sm:$0x33]  }
  0x86   : > { %v701_v12 = vsel %vm659_vm0, %v699_v56, %v700_v57  ;;  %v626_v56 = vsel %vm434_vm1, %v621_v46, %v625_v39 }
  0x87   : > { %651 = vrot.lane.b32.xlu1 %v590_v63, %s3602_s20  ;;  %v859_v63 = vrot.slane %v594_v25, 2  ;;  %v865_v20 = vor.u32 %v864_v5, %v863_v4  ;;  %v960_v25 = vrot.slane %v3928_v8, 2  ;;  %v1164_v4 = vrot.slane %v1162_v54, 1 }
  0x88   : > { %649 = vrot.lane.b32.xlu0 %v578_v9, %s3602_s20  ;;  %v3533_v9 = vld [vmem:[%s4651_s1 + $0x18] sm:$0xff]   ;;  %v1165_v5 = vrot.slane %v1148_v50, 2  ;;  %v3537_v50 = vld [vmem:[%s3698_s14 + $0xc] sm:$0xff]   ;;  %v1579_v54 = vshll.u32 %v4072_v22, 16 }
  0x89   : > { %v4011_v24 = vand.u32 %v3533_v9, %v3964_v30  ;;  %v962_v41 = vsel %vm917_vm2, %v960_v25, %v961_v26 }
  0x8a   : > { %v1166_v26 = vor.u32 %v1165_v5, %v1164_v4  ;;  %v4093_v4 = vld [vmem:[%s3698_s14 + $0xe0] ss:$0 sps:$4 sm:$0x33]  }
  0x8b   : > { %732 = vrot.lane.b32.xlu1 %v698_v18, %s3601_s18  ;;  %v4004_v18 = vand.u32 %v3532_v55, %v3964_v30  ;;  %3253 = vmatprep.subr.bf16.mxu0 %v4011_v24 }
  0x8c   : > { %730 = vrot.lane.b32.xlu0 %v695_v0, %s3601_s18  ;;  %v860_v0 = vor.u32 %v859_v63, %v858_v3  ;;  %v4046_v3 = vld [vmem:[%s3698_s14 + $0x8] ss:$0 sps:$4 sm:$0x33]   ;;  %v1160_v63 = vrot.slane %v1143_v40, 2 }
  0x8d   : > { %3185 = vmatprep.subr.bf16.mxu1 %v4004_v18 }
  0x8e   : > { %v866_v35 = vsel %vm740_vm3, %v860_v0, %v865_v20  ;;  %v1171_v0 = vrot.slane %v3523_v17, 2  ;;  %v443_v20 = vshll.u32 %v4046_v3, 16  ;;  %v1161_v25 = vor.u32 %v1160_v63, %v1159_v2 }
  0x8f   : > { %909 = vrot.lane.b32.xlu1 %v857_v29, %s3604_s22  ;;  %v879_v29 = vshrl.u32 %v4001_v16, 16  ;;  %v1170_v16 = vrot.slane %v4008_v23, 2 }
  0x90   : > { %907 = vrot.lane.b32.xlu0 %v848_v38, %s3604_s22  ;;  %v876_v38 = vrot.slane %v616_v36, 1  ;;  %v445_v17 = vrot.slane %v443_v20, 1 }
  0x91   : > { %v1172_v37 = vsel %vm917_vm2, %v1170_v16, %v1171_v0  ;;  %v1581_v0 = vrot.slane %v1579_v54, 1 }
  0x92   : > { %v878_v52 = vor.u32 %v877_v43, %v876_v38  ;;  %v742_v38 = vrot.slane %v438_v13, 2 }
  0x93   : > { %990 = vrot.lane.b32.xlu1 %v956_v44, %s3603_s21  ;;  %v881_v44 = vrot.slane %v879_v29, 1  ;;  %v744_v29 = vshrl.u32 %v4046_v3, 16 }
  0x94   : > { %988 = vrot.lane.b32.xlu0 %v953_v49, %s3603_s21  ;;  %v1145_v49 = vrot.slane %v1143_v40, 1  ;;  %v660_v40 = vrot.slane %v4040_v60, 1 }
  0x95   : > { %v883_v53 = vor.u32 %v882_v45, %v881_v44  ;;  %v746_v44 = vrot.slane %v744_v29, 1  ;;  %v747_v45 = vrot.slane %v443_v20, 2 }
  0x96   : > { %v1146_v57 = vor.u32 %v1145_v49, %v1141_v47  ;;  %v4079_v49 = vld [vmem:[%s3698_s14 + $0xd8] sm:$0xff]  }
  0x97   : > { %655 = vrot.lane.b32.xlu1 %v614_v61, %s3602_s20  ;;  %v963_v61 = vrot.slane %v3991_v7, 2  ;;  %v748_v2 = vor.u32 %v747_v45, %v746_v44  ;;  %v3536_v45 = vld [vmem:[%s4651_s1 + $0x20] sm:$0xff]  }
  0x98   : > { %653 = vrot.lane.b32.xlu0 %v602_v58, %s3602_s20  ;;  %v884_v58 = vsel %vm740_vm3, %v878_v52, %v883_v53  ;;  %v918_v52 = vrot.slane %v4040_v60, 2  ;;  %v919_v53 = vrot.slane %v4046_v3, 2 }
  0x99   : > { %v965_v1 = vsel %vm917_vm2, %v963_v61, %v964_v62 }
  0x9a   : > { %v920_v16 = vsel %vm917_vm2, %v918_v52, %v919_v53 }
  0x9b   : > { %736 = vrot.lane.b32.xlu1 %v704_v10, %s3601_s18  ;;  %v1151_v10 = vsel %vm434_vm1, %v1146_v57, %v1150_v59  ;;  %v1593_v59 = vshrl.u32 %v4072_v22, 16 }
  0x9c   : > { %734 = vrot.lane.b32.xlu0 %v701_v12, %s3601_s18  ;;  %v1154_v12 = vrot.slane %v4008_v23, 1 }
  0x9e   : > { %v1156_v28 = vsel %vm659_vm0, %v1154_v12, %v1155_v6  ;;  %v1586_v12 = vrot.slane %v4072_v22, 1  ;;  %v1831_v6 = vshll.u32 %v4079_v49, 16 }
  0x9f   : > { %913 = vrot.lane.b32.xlu1 %v875_v32, %s3604_s22  ;;  %v436_v32 = vshrl.u32 %v4040_v60, 16 }
  0xa0   : > { %911 = vrot.lane.b32.xlu0 %v866_v35, %s3604_s22  ;;  %v4066_v35 = vld [vmem:[%s3698_s14 + $0xcc] sm:$0xff]  }
  0xa1   : > { %v741_v42 = vrot.slane %v436_v32, 1  ;;  %v441_v43 = vor.u32 %v440_v33, %v436_v32  ;;  %v1574_v46 = vshll.u32 %v4066_v35, 16 }
  0xa3   : > { %994 = vrot.lane.b32.xlu1 %v962_v41, %s3603_s21  ;;  %v1167_v41 = vsel %vm740_vm3, %v1161_v25, %v1166_v26  ;;  %v743_v57 = vor.u32 %v742_v38, %v741_v42  ;;  %v446_v62 = vsel %vm434_vm1, %v441_v43, %v445_v17  ;;  %v1576_v63 = vrot.slane %v1574_v46, 1  ;;  %v3539_v17 = vld [vmem:[%s3698_s14 + $0x18] sm:$0xff]  }
  0xa4   : > { %992 = vrot.lane.b32.xlu0 %v959_v34, %s3603_s21  ;;  %v661_v34 = vrot.slane %v4046_v3, 1  ;;  %v1595_v25 = vrot.slane %v1593_v59, 1  ;;  %v1596_v26 = vrot.slane %v1579_v54, 2  ;;  %v1833_v42 = vrot.slane %v1831_v6, 1 }
  0xa5   : > { %v749_v29 = vsel %vm740_vm3, %v743_v57, %v748_v2  ;;  %v1850_v57 = vshrl.u32 %v4093_v4, 16  ;;  %v1602_v2 = vrot.slane %v4072_v22, 2 }
  0xa6   : > { %v1597_v44 = vor.u32 %v1596_v26, %v1595_v25  ;;  %v1859_v25 = vrot.slane %v4093_v4, 2 }
  0xa7   : > { %738 = vrot.lane.b32.xlu1 %v707_v51, %s3601_s18 }
  0xa8   : > { %657 = vrot.lane.b32.xlu0 %v626_v56, %s3602_s20  ;;  %v4049_v55 = vpop.permute.xlu0 %712  ;;  %v662_v56 = vsel %vm659_vm0, %v660_v40, %v661_v34  ;;  %v1829_v34 = vshrl.u32 %v4079_v49, 16 }
  0xa9   : > { %v711_v9 = vpop.permute.xlu1 %710 }
  0xab   : > { %915 = vrot.lane.b32.xlu1 %v884_v58, %s3604_s22  ;;  %v1572_v58 = vshrl.u32 %v4066_v35, 16 }
  0xac   : > { %1152 = vrot.lane.b32.xlu0 %v1151_v10, %s3602_s20  ;;  %v1585_v10 = vrot.slane %v4066_v35, 1 }
  0xad   : > { %v4060_v27 = vpop.permute.xlu1 %714  ;;  %v1590_v20 = vrot.slane %v1572_v58, 1 }
  0xae   : > { %v630_v36 = vpop.permute.xlu0 %629 }
  0xaf   : > { %996 = vrot.lane.b32.xlu1 %v965_v1, %s3603_s21  ;;  %v1002_v51 = vsel %vm998_vm5, %v3537_v50, %v630_v36  ;;  %v1591_v1 = vrot.slane %v1574_v46, 2  ;;  %v1577_v36 = vor.u32 %v1576_v63, %v1572_v58  ;;  %v4147_v58 = vand.u32 %v3536_v45, %v3964_v30  ;;  %v3540_v45 = vld [vmem:[%s3698_s14 + $0x3c] sm:$0xff]  }
  0xb0   : > { %1157 = vrot.lane.b32.xlu0 %v1156_v28, %s3601_s18  ;;  %v1035_v3 = vsel %vm1031_vm6, %v1002_v51, %v711_v9  ;;  %v3538_v28 = vld [vmem:[%s3698_s14 + $0x24] sm:$0xff]   ;;  %v1852_v30 = vrot.slane %v1850_v57, 1 }
  0xb1   : > { %v969_v39 = vpop.permute.xlu1 %968  ;;  %v1592_v43 = vor.u32 %v1591_v1, %v1590_v20  ;;  %v1582_v51 = vsel %vm434_vm1, %v1577_v36, %v1581_v0  ;;  %v3535_v0 = vld [vmem:[%s3698_s14 + $0xec] ss:$0 sps:$4 sm:$0x33]  }
  0xb2   : > { %v632_v47 = vpop.permute.xlu0 %631  ;;  %v2100_v36 = vrot.slane %v3535_v0, 1  ;;  %v2116_v57 = vrot.slane %v3535_v0, 2 }
  0xb3   : > { %1173 = vrot.lane.b32.xlu1 %v1172_v37, %s3603_s21  ;;  %v1836_v37 = vshll.u32 %v4093_v4, 16  ;;  %v1004_v40 = vsel %vm998_vm5, %v3539_v17, %v632_v47  ;;  %v2107_v17 = vshrl.u32 %v3535_v0, 16 }
  0xb4   : > { %1168 = vrot.lane.b32.xlu0 %v1167_v41, %s3604_s22  ;;  %v1037_v46 = vsel %vm1031_vm6, %v1004_v40, %v4049_v55  ;;  %v4137_v55 = vld [vmem:[%s3698_s14 + $0xe4] sm:$0xff]  }
  0xb5   : > { %v634_v61 = vpop.permute.xlu1 %633  ;;  %v2088_v20 = vshll.u32 %v4137_v55, 16 }
  0xb6   : > { %v888_v5 = vpop.permute.xlu0 %887  ;;  %v1006_v32 = vsel %vm998_vm5, %v3538_v28, %v634_v61  ;;  %v1598_v61 = vsel %vm740_vm3, %v1592_v43, %v1597_v44 }
  0xb7   : > { %v1068_v13 = vsel %vm1064_vm7, %v1035_v3, %v888_v5  ;;  %708 = vrot.lane.b32.xlu1 %v662_v56, %s3601_s18  ;;  %v1039_v38 = vsel %vm1031_vm6, %v1006_v32, %v4060_v27  ;;  %v1838_v27 = vrot.slane %v1836_v37, 1  ;;  %v1834_v56 = vor.u32 %v1833_v42, %v1829_v34 }
  0xb8   : > { %627 = vrot.lane.b32.xlu0 %v446_v62, %s3602_s20  ;;  %v4104_v9 = vsel %vm1097_vm8, %v1068_v13, %v969_v39  ;;  %v1587_v39 = vsel %vm659_vm0, %v1585_v10, %v1586_v12  ;;  %v1601_v62 = vrot.slane %v4066_v35, 2  ;;  %v1842_v3 = vrot.slane %v4079_v49, 1 }
  0xb9   : > { %3153 = vmatprep.mubr.msk.bf16.mxu1 %vm1191_vm9, %v4104_v9  ;;  %v890_v33 = vpop.permute.xlu1 %889  ;;  %v1843_v5 = vrot.slane %v4093_v4, 1  ;;  %v1847_v10 = vrot.slane %v1829_v34, 1  ;;  %v1848_v12 = vrot.slane %v1831_v6, 2  ;;  %v1839_v22 = vsel %vm434_vm1, %v1834_v56, %v1838_v27  ;;  %v3541_v27 = vld [vmem:[%s3698_s14 + $0x30] sm:$0xff]  }
  0xba   : > { %v892_v41 = vpop.permute.xlu0 %891  ;;  %v1070_v52 = vsel %vm1064_vm7, %v1037_v46, %v890_v33  ;;  %v1603_v1 = vsel %vm917_vm2, %v1601_v62, %v1602_v2  ;;  %v1858_v6 = vrot.slane %v4079_v49, 2  ;;  %v2093_v33 = vshll.u32 %v3535_v0, 16 }
  0xbb   : > { %966 = vrot.lane.b32.xlu1 %v920_v16, %s3603_s21  ;;  %v1072_v47 = vsel %vm1064_vm7, %v1039_v38, %v892_v41  ;;  %v1853_v16 = vrot.slane %v1836_v37, 2  ;;  %v1844_v26 = vsel %vm659_vm0, %v1842_v3, %v1843_v5  ;;  %v1849_v28 = vor.u32 %v1848_v12, %v1847_v10 }
  0xbc   : > { %885 = vrot.lane.b32.xlu0 %v749_v29, %s3604_s22  ;;  %v2099_v29 = vrot.slane %v4137_v55, 1  ;;  %v2086_v4 = vshrl.u32 %v4137_v55, 16  ;;  %v2090_v37 = vrot.slane %v2088_v20, 1  ;;  %v1860_v40 = vsel %vm917_vm2, %v1858_v6, %v1859_v25 }
  0xbd   : > { %v973_v50 = vpop.permute.xlu1 %972  ;;  %v2105_v44 = vrot.slane %v2088_v20, 2  ;;  %v2115_v56 = vrot.slane %v4137_v55, 2 }
  0xbe   : > { %v4129_v53 = vsel %vm1097_vm8, %v1072_v47, %v973_v50  ;;  %v971_v54 = vpop.permute.xlu0 %970  ;;  %v2104_v34 = vrot.slane %v2086_v4, 1  ;;  %v2101_v43 = vsel %vm659_vm0, %v2099_v29, %v2100_v36  ;;  %v2091_v47 = vor.u32 %v2090_v37, %v2086_v4 }
  0xbf   : > { %v4133_v59 = vsel %vm1097_vm8, %v1070_v52, %v971_v54  ;;  %1588 = vrot.lane.b32.xlu1 %v1587_v39, %s3601_s18  ;;  %v2095_v39 = vrot.slane %v2093_v33, 1  ;;  %v2109_v50 = vrot.slane %v2107_v17, 1 }
  0xc0   : > { %3154 = vmatmul.mubr.msk.bf16.vlgmr.msra.gmra.mrb[0].mxu1 %vm1191_vm9, %v4133_v59  ;;  %3221 = vmatprep.mubr.msk.bf16.mxu0 %vm1191_vm9, %v4133_v59 }
  0xc1   : > { %1583 = vrot.lane.b32.xlu0 %v1582_v51, %s3602_s20  ;;  %3157 = vmatprep.mubr.msk.bf16.mxu1 %vm1191_vm9, %v4129_v53  ;;  %v638_v63 = vpop.permute.xlu1 %637  ;;  %v2110_v51 = vrot.slane %v2093_v33, 2  ;;  %v2096_v12 = vsel %vm434_vm1, %v2091_v47, %v2095_v39 }
  0xc2   : > { %3222 = vmatmul.mubr.msk.bf16.vlgmr.msra.gmra.mrb[0].mxu0 %vm1191_vm9, %v4129_v53  ;;  %v636_v13 = vpop.permute.xlu0 %635  ;;  %3186 = vmatpush3.bf16.msra.mxu1 %v4004_v18  ;;  %v1010_v46 = vsel %vm998_vm5, %v3540_v45, %v638_v63 }
  0xc3   : > { %1599 = vrot.lane.b32.xlu1 %v1598_v61, %s3604_s22  ;;  %3254 = vmatpush3.bf16.msra.mxu0 %v4011_v24  ;;  %v1854_v24 = vor.u32 %v1853_v16, %v1852_v30  ;;  %v1008_v52 = vsel %vm998_vm5, %v3541_v27, %v636_v13  ;;  %v2106_v13 = vor.u32 %v2105_v44, %v2104_v34 }
  0xc4   : > { %3287 = vmatprep.subr.bf16.mxu0 %v4147_v58  ;;  %3321 = vmatprep.subr.bf16.mxu1 %v3969_v31  ;;  %v2117_v30 = vsel %vm917_vm2, %v2115_v56, %v2116_v57 }
  0xc5   : > { %1840 = vrot.lane.b32.xlu0 %v1839_v22, %s3602_s20  ;;  %v719_v18 = vpop.permute.xlu1 %718  ;;  %v1855_v38 = vsel %vm740_vm3, %v1849_v28, %v1854_v24  ;;  %v2111_v22 = vor.u32 %v2110_v51, %v2109_v50 }
  0xc6   : > { %v717_v32 = vpop.permute.xlu0 %716  ;;  %v1043_v54 = vsel %vm1031_vm6, %v1010_v46, %v719_v18 }
  0xc7   : > { %1604 = vrot.lane.b32.xlu1 %v1603_v1, %s3603_s21  ;;  %v1041_v61 = vsel %vm1031_vm6, %v1008_v52, %v717_v32  ;;  %v2112_v20 = vsel %vm740_vm3, %v2106_v13, %v2111_v22  ;;  %v3543_v32 = vld [vmem:[%s3698_s14 + $0x48] sm:$0xff]  }
  0xc9   : > { %1845 = vrot.lane.b32.xlu0 %v1844_v26, %s3601_s18  ;;  %v896_v41 = vpop.permute.xlu1 %895  ;;  %v3542_v26 = vld [vmem:[%s3698_s14 + $0x54] sm:$0xff]  }
  0xca   : > { %v894_v42 = vpop.permute.xlu0 %893  ;;  %v1076_v62 = vsel %vm1064_vm7, %v1043_v54, %v896_v41 }
  0xcb   : > { %1861 = vrot.lane.b32.xlu1 %v1860_v40, %s3603_s21  ;;  %v1074_v63 = vsel %vm1064_vm7, %v1041_v61, %v894_v42 }
  0xcd   : > { %1856 = vrot.lane.b32.xlu0 %v1855_v38, %s3604_s22  ;;  %v977_v2 = vpop.permute.xlu1 %976 }
  0xce   : > { %v4188_v3 = vsel %vm1097_vm8, %v1076_v62, %v977_v2  ;;  %v975_v5 = vpop.permute.xlu0 %974 }
  0xcf   : > { %v4191_v10 = vsel %vm1097_vm8, %v1074_v63, %v975_v5  ;;  %2102 = vrot.lane.b32.xlu1 %v2101_v43, %s3601_s18  ;;  %s243_s18 = scalar_lea.vmem %s4654_s4, %s2865_s12 }
  0xd0   : > { %3158 = vmatmul.mubr.msk.bf16.gmra.mrb[4].mxu1 %vm1191_vm9, %v4191_v10  ;;  %3225 = vmatprep.mubr.msk.bf16.mxu0 %vm1191_vm9, %v4191_v10 }
  0xd1   : > { %3161 = vmatprep.mubr.msk.bf16.mxu1 %vm1191_vm9, %v4188_v3  ;;  %3226 = vmatmul.mubr.msk.bf16.gmra.mrb[4].mxu0 %vm1191_vm9, %v4188_v3  ;;  %v642_v16 = vpop.permute.xlu1 %641 }
  0xd2   : > { %v640_v0 = vpop.permute.xlu0 %639  ;;  %2097 = vrot.lane.b32.xlu0 %v2096_v12, %s3602_s20  ;;  %v1014_v28 = vsel %vm998_vm5, %v3542_v26, %v642_v16 }
  0xd3   : > { %2118 = vrot.lane.b32.xlu1 %v2117_v30, %s3603_s21  ;;  %v1012_v24 = vsel %vm998_vm5, %v3543_v32, %v640_v0 }
  0xd5   : > { %v723_v1 = vpop.permute.xlu1 %722 }
  0xd6   : > { %v721_v6 = vpop.permute.xlu0 %720  ;;  %2113 = vrot.lane.b32.xlu0 %v2112_v20, %s3604_s22  ;;  %v1047_v33 = vsel %vm1031_vm6, %v1014_v28, %v723_v1 }
  0xd7   : > { %v1045_v29 = vsel %vm1031_vm6, %v1012_v24, %v721_v6 }
  0xd9   : > { %v900_v25 = vpop.permute.xlu1 %899 }
  0xda   : > { %v898_v18 = vpop.permute.xlu0 %897  ;;  %v1080_v36 = vsel %vm1064_vm7, %v1047_v33, %v900_v25 }
  0xdb   : > { %v1078_v37 = vsel %vm1064_vm7, %v1045_v29, %v898_v18 }
  0xdd   : > { %v981_v4 = vpop.permute.xlu1 %980 }
  0xde   : > { %v4217_v17 = vsel %vm1097_vm8, %v1080_v36, %v981_v4  ;;  %v979_v40 = vpop.permute.xlu0 %978 }
  0xdf   : > { %v4220_v41 = vsel %vm1097_vm8, %v1078_v37, %v979_v40 }
  0xe0   : > { %3162 = vmatmul.mubr.msk.bf16.gmra.mrb[8].mxu1 %vm1191_vm9, %v4220_v41  ;;  %3229 = vmatprep.mubr.msk.bf16.mxu0 %vm1191_vm9, %v4220_v41 }
  0xe1   : > { %3165 = vmatprep.mubr.msk.bf16.mxu1 %vm1191_vm9, %v4217_v17  ;;  %3230 = vmatmul.mubr.msk.bf16.gmra.mrb[8].mxu0 %vm1191_vm9, %v4217_v17  ;;  %v646_v34 = vpop.permute.xlu1 %645 }
  0xe2   : > { %v644_v42 = vpop.permute.xlu0 %643  ;;  %v1018_v45 = vsel %vm998_vm5, %v3823_v14, %v646_v34 }
  0xe3   : > { %v1016_v46 = vsel %vm998_vm5, %v3826_v15, %v644_v42 }
  0xe5   : > { %v727_v38 = vpop.permute.xlu1 %726 }
  0xe6   : > { %v725_v39 = vpop.permute.xlu0 %724  ;;  %v1051_v47 = vsel %vm1031_vm6, %v1018_v45, %v727_v38 }
  0xe7   : > { %v1049_v50 = vsel %vm1031_vm6, %v1016_v46, %v725_v39 }
  0xe9   : > { %v904_v43 = vpop.permute.xlu1 %903 }
  0xea   : > { %v902_v44 = vpop.permute.xlu0 %901  ;;  %v1084_v51 = vsel %vm1064_vm7, %v1051_v47, %v904_v43 }
  0xeb   : > { %v1082_v52 = vsel %vm1064_vm7, %v1049_v50, %v902_v44 }
  0xed   : > { %v985_v27 = vpop.permute.xlu1 %984 }
  0xee   : > { %v4239_v54 = vsel %vm1097_vm8, %v1084_v51, %v985_v27  ;;  %v983_v56 = vpop.permute.xlu0 %982 }
  0xef   : > { %v4242_v57 = vsel %vm1097_vm8, %v1082_v52, %v983_v56 }
  0xf0   : > { %3166 = vmatmul.mubr.msk.bf16.gmra.mrb[12].mxu1 %vm1191_vm9, %v4242_v57  ;;  %3233 = vmatprep.mubr.msk.bf16.mxu0 %vm1191_vm9, %v4242_v57 }
  0xf1   : > { %3169 = vmatprep.mubr.msk.bf16.mxu1 %vm1191_vm9, %v4239_v54  ;;  %3234 = vmatmul.mubr.msk.bf16.gmra.mrb[12].mxu0 %vm1191_vm9, %v4239_v54  ;;  %v729_v14 = vpop.permute.xlu1 %728 }
  0xf2   : > { %3255 = vmatprep.mubr.msk.bf16.mxu0 %vm1191_vm9, %v4129_v53  ;;  %v648_v15 = vpop.permute.xlu0 %647 }
  0xf3   : > { %v1020_v61 = vsel %vm998_vm5, %v3866_v48, %v648_v15 }
  0xf4   : > { %v1053_v2 = vsel %vm1031_vm6, %v1020_v61, %v729_v14 }
  0xf5   : > { %v987_v62 = vpop.permute.xlu1 %986 }
  0xf6   : > { %v906_v63 = vpop.permute.xlu0 %905 }
  0xf7   : > { %v1086_v5 = vsel %vm1064_vm7, %v1053_v2, %v906_v63 }
  0xf8   : > { %v4259_v12 = vsel %vm1097_vm8, %v1086_v5, %v987_v62 }
  0xf9   : > { %3170 = vmatmul.mubr.msk.bf16.gmra.mrb[16].mxu1 %vm1191_vm9, %v4259_v12  ;;  %3256 = vmatmul.mubr.msk.bf16.vlgmr.msra.gmra.mrb[0].mxu0 %vm1191_vm9, %v4191_v10  ;;  %v652_v13 = vpop.permute.xlu1 %651 }
  0xfa   : > { %3259 = vmatprep.mubr.msk.bf16.mxu0 %vm1191_vm9, %v4188_v3  ;;  %v650_v48 = vpop.permute.xlu0 %649  ;;  %3288 = vmatpush3.bf16.msra.mxu0 %v4147_v58  ;;  %v1024_v20 = vsel %vm998_vm5, %v3884_v19, %v652_v13 }
  0xfb   : > { %v1022_v1 = vsel %vm998_vm5, %v3890_v21, %v650_v48 }
  0xfd   : > { %v733_v22 = vpop.permute.xlu1 %732 }
  0xfe   : > { %v731_v30 = vpop.permute.xlu0 %730  ;;  %v1057_v6 = vsel %vm1031_vm6, %v1024_v20, %v733_v22 }
  0xff   : > { %v1055_v58 = vsel %vm1031_vm6, %v1022_v1, %v731_v30 }
 0x101   : > { %3260 = vmatmul.mubr.msk.bf16.gmra.mrb[4].mxu0 %vm1191_vm9, %v4220_v41  ;;  %v910_v16 = vpop.permute.xlu1 %909 }
 0x102   : > { %3263 = vmatprep.mubr.msk.bf16.mxu0 %vm1191_vm9, %v4217_v17  ;;  %v908_v0 = vpop.permute.xlu0 %907  ;;  %v1090_v25 = vsel %vm1064_vm7, %v1057_v6, %v910_v16 }
 0x103   : > { %v1088_v26 = vsel %vm1064_vm7, %v1055_v58, %v908_v0 }
 0x105   : > { %v991_v18 = vpop.permute.xlu1 %990 }
 0x106   : > { %v4281_v28 = vsel %vm1097_vm8, %v1090_v25, %v991_v18  ;;  %v989_v32 = vpop.permute.xlu0 %988 }
 0x107   : > { %v4284_v24 = vsel %vm1097_vm8, %v1088_v26, %v989_v32 }
 0x108   : > { %3173 = vmatprep.mubr.msk.bf16.mxu1 %vm1191_vm9, %v4284_v24 }
 0x109   : > { %3174 = vmatmul.mubr.msk.bf16.gmra.mrb[20].mxu1 %vm1191_vm9, %v4281_v28  ;;  %3264 = vmatmul.mubr.msk.bf16.gmra.mrb[8].mxu0 %vm1191_vm9, %v4242_v57  ;;  %v656_v19 = vpop.permute.xlu1 %655 }
 0x10a   : > { %3267 = vmatprep.mubr.msk.bf16.mxu0 %vm1191_vm9, %v4239_v54  ;;  %v654_v21 = vpop.permute.xlu0 %653  ;;  %v1028_v37 = vsel %vm998_vm5, %v3928_v8, %v656_v19 }
 0x10b   : > { %v1026_v40 = vsel %vm998_vm5, %v3932_v11, %v654_v21 }
 0x10d   : > { %v737_v33 = vpop.permute.xlu1 %736 }
 0x10e   : > { %v735_v29 = vpop.permute.xlu0 %734  ;;  %v1061_v34 = vsel %vm1031_vm6, %v1028_v37, %v737_v33 }
 0x10f   : > { %v1059_v42 = vsel %vm1031_vm6, %v1026_v40, %v735_v29 }
 0x111   : > { %3268 = vmatmul.mubr.msk.bf16.gmra.mrb[12].mxu0 %vm1191_vm9, %v4259_v12  ;;  %v914_v36 = vpop.permute.xlu1 %913 }
 0x112   : > { %3271 = vmatprep.mubr.msk.bf16.mxu0 %vm1191_vm9, %v4284_v24  ;;  %v912_v4 = vpop.permute.xlu0 %911  ;;  %v1094_v38 = vsel %vm1064_vm7, %v1061_v34, %v914_v36 }
 0x113   : > { %v1092_v43 = vsel %vm1064_vm7, %v1059_v42, %v912_v4 }
 0x115   : > { %v995_v39 = vpop.permute.xlu1 %994 }
 0x116   : > { %v4307_v44 = vsel %vm1097_vm8, %v1094_v38, %v995_v39  ;;  %v993_v45 = vpop.permute.xlu0 %992 }
 0x117   : > { %v4310_v46 = vsel %vm1097_vm8, %v1092_v43, %v993_v45 }
 0x118   : > { %3177 = vmatprep.mubr.msk.bf16.mxu1 %vm1191_vm9, %v4310_v46 }
 0x119   : > { %3178 = vmatmul.mubr.msk.bf16.gmra.mrb[24].mxu1 %vm1191_vm9, %v4307_v44  ;;  %3272 = vmatmul.mubr.msk.bf16.gmra.mrb[16].mxu0 %vm1191_vm9, %v4281_v28  ;;  %v739_v8 = vpop.permute.xlu1 %738 }
 0x11a   : > { %3275 = vmatprep.mubr.msk.bf16.mxu0 %vm1191_vm9, %v4310_v46  ;;  %v658_v11 = vpop.permute.xlu0 %657 }
 0x11b   : > { %v1030_v47 = vsel %vm998_vm5, %v3991_v7, %v658_v11 }
 0x11c   : > { %v1063_v27 = vsel %vm1031_vm6, %v1030_v47, %v739_v8 }
 0x11d   : > { %v916_v50 = vpop.permute.xlu1 %915 }
 0x11e   : > { %v1153_v51 = vpop.permute.xlu0 %1152  ;;  %v1096_v52 = vsel %vm1064_vm7, %v1063_v27, %v916_v50 }
 0x11f   : > { %v1176_v7 = vsel %vm998_vm5, %v4008_v23, %v1153_v51 }
 0x121   : > { %3276 = vmatmul.mubr.msk.bf16.gmra.mrb[20].mxu0 %vm1191_vm9, %v4307_v44  ;;  %v997_v56 = vpop.permute.xlu1 %996 }
 0x122   : > { %v4327_v14 = vsel %vm1097_vm8, %v1096_v52, %v997_v56  ;;  %v1158_v15 = vpop.permute.xlu0 %1157 }
 0x123   : > { %3181 = vmatprep.mubr.msk.bf16.mxu1 %vm1191_vm9, %v4327_v14  ;;  %3279 = vmatprep.mubr.msk.bf16.mxu0 %vm1191_vm9, %v4327_v14  ;;  %v1178_v62 = vsel %vm1031_vm6, %v1176_v7, %v1158_v15 }
 0x125   : > { %v1174_v61 = vpop.permute.xlu1 %1173 }
 0x126   : > { %v1169_v2 = vpop.permute.xlu0 %1168 }
 0x127   : > { %v1180_v63 = vsel %vm1064_vm7, %v1178_v62, %v1169_v2 }
 0x128   : > { %v4338_v5 = vsel %vm1097_vm8, %v1180_v63, %v1174_v61 }
 0x129   : > { %3182 = vmatmul.mubr.msk.bf16.gmra.mrb[28].mxu1 %vm1191_vm9, %v4338_v5  ;;  %3280 = vmatmul.mubr.msk.bf16.gmra.mrb[24].mxu0 %vm1191_vm9, %v4338_v5  ;;  %v709_v13 = vpop.permute.xlu1 %708 }
 0x12a   : > { %v628_v48 = vpop.permute.xlu0 %627 }
 0x12b   : > { %v1000_v23 = vsel %vm998_vm5, %v4040_v60, %v628_v48 }
 0x12c   : > { %v1033_v30 = vsel %vm1031_vm6, %v1000_v23, %v709_v13 }
 0x12d   : > { %v967_v22 = vpop.permute.xlu1 %966 }
 0x12e   : > { %v886_v16 = vpop.permute.xlu0 %885 }
 0x12f   : > { %v1066_v0 = vsel %vm1064_vm7, %v1033_v30, %v886_v16 }
 0x130   : > { %v1099_v20 = vsel %vm1097_vm8, %v1066_v0, %v967_v22 }
 0x131   : > { %3187 = vmatprep.mubr.msk.bf16.mxu1 %vm1191_vm9, %v1099_v20  ;;  %v1589_v1 = vpop.permute.xlu1 %1588 }
 0x132   : > { %3188 = vmatmul.mubr.msk.bf16.vlgmr.msra.gmra.mrb[0].mxu1 %vm1191_vm9, %v4104_v9 }
 0x133   : > { %3322 = vmatpush3.bf16.msra.mxu1 %v3969_v31  ;;  %v1584_v6 = vpop.permute.xlu0 %1583  ;;  %3191 = vmatprep.mubr.msk.bf16.mxu1 %vm1191_vm9, %v4133_v59 }
 0x134   : > { %v1607_v60 = vsel %vm998_vm5, %v4066_v35, %v1584_v6 }
 0x135   : > { %v1609_v58 = vsel %vm1031_vm6, %v1607_v60, %v1589_v1  ;;  %v1600_v25 = vpop.permute.xlu1 %1599 }
 0x136   : > { %v1611_v26 = vsel %vm1064_vm7, %v1609_v58, %v1600_v25 }
 0x137   : > { %v1841_v18 = vpop.permute.xlu0 %1840 }
 0x138   : > { %v1864_v19 = vsel %vm998_vm5, %v4079_v49, %v1841_v18 }
 0x139   : > { %v1605_v32 = vpop.permute.xlu1 %1604 }
 0x13a   : > { %3192 = vmatmul.mubr.msk.bf16.gmra.mrb[4].mxu1 %vm1191_vm9, %v4129_v53  ;;  %v1613_v31 = vsel %vm1097_vm8, %v1611_v26, %v1605_v32 }
 0x13b   : > { %v1846_v9 = vpop.permute.xlu0 %1845  ;;  %3195 = vmatprep.mubr.msk.bf16.mxu1 %vm1191_vm9, %v4191_v10  ;;  %3283 = vmatprep.mubr.msk.bf16.mxu0 %vm1191_vm9, %v1613_v31 }
 0x13c   : > { %v1866_v35 = vsel %vm1031_vm6, %v1864_v19, %v1846_v9 }
 0x13d   : > { %v1862_v59 = vpop.permute.xlu1 %1861 }
 0x13f   : > { %v1857_v21 = vpop.permute.xlu0 %1856 }
 0x140   : > { %v1868_v33 = vsel %vm1064_vm7, %v1866_v35, %v1857_v21 }
 0x141   : > { %v1870_v29 = vsel %vm1097_vm8, %v1868_v33, %v1862_v59 }
 0x142   : > { %3284 = vmatmul.mubr.msk.bf16.gmra.mrb[28].mxu0 %vm1191_vm9, %v1870_v29  ;;  %3196 = vmatmul.mubr.msk.bf16.gmra.mrb[8].mxu1 %vm1191_vm9, %v4188_v3 }
 0x143   : > { %3289 = vmatprep.mubr.msk.bf16.mxu0 %vm1191_vm9, %v4191_v10  ;;  %3199 = vmatprep.mubr.msk.bf16.mxu1 %vm1191_vm9, %v4220_v41 }
 0x144   : > { %v2098_v49 = vpop.permute.xlu0 %2097 }
 0x145   : > { %v2121_v53 = vsel %vm998_vm5, %v4137_v55, %v2098_v49 }
 0x14a   : > { %3290 = vmatmul.mubr.msk.bf16.vlgmr.msra.gmra.mrb[0].mxu0 %vm1191_vm9, %v4188_v3  ;;  %3200 = vmatmul.mubr.msk.bf16.gmra.mrb[12].mxu1 %vm1191_vm9, %v4217_v17  ;;  %v2103_v3 = vpop.permute.xlu1 %2102 }
 0x14b   : > { %3293 = vmatprep.mubr.msk.bf16.mxu0 %vm1191_vm9, %v4220_v41  ;;  %3203 = vmatprep.mubr.msk.bf16.mxu1 %vm1191_vm9, %v4242_v57  ;;  %v2123_v10 = vsel %vm1031_vm6, %v2121_v53, %v2103_v3 }
 0x152   : > { %3294 = vmatmul.mubr.msk.bf16.gmra.mrb[4].mxu0 %vm1191_vm9, %v4217_v17  ;;  %3204 = vmatmul.mubr.msk.bf16.gmra.mrb[16].mxu1 %vm1191_vm9, %v4239_v54  ;;  %v2114_v17 = vpop.permute.xlu0 %2113 }
 0x153   : > { %3297 = vmatprep.mubr.msk.bf16.mxu0 %vm1191_vm9, %v4242_v57  ;;  %3207 = vmatprep.mubr.msk.bf16.mxu1 %vm1191_vm9, %v4259_v12  ;;  %v2125_v41 = vsel %vm1064_vm7, %v2123_v10, %v2114_v17 }
 0x15a   : > { %3298 = vmatmul.mubr.msk.bf16.gmra.mrb[8].mxu0 %vm1191_vm9, %v4239_v54  ;;  %3208 = vmatmul.mubr.msk.bf16.gmra.mrb[20].mxu1 %vm1191_vm9, %v4284_v24  ;;  %v2119_v54 = vpop.permute.xlu1 %2118 }
 0x15b   : > { %3301 = vmatprep.mubr.msk.bf16.mxu0 %vm1191_vm9, %v4259_v12  ;;  %3211 = vmatprep.mubr.msk.bf16.mxu1 %vm1191_vm9, %v4281_v28  ;;  %v2127_v55 = vsel %vm1097_vm8, %v2125_v41, %v2119_v54 }
 0x162   : > { %3302 = vmatmul.mubr.msk.bf16.gmra.mrb[12].mxu0 %vm1191_vm9, %v4284_v24  ;;  %3212 = vmatmul.mubr.msk.bf16.gmra.mrb[24].mxu1 %vm1191_vm9, %v4310_v46 }
 0x163   : > { %3305 = vmatprep.mubr.msk.bf16.mxu0 %vm1191_vm9, %v4281_v28  ;;  %3215 = vmatprep.mubr.msk.bf16.mxu1 %vm1191_vm9, %v4307_v44 }
 0x16a   : > { %3306 = vmatmul.mubr.msk.bf16.gmra.mrb[16].mxu0 %vm1191_vm9, %v4310_v46  ;;  %3216 = vmatmul.mubr.msk.bf16.gmra.mrb[28].mxu1 %vm1191_vm9, %v4327_v14 }
 0x16b   : > { %3309 = vmatprep.mubr.msk.bf16.mxu0 %vm1191_vm9, %v4307_v44  ;;  %3237 = vmatprep.mubr.msk.bf16.mxu1 %vm1191_vm9, %v4259_v12 }
 0x172   : > { %3310 = vmatmul.mubr.msk.bf16.gmra.mrb[20].mxu0 %vm1191_vm9, %v4327_v14  ;;  %3238 = vmatmul.mubr.msk.bf16.vlgmr.msra.gmra.mrb[16].mxu1 %vm1191_vm9, %v4284_v24 }
 0x173   : > { %3313 = vmatprep.mubr.msk.bf16.mxu0 %vm1191_vm9, %v4338_v5  ;;  %3241 = vmatprep.mubr.msk.bf16.mxu1 %vm1191_vm9, %v4281_v28 }
 0x17a   : > { %3314 = vmatmul.mubr.msk.bf16.gmra.mrb[24].mxu0 %vm1191_vm9, %v1613_v31  ;;  %3242 = vmatmul.mubr.msk.bf16.gmra.mrb[20].mxu1 %vm1191_vm9, %v4310_v46 }
 0x17b   : > { %3317 = vmatprep.mubr.msk.bf16.mxu0 %vm1191_vm9, %v1870_v29  ;;  %3245 = vmatprep.mubr.msk.bf16.mxu1 %vm1191_vm9, %v4307_v44  ;;  %v4451_v44 = vld [vmem:[#allocation2] ss:$0 sm:$0xff] }
 0x182   : > { %3318 = vmatmul.mubr.msk.bf16.gmra.mrb[28].mxu0 %vm1191_vm9, %v2127_v55  ;;  %3246 = vmatmul.mubr.msk.bf16.gmra.mrb[24].mxu1 %vm1191_vm9, %v4327_v14 }
 0x183   : > { %3249 = vmatprep.mubr.msk.bf16.mxu1 %vm1191_vm9, %v4338_v5 }
 0x18a   : > { %3250 = vmatmul.mubr.msk.bf16.gmra.mrb[28].mxu1 %vm1191_vm9, %v1613_v31 }
 0x205   : > { %v3189_v57 = vpop.f32.mrb[0].mxu1 }
 0x206   : > { %v1436_v12 = vpop.f32.mrb[1].mxu1 }
 0x207   : > { %v3190_v28 = vpop.f32.mrb[2].mxu1 }
 0x208   : > { %v1439_v24 = vpop.f32.mrb[3].mxu1 }
 0x20d   : > { %v3193_v36 = vpop.f32.mrb[4].mxu1 }
 0x20e   : > { %v1452_v4 = vpop.f32.mrb[5].mxu1 }
 0x20f   : > { %v3194_v37 = vpop.f32.mrb[6].mxu1 }
 0x210   : > { %v1455_v40 = vpop.f32.mrb[7].mxu1 }
 0x215   : > { %v4442_v34 = vpop.f32.mrb[8].mxu1 }
 0x216   : > { %v4445_v42 = vpop.f32.mrb[9].mxu1 }
 0x217   : > { %v4447_v38 = vpop.f32.mrb[10].mxu1 }
 0x218   : > { %v4449_v39 = vpop.f32.mrb[11].mxu1 }
 0x21d   : > { %v3291_v43 = vpop.f32.mrb[0].mxu0  ;;  %v4453_v45 = vpop.f32.mrb[12].mxu1 }
 0x21e   : > { %v3323_v46 = vadd.f32 %v3291_v43, %v3189_v57  ;;  %v2175_v8 = vpop.f32.mrb[1].mxu0  ;;  %v4455_v11 = vpop.f32.mrb[13].mxu1 }
 0x21f   : > { %v3324_v47 = vadd.f32 %v2175_v8, %v1436_v12  ;;  %v3292_v50 = vpop.f32.mrb[2].mxu0  ;;  %v4457_v51 = vpop.f32.mrb[14].mxu1 }
 0x220   : > { %v2343_v27 = vadd.f32 %v3323_v46, %v4451_v44  ;;  %v3325_v52 = vadd.f32 %v3292_v50, %v3190_v28  ;;  %v2178_v56 = vpop.f32.mrb[3].mxu0  ;;  %v4460_v14 = vpop.f32.mrb[15].mxu1 }
 0x221   : > { %v2341_v15 = vadd.f32 %v3324_v47, %v4451_v44  ;;  %v3326_v7 = vadd.f32 %v2178_v56, %v1439_v24 }
 0x222   : > { %v2375_v61 = vmax.f32 %v2343_v27, 0.0  ;;  %v2344_v62 = vadd.f32 %v3325_v52, %v4451_v44 }
 0x223   : > { %v2373_v2 = vmax.f32 %v2341_v15, 0.0  ;;  %v2342_v63 = vadd.f32 %v3326_v7, %v4451_v44 }
 0x224   : > { %v3036_v5 = vpack.c.bf16 %v2375_v61, %v2375_v61  ;;  %v2376_v13 = vmax.f32 %v2344_v62, 0.0  ;;  %v2570_v16 = vsel %vm2566_vm11, %v2375_v61, 0.0  ;;  %v2638_v0 = vmul.f32 %v2375_v61, %v2375_v61 }
 0x225   : > { %v3034_v48 = vpack.c.bf16 %v2373_v2, %v2373_v2  ;;  %v2636_v23 = vmul.f32 %v2373_v2, %v2373_v2  ;;  %v2374_v22 = vmax.f32 %v2342_v63, 0.0  ;;  %v3295_v30 = vpop.f32.mrb[4].mxu0  ;;  %v2567_v6 = vsel %vm2566_vm11, %v2373_v2, 0.0 }
 0x226   : > { %2536 = vst.msk [vmem:[%s4467_s11 + $0x8] sm:$0xf] %vm2533_vm10, %v3036_v5  ;;  %v3037_v20 = vpack.c.bf16 %v2376_v13, %v2376_v13  ;;  %v2191_v1 = vpop.f32.mrb[5].mxu0  ;;  %v2639_v26 = vmul.f32 %v2376_v13, %v2376_v13  ;;  %v3327_v19 = vadd.f32 %v3295_v30, %v3193_v36  ;;  %v2671_v10 = vsel %vm2566_vm11, %v2638_v0, 0.0 }
 0x227   : > { %2534 = vst.msk [vmem:[%s4467_s11] sm:$0xf] %vm2533_vm10, %v3034_v48  ;;  %v3035_v60 = vpack.c.bf16 %v2374_v22, %v2374_v22  ;;  %v2568_v58 = vsel %vm2566_vm11, %v2374_v22, 0.0  ;;  %v2637_v25 = vmul.f32 %v2374_v22, %v2374_v22  ;;  %v3296_v18 = vpop.f32.mrb[6].mxu0  ;;  %v3328_v31 = vadd.f32 %v2191_v1, %v1452_v4 }
 0x228   : > { %2537 = vst.msk [vmem:[%s4467_s11 + $0xc] sm:$0xf] %vm2533_vm10, %v3037_v20  ;;  %v2569_v32 = vadd.f32 %v2568_v58, %v2567_v6  ;;  %v2194_v9 = vpop.f32.mrb[7].mxu0  ;;  %v2668_v35 = vsel %vm2566_vm11, %v2636_v23, 0.0  ;;  %v3329_v21 = vadd.f32 %v3296_v18, %v3194_v37  ;;  %v2347_v53 = vadd.f32 %v3327_v19, %v4451_v44 }
 0x229   : > { %2535 = vst.msk [vmem:[%s4467_s11 + $0x4] sm:$0xf] %vm2533_vm10, %v3035_v60  ;;  %v2669_v59 = vsel %vm2566_vm11, %v2637_v25, 0.0  ;;  %v3330_v33 = vadd.f32 %v2194_v9, %v1455_v40  ;;  %v2345_v3 = vadd.f32 %v3328_v31, %v4451_v44  ;;  %v2572_v17 = vsel %vm2566_vm11, %v2376_v13, 0.0 }
 0x22a   : > { %v2571_v29 = vadd.f32 %v2570_v16, %v2569_v32  ;;  %v2670_v49 = vadd.f32 %v2669_v59, %v2668_v35  ;;  %v2348_v41 = vadd.f32 %v3329_v21, %v4451_v44  ;;  %v2379_v57 = vmax.f32 %v2347_v53, 0.0 }
 0x22b   : > { %v2346_v54 = vadd.f32 %v3330_v33, %v4451_v44  ;;  %v2377_v12 = vmax.f32 %v2345_v3, 0.0  ;;  %v2673_v37 = vsel %vm2566_vm11, %v2639_v26, 0.0 }
 0x22c   : > { %v2672_v55 = vadd.f32 %v2671_v10, %v2670_v49  ;;  %v2573_v28 = vadd.f32 %v2572_v17, %v2571_v29  ;;  %v2380_v24 = vmax.f32 %v2348_v41, 0.0  ;;  %v3040_v40 = vpack.c.bf16 %v2379_v57, %v2379_v57 }
 0x22d   : > { %v2378_v36 = vmax.f32 %v2346_v54, 0.0  ;;  %v3299_v4 = vpop.f32.mrb[8].mxu0  ;;  %v2642_v43 = vmul.f32 %v2379_v57, %v2379_v57  ;;  %v3038_v46 = vpack.c.bf16 %v2377_v12, %v2377_v12  ;;  %v2574_v47 = vsel %vm2566_vm11, %v2377_v12, 0.0 }
 0x22e   : > { %v2207_v8 = vpop.f32.mrb[9].mxu0  ;;  %v2640_v50 = vmul.f32 %v2377_v12, %v2377_v12  ;;  %v2674_v27 = vadd.f32 %v2673_v37, %v2672_v55  ;;  %v3041_v52 = vpack.c.bf16 %v2380_v24, %v2380_v24  ;;  %2540 = vst.msk [vmem:[%s4467_s11 + $0x18] sm:$0xf] %vm2533_vm10, %v3040_v40  ;;  %v2578_v15 = vsel %vm2566_vm11, %v2379_v57, 0.0 }
 0x22f   : > { %v3300_v56 = vpop.f32.mrb[10].mxu0  ;;  %2538 = vst.msk [vmem:[%s4467_s11 + $0x10] sm:$0xf] %vm2533_vm10, %v3038_v46  ;;  %v2575_v7 = vadd.f32 %v2574_v47, %v2573_v28  ;;  %v2643_v61 = vmul.f32 %v2380_v24, %v2380_v24  ;;  %v3039_v63 = vpack.c.bf16 %v2378_v36, %v2378_v36  ;;  %v2576_v5 = vsel %vm2566_vm11, %v2378_v36, 0.0 }
 0x230   : > { %v2210_v62 = vpop.f32.mrb[11].mxu0  ;;  %v2675_v2 = vsel %vm2566_vm11, %v2640_v50, 0.0  ;;  %2541 = vst.msk [vmem:[%s4467_s11 + $0x1c] sm:$0xf] %vm2533_vm10, %v3041_v52  ;;  %v2641_v13 = vmul.f32 %v2378_v36, %v2378_v36  ;;  %v2679_v48 = vsel %vm2566_vm11, %v2642_v43, 0.0  ;;  %v3331_v30 = vadd.f32 %v3299_v4, %v4442_v34 }
 0x231   : > { %v2676_v23 = vadd.f32 %v2675_v2, %v2674_v27  ;;  %v2577_v22 = vadd.f32 %v2576_v5, %v2575_v7  ;;  %2539 = vst.msk [vmem:[%s4467_s11 + $0x14] sm:$0xf] %vm2533_vm10, %v3039_v63  ;;  %v3332_v0 = vadd.f32 %v2207_v8, %v4445_v42  ;;  %v3333_v20 = vadd.f32 %v3300_v56, %v4447_v38 }
 0x232   : > { %v2677_v16 = vsel %vm2566_vm11, %v2641_v13, 0.0  ;;  %v3334_v1 = vadd.f32 %v2210_v62, %v4449_v39  ;;  %v2580_v6 = vsel %vm2566_vm11, %v2380_v24, 0.0  ;;  %v2351_v25 = vadd.f32 %v3331_v30, %v4451_v44 }
 0x233   : > { %v2579_v60 = vadd.f32 %v2578_v15, %v2577_v22  ;;  %v2678_v58 = vadd.f32 %v2677_v16, %v2676_v23  ;;  %v2681_v18 = vsel %vm2566_vm11, %v2643_v61, 0.0  ;;  %v2349_v34 = vadd.f32 %v3332_v0, %v4451_v44 }
 0x234   : > { %v2352_v26 = vadd.f32 %v3333_v20, %v4451_v44  ;;  %v2350_v32 = vadd.f32 %v3334_v1, %v4451_v44  ;;  %v2383_v31 = vmax.f32 %v2351_v25, 0.0 }
 0x235   : > { %v3303_v19 = vpop.f32.mrb[12].mxu0  ;;  %v2680_v42 = vadd.f32 %v2679_v48, %v2678_v58  ;;  %v2581_v38 = vadd.f32 %v2580_v6, %v2579_v60  ;;  %v2381_v35 = vmax.f32 %v2349_v34, 0.0 }
 0x236   : > { %v3335_v39 = vadd.f32 %v3303_v19, %v4453_v45  ;;  %v2223_v9 = vpop.f32.mrb[13].mxu0  ;;  %v2384_v59 = vmax.f32 %v2352_v26, 0.0  ;;  %v2382_v21 = vmax.f32 %v2350_v32, 0.0  ;;  %v3044_v49 = vpack.c.bf16 %v2383_v31, %v2383_v31 }
 0x237   : > { %v3336_v33 = vadd.f32 %v2223_v9, %v4455_v11  ;;  %v3304_v29 = vpop.f32.mrb[14].mxu0  ;;  %v2682_v53 = vadd.f32 %v2681_v18, %v2680_v42  ;;  %v3042_v10 = vpack.c.bf16 %v2381_v35, %v2381_v35  ;;  %v2582_v17 = vsel %vm2566_vm11, %v2381_v35, 0.0 }
 0x238   : > { %v2226_v3 = vpop.f32.mrb[15].mxu0  ;;  %v2644_v41 = vmul.f32 %v2381_v35, %v2381_v35  ;;  %v3045_v54 = vpack.c.bf16 %v2384_v59, %v2384_v59  ;;  %2544 = vst.msk [vmem:[%s4467_s11 + $0x28] sm:$0xf] %vm2533_vm10, %v3044_v49  ;;  %v2586_v45 = vsel %vm2566_vm11, %v2383_v31, 0.0  ;;  %v2646_v55 = vmul.f32 %v2383_v31, %v2383_v31 }
 0x239   : > { %v2583_v57 = vadd.f32 %v2582_v17, %v2581_v38  ;;  %2542 = vst.msk [vmem:[%s4467_s11 + $0x20] sm:$0xf] %vm2533_vm10, %v3042_v10  ;;  %v3043_v12 = vpack.c.bf16 %v2382_v21, %v2382_v21  ;;  %v2584_v28 = vsel %vm2566_vm11, %v2382_v21, 0.0  ;;  %v2645_v24 = vmul.f32 %v2382_v21, %v2382_v21 }
 0x23a   : > { %v2683_v11 = vsel %vm2566_vm11, %v2644_v41, 0.0  ;;  %2545 = vst.msk [vmem:[%s4467_s11 + $0x2c] sm:$0xf] %vm2533_vm10, %v3045_v54  ;;  %v2647_v4 = vmul.f32 %v2384_v59, %v2384_v59  ;;  %v2355_v40 = vadd.f32 %v3335_v39, %v4451_v44  ;;  %v2353_v46 = vadd.f32 %v3336_v33, %v4451_v44 }
 0x23b   : > { %v2684_v36 = vadd.f32 %v2683_v11, %v2682_v53  ;;  %v2585_v37 = vadd.f32 %v2584_v28, %v2583_v57  ;;  %2543 = vst.msk [vmem:[%s4467_s11 + $0x24] sm:$0xf] %vm2533_vm10, %v3043_v12  ;;  %v2685_v43 = vsel %vm2566_vm11, %v2645_v24, 0.0  ;;  %v3337_v8 = vadd.f32 %v3304_v29, %v4457_v51 }
 0x23c   : > { %v3338_v47 = vadd.f32 %v2226_v3, %v4460_v14  ;;  %v2387_v56 = vmax.f32 %v2355_v40, 0.0  ;;  %v2687_v7 = vsel %vm2566_vm11, %v2646_v55, 0.0  ;;  %v2385_v61 = vmax.f32 %v2353_v46, 0.0 }
 0x23d   : > { %v3307_v50 = vpop.f32.mrb[16].mxu0  ;;  %v2587_v27 = vadd.f32 %v2586_v45, %v2585_v37  ;;  %v2686_v52 = vadd.f32 %v2685_v43, %v2684_v36  ;;  %v2356_v62 = vadd.f32 %v3337_v8, %v4451_v44  ;;  %v2588_v5 = vsel %vm2566_vm11, %v2384_v59, 0.0 }
 0x23e   : > { %v2239_v15 = vpop.f32.mrb[17].mxu0  ;;  %v2354_v2 = vadd.f32 %v3338_v47, %v4451_v44  ;;  %v2689_v51 = vsel %vm2566_vm11, %v2647_v4, 0.0  ;;  %v3048_v13 = vpack.c.bf16 %v2387_v56, %v2387_v56  ;;  %v3046_v23 = vpack.c.bf16 %v2385_v61, %v2385_v61 }
 0x23f   : > { %v3308_v63 = vpop.f32.mrb[18].mxu0  ;;  %v2688_v14 = vadd.f32 %v2687_v7, %v2686_v52  ;;  %v2589_v22 = vadd.f32 %v2588_v5, %v2587_v27  ;;  %v2590_v30 = vsel %vm2566_vm11, %v2385_v61, 0.0  ;;  %v2648_v16 = vmul.f32 %v2385_v61, %v2385_v61 }
 0x240   : > { %v2242_v48 = vpop.f32.mrb[19].mxu0  ;;  %2548 = vst.msk [vmem:[%s4467_s11 + $0x38] sm:$0xf] %vm2533_vm10, %v3048_v13  ;;  %v2388_v20 = vmax.f32 %v2356_v62, 0.0  ;;  %v2386_v1 = vmax.f32 %v2354_v2, 0.0  ;;  %v2650_v18 = vmul.f32 %v2387_v56, %v2387_v56  ;;  %v2594_v35 = vsel %vm2566_vm11, %v2387_v56, 0.0 }
 0x241   : > { %v2690_v0 = vadd.f32 %v2689_v51, %v2688_v14  ;;  %2546 = vst.msk [vmem:[%s4467_s11 + $0x30] sm:$0xf] %vm2533_vm10, %v3046_v23  ;;  %v2591_v6 = vadd.f32 %v2590_v30, %v2589_v22  ;;  %v2691_v60 = vsel %vm2566_vm11, %v2648_v16, 0.0 }
 0x242   : > { %v3049_v25 = vpack.c.bf16 %v2388_v20, %v2388_v20  ;;  %v3047_v34 = vpack.c.bf16 %v2386_v1, %v2386_v1  ;;  %v2592_v26 = vsel %vm2566_vm11, %v2386_v1, 0.0  ;;  %v2649_v32 = vmul.f32 %v2386_v1, %v2386_v1 }
 0x243   : > { %v2692_v58 = vadd.f32 %v2691_v60, %v2690_v0  ;;  %v2593_v31 = vadd.f32 %v2592_v26, %v2591_v6  ;;  %v2651_v59 = vmul.f32 %v2388_v20, %v2388_v20  ;;  %v2695_v45 = vsel %vm2566_vm11, %v2650_v18, 0.0 }
 0x244   : > { %2549 = vst.msk [vmem:[%s4467_s11 + $0x3c] sm:$0xf] %vm2533_vm10, %v3049_v25  ;;  %2547 = vst.msk [vmem:[%s4467_s11 + $0x34] sm:$0xf] %vm2533_vm10, %v3047_v34  ;;  %v2693_v21 = vsel %vm2566_vm11, %v2649_v32, 0.0  ;;  %v2596_v55 = vsel %vm2566_vm11, %v2388_v20, 0.0 }
 0x245   : > { %v3311_v19 = vpop.f32.mrb[20].mxu0  ;;  %v3239_v42 = vpop.f32.mrb[16].mxu1  ;;  %v2595_v53 = vadd.f32 %v2594_v35, %v2593_v31  ;;  %v2694_v3 = vadd.f32 %v2693_v21, %v2692_v58  ;;  %v2697_v4 = vsel %vm2566_vm11, %v2651_v59, 0.0 }
 0x246   : > { %v3339_v38 = vadd.f32 %v3307_v50, %v3239_v42  ;;  %v2255_v39 = vpop.f32.mrb[21].mxu0  ;;  %v1725_v9 = vpop.f32.mrb[17].mxu1 }
 0x247   : > { %v3340_v33 = vadd.f32 %v2239_v15, %v1725_v9  ;;  %v3312_v29 = vpop.f32.mrb[22].mxu0  ;;  %v3240_v49 = vpop.f32.mrb[18].mxu1  ;;  %v2696_v12 = vadd.f32 %v2695_v45, %v2694_v3  ;;  %v2597_v24 = vadd.f32 %v2596_v55, %v2595_v53 }
 0x248   : > { %v2359_v10 = vadd.f32 %v3339_v38, %v4451_v44  ;;  %v3341_v17 = vadd.f32 %v3308_v63, %v3240_v49  ;;  %v2258_v41 = vpop.f32.mrb[23].mxu0  ;;  %v1728_v54 = vpop.f32.mrb[19].mxu1 }
 0x249   : > { %v2357_v57 = vadd.f32 %v3340_v33, %v4451_v44  ;;  %v3342_v11 = vadd.f32 %v2242_v48, %v1728_v54  ;;  %v2698_v46 = vadd.f32 %v2697_v4, %v2696_v12 }
 0x24a   : > { %v2391_v28 = vmax.f32 %v2359_v10, 0.0  ;;  %v2360_v36 = vadd.f32 %v3341_v17, %v4451_v44 }
 0x24b   : > { %v2389_v37 = vmax.f32 %v2357_v57, 0.0  ;;  %v2358_v40 = vadd.f32 %v3342_v11, %v4451_v44 }
 0x24c   : > { %v3052_v43 = vpack.c.bf16 %v2391_v28, %v2391_v28  ;;  %v2392_v27 = vmax.f32 %v2360_v36, 0.0  ;;  %v2654_v63 = vmul.f32 %v2391_v28, %v2391_v28  ;;  %v2602_v58 = vsel %vm2566_vm11, %v2391_v28, 0.0 }
 0x24d   : > { %v3050_v8 = vpack.c.bf16 %v2389_v37, %v2389_v37  ;;  %v2598_v47 = vsel %vm2566_vm11, %v2389_v37, 0.0  ;;  %v2652_v50 = vmul.f32 %v2389_v37, %v2389_v37  ;;  %v3315_v52 = vpop.f32.mrb[24].mxu0  ;;  %v3243_v56 = vpop.f32.mrb[20].mxu1  ;;  %v2390_v7 = vmax.f32 %v2358_v40, 0.0 }
 0x24e   : > { %2552 = vst.msk [vmem:[%s4467_s11 + $0x48] sm:$0xf] %vm2533_vm10, %v3052_v43  ;;  %v2599_v15 = vadd.f32 %v2598_v47, %v2597_v24  ;;  %v3343_v61 = vadd.f32 %v3311_v19, %v3243_v56  ;;  %v2271_v62 = vpop.f32.mrb[25].mxu0  ;;  %v1741_v2 = vpop.f32.mrb[21].mxu1  ;;  %v3053_v51 = vpack.c.bf16 %v2392_v27, %v2392_v27  ;;  %v2655_v20 = vmul.f32 %v2392_v27, %v2392_v27 }
 0x24f   : > { %2550 = vst.msk [vmem:[%s4467_s11 + $0x40] sm:$0xf] %vm2533_vm10, %v3050_v8  ;;  %v2699_v5 = vsel %vm2566_vm11, %v2652_v50, 0.0  ;;  %v4564_v14 = vpop.f32.mrb[26].mxu0  ;;  %v3244_v13 = vpop.f32.mrb[22].mxu1  ;;  %v3051_v23 = vpack.c.bf16 %v2390_v7, %v2390_v7  ;;  %v2600_v22 = vsel %vm2566_vm11, %v2390_v7, 0.0  ;;  %v2653_v30 = vmul.f32 %v2390_v7, %v2390_v7 }
 0x250   : > { %v2700_v48 = vadd.f32 %v2699_v5, %v2698_v46  ;;  %v2274_v16 = vpop.f32.mrb[27].mxu0  ;;  %v1744_v0 = vpop.f32.mrb[23].mxu1  ;;  %2553 = vst.msk [vmem:[%s4467_s11 + $0x4c] sm:$0xf] %vm2533_vm10, %v3053_v51  ;;  %v2601_v1 = vadd.f32 %v2600_v22, %v2599_v15  ;;  %v2363_v6 = vadd.f32 %v3343_v61, %v4451_v44  ;;  %v3344_v60 = vadd.f32 %v2255_v39, %v1741_v2 }
 0x251   : > { %2551 = vst.msk [vmem:[%s4467_s11 + $0x44] sm:$0xf] %vm2533_vm10, %v3051_v23  ;;  %v2701_v25 = vsel %vm2566_vm11, %v2653_v30, 0.0  ;;  %v3345_v18 = vadd.f32 %v3312_v29, %v3244_v13  ;;  %v3346_v34 = vadd.f32 %v2258_v41, %v1744_v0  ;;  %v2703_v31 = vsel %vm2566_vm11, %v2654_v63, 0.0 }
 0x252   : > { %v2603_v26 = vadd.f32 %v2602_v58, %v2601_v1  ;;  %v2702_v32 = vadd.f32 %v2701_v25, %v2700_v48  ;;  %v2395_v19 = vmax.f32 %v2363_v6, 0.0  ;;  %v2361_v42 = vadd.f32 %v3344_v60, %v4451_v44 }
 0x253   : > { %v2364_v38 = vadd.f32 %v3345_v18, %v4451_v44  ;;  %v2362_v39 = vadd.f32 %v3346_v34, %v4451_v44  ;;  %v2604_v9 = vsel %vm2566_vm11, %v2392_v27, 0.0  ;;  %v2705_v35 = vsel %vm2566_vm11, %v2655_v20, 0.0 }
 0x254   : > { %v2704_v59 = vadd.f32 %v2703_v31, %v2702_v32  ;;  %v3056_v21 = vpack.c.bf16 %v2395_v19, %v2395_v19  ;;  %v2393_v49 = vmax.f32 %v2361_v42, 0.0  ;;  %v2605_v53 = vadd.f32 %v2604_v9, %v2603_v26 }
 0x255   : > { %v3319_v33 = vpop.f32.mrb[28].mxu0  ;;  %v3247_v29 = vpop.f32.mrb[24].mxu1  ;;  %v2396_v3 = vmax.f32 %v2364_v38, 0.0  ;;  %v2394_v10 = vmax.f32 %v2362_v39, 0.0  ;;  %v2610_v40 = vsel %vm2566_vm11, %v2395_v19, 0.0  ;;  %v2658_v43 = vmul.f32 %v2395_v19, %v2395_v19 }
 0x256   : > { %v2287_v17 = vpop.f32.mrb[29].mxu0  ;;  %v1757_v41 = vpop.f32.mrb[25].mxu1  ;;  %2556 = vst.msk [vmem:[%s4467_s11 + $0x58] sm:$0xf] %vm2533_vm10, %v3056_v21  ;;  %v2706_v54 = vadd.f32 %v2705_v35, %v2704_v59  ;;  %v3347_v45 = vadd.f32 %v3315_v52, %v3247_v29  ;;  %v3054_v12 = vpack.c.bf16 %v2393_v49, %v2393_v49  ;;  %v2606_v28 = vsel %vm2566_vm11, %v2393_v49, 0.0 }
 0x257   : > { %v3348_v55 = vadd.f32 %v2271_v62, %v1757_v41  ;;  %v3320_v57 = vpop.f32.mrb[30].mxu0  ;;  %v3248_v11 = vpop.f32.mrb[26].mxu1  ;;  %v2656_v24 = vmul.f32 %v2393_v49, %v2393_v49  ;;  %v3057_v36 = vpack.c.bf16 %v2396_v3, %v2396_v3  ;;  %v2607_v46 = vadd.f32 %v2606_v28, %v2605_v53 }
 0x258   : > { %v2290_v4 = vpop.f32.mrb[31].mxu0  ;;  %v1760_v37 = vpop.f32.mrb[27].mxu1  ;;  %v3055_v8 = vpack.c.bf16 %v2394_v10, %v2394_v10  ;;  %2554 = vst.msk [vmem:[%s4467_s11 + $0x50] sm:$0xf] %vm2533_vm10, %v3054_v12  ;;  %v2608_v50 = vsel %vm2566_vm11, %v2394_v10, 0.0  ;;  %v2657_v27 = vmul.f32 %v2394_v10, %v2394_v10  ;;  %v2367_v52 = vadd.f32 %v3347_v45, %v4451_v44 }
 0x259   : > { %v2707_v47 = vsel %vm2566_vm11, %v2656_v24, 0.0  ;;  %2557 = vst.msk [vmem:[%s4467_s11 + $0x5c] sm:$0xf] %vm2533_vm10, %v3057_v36  ;;  %v2659_v15 = vmul.f32 %v2396_v3, %v2396_v3  ;;  %v2609_v7 = vadd.f32 %v2608_v50, %v2607_v46  ;;  %v2365_v61 = vadd.f32 %v3348_v55, %v4451_v44 }
 0x25a   : > { %v2708_v56 = vadd.f32 %v2707_v47, %v2706_v54  ;;  %2555 = vst.msk [vmem:[%s4467_s11 + $0x54] sm:$0xf] %vm2533_vm10, %v3055_v8  ;;  %v2709_v62 = vsel %vm2566_vm11, %v2657_v27, 0.0  ;;  %v2399_v2 = vmax.f32 %v2367_v52, 0.0  ;;  %v3349_v63 = vadd.f32 %v4564_v14, %v3248_v11 }
 0x25b   : > { %v3350_v5 = vadd.f32 %v2274_v16, %v1760_v37  ;;  %v2611_v51 = vadd.f32 %v2610_v40, %v2609_v7  ;;  %v2397_v48 = vmax.f32 %v2365_v61, 0.0  ;;  %v2711_v22 = vsel %vm2566_vm11, %v2658_v43, 0.0 }
 0x25c   : > { %v2710_v13 = vadd.f32 %v2709_v62, %v2708_v56  ;;  %v2612_v30 = vsel %vm2566_vm11, %v2396_v3, 0.0  ;;  %v3060_v0 = vpack.c.bf16 %v2399_v2, %v2399_v2  ;;  %v2368_v20 = vadd.f32 %v3349_v63, %v4451_v44 }
 0x25d   : > { %v3251_v23 = vpop.f32.mrb[28].mxu1  ;;  %v3058_v60 = vpack.c.bf16 %v2397_v48, %v2397_v48  ;;  %v2613_v58 = vadd.f32 %v2612_v30, %v2611_v51  ;;  %v2614_v14 = vsel %vm2566_vm11, %v2397_v48, 0.0  ;;  %v2713_v25 = vsel %vm2566_vm11, %v2659_v15, 0.0 }
 0x25e   : > { %v1773_v1 = vpop.f32.mrb[29].mxu1  ;;  %v2712_v6 = vadd.f32 %v2711_v22, %v2710_v13  ;;  %2560 = vst.msk [vmem:[%s4467_s11 + $0x68] sm:$0xf] %vm2533_vm10, %v3060_v0  ;;  %v2660_v18 = vmul.f32 %v2397_v48, %v2397_v48  ;;  %v2400_v34 = vmax.f32 %v2368_v20, 0.0  ;;  %v2366_v26 = vadd.f32 %v3350_v5, %v4451_v44 }
 0x25f   : > { %v3252_v16 = vpop.f32.mrb[30].mxu1  ;;  %2558 = vst.msk [vmem:[%s4467_s11 + $0x60] sm:$0xf] %vm2533_vm10, %v3058_v60  ;;  %v2615_v19 = vadd.f32 %v2614_v14, %v2613_v58  ;;  %v3351_v31 = vadd.f32 %v3319_v33, %v3251_v23  ;;  %v3352_v38 = vadd.f32 %v2287_v17, %v1773_v1  ;;  %v2662_v39 = vmul.f32 %v2399_v2, %v2399_v2 }
 0x260   : > { %v1776_v32 = vpop.f32.mrb[31].mxu1  ;;  %v2714_v42 = vadd.f32 %v2713_v25, %v2712_v6  ;;  %v2715_v9 = vsel %vm2566_vm11, %v2660_v18, 0.0  ;;  %v3061_v35 = vpack.c.bf16 %v2400_v34, %v2400_v34  ;;  %v2398_v21 = vmax.f32 %v2366_v26, 0.0 }
 0x261   : > { %v2371_v29 = vadd.f32 %v3351_v31, %v4451_v44  ;;  %v2369_v49 = vadd.f32 %v3352_v38, %v4451_v44  ;;  %v2618_v53 = vsel %vm2566_vm11, %v2399_v2, 0.0  ;;  %v3353_v3 = vadd.f32 %v3320_v57, %v3252_v16 }
 0x262   : > { %v2716_v59 = vadd.f32 %v2715_v9, %v2714_v42  ;;  %2561 = vst.msk [vmem:[%s4467_s11 + $0x6c] sm:$0xf] %vm2533_vm10, %v3061_v35  ;;  %v3354_v10 = vadd.f32 %v2290_v4, %v1776_v32  ;;  %v3059_v41 = vpack.c.bf16 %v2398_v21, %v2398_v21  ;;  %v2616_v33 = vsel %vm2566_vm11, %v2398_v21, 0.0 }
 0x263   : > { %v2661_v17 = vmul.f32 %v2398_v21, %v2398_v21  ;;  %v2403_v54 = vmax.f32 %v2371_v29, 0.0  ;;  %v2617_v45 = vadd.f32 %v2616_v33, %v2615_v19  ;;  %v2401_v55 = vmax.f32 %v2369_v49, 0.0 }
 0x264   : > { %v2372_v11 = vadd.f32 %v3353_v3, %v4451_v44  ;;  %v2370_v12 = vadd.f32 %v3354_v10, %v4451_v44  ;;  %v2719_v28 = vsel %vm2566_vm11, %v2662_v39, 0.0  ;;  %v2663_v24 = vmul.f32 %v2400_v34, %v2400_v34  ;;  %2559 = vst.msk [vmem:[%s4467_s11 + $0x64] sm:$0xf] %vm2533_vm10, %v3059_v41 }
 0x265   : > { %v2717_v57 = vsel %vm2566_vm11, %v2661_v17, 0.0  ;;  %v3064_v36 = vpack.c.bf16 %v2403_v54, %v2403_v54  ;;  %v2620_v4 = vsel %vm2566_vm11, %v2400_v34, 0.0  ;;  %v2619_v37 = vadd.f32 %v2618_v53, %v2617_v45 }
 0x266   : > { %v2718_v40 = vadd.f32 %v2717_v57, %v2716_v59  ;;  %v3062_v43 = vpack.c.bf16 %v2401_v55, %v2401_v55  ;;  %v2622_v46 = vsel %vm2566_vm11, %v2401_v55, 0.0  ;;  %v2664_v44 = vmul.f32 %v2401_v55, %v2401_v55 }
 0x267   : > { %2564 = vst.msk [vmem:[%s4467_s11 + $0x78] sm:$0xf] %vm2533_vm10, %v3064_v36  ;;  %v2404_v8 = vmax.f32 %v2372_v11, 0.0  ;;  %v2402_v47 = vmax.f32 %v2370_v12, 0.0  ;;  %v2621_v27 = vadd.f32 %v2620_v4, %v2619_v37  ;;  %v2721_v52 = vsel %vm2566_vm11, %v2663_v24, 0.0 }
 0x268   : > { %v2720_v50 = vadd.f32 %v2719_v28, %v2718_v40  ;;  %2562 = vst.msk [vmem:[%s4467_s11 + $0x70] sm:$0xf] %vm2533_vm10, %v3062_v43  ;;  %v2723_v56 = vsel %vm2566_vm11, %v2664_v44, 0.0  ;;  %v2666_v63 = vmul.f32 %v2403_v54, %v2403_v54  ;;  %v2626_v48 = vsel %vm2566_vm11, %v2403_v54, 0.0 }
 0x269   : > { %v3065_v15 = vpack.c.bf16 %v2404_v8, %v2404_v8  ;;  %v2623_v7 = vadd.f32 %v2622_v46, %v2621_v27  ;;  %v3063_v62 = vpack.c.bf16 %v2402_v47, %v2402_v47  ;;  %v2624_v2 = vsel %vm2566_vm11, %v2402_v47, 0.0 }
 0x26a   : > { %v2722_v61 = vadd.f32 %v2721_v52, %v2720_v50  ;;  %v2665_v5 = vmul.f32 %v2402_v47, %v2402_v47  ;;  %v2667_v23 = vmul.f32 %v2404_v8, %v2404_v8  ;;  %v2727_v20 = vsel %vm2566_vm11, %v2666_v63, 0.0 }
 0x26b   : > { %2565 = vst.msk [vmem:[%s4467_s11 + $0x7c] sm:$0xf] %vm2533_vm10, %v3065_v15  ;;  %2563 = vst.msk [vmem:[%s4467_s11 + $0x74] sm:$0xf] %vm2533_vm10, %v3063_v62  ;;  %v2625_v13 = vadd.f32 %v2624_v2, %v2623_v7  ;;  %v2628_v1 = vsel %vm2566_vm11, %v2404_v8, 0.0 }
 0x26c   : > { %v2724_v51 = vadd.f32 %v2723_v56, %v2722_v61  ;;  %v2725_v22 = vsel %vm2566_vm11, %v2665_v5, 0.0  ;;  %v2729_v58 = vsel %vm2566_vm11, %v2667_v23, 0.0 }
 0x26d   : > { %v2627_v30 = vadd.f32 %v2626_v48, %v2625_v13 }
 0x26e   : > { %v2726_v0 = vadd.f32 %v2725_v22, %v2724_v51 }
 0x26f   : > { %v2629_v6 = vadd.f32 %v2628_v1, %v2627_v30 }
 0x270   : > { %v2728_v60 = vadd.f32 %v2727_v20, %v2726_v0 }
 0x271   : > { %v2630_v14 = vrot.slane %v2629_v6, 4 }
 0x272   : > { %v2730_v16 = vadd.f32 %v2729_v58, %v2728_v60 }
 0x273   : > { %v2631_v25 = vadd.f32 %v2630_v14, %v2629_v6 }
 0x274   : > { %v2731_v18 = vrot.slane %v2730_v16, 4 }
 0x275   : > { %v2632_v34 = vrot.slane %v2631_v25, 2 }
 0x276   : > { %v2732_v26 = vadd.f32 %v2731_v18, %v2730_v16 }
 0x277   : > { %v2633_v32 = vadd.f32 %v2632_v34, %v2631_v25 }
 0x278   : > { %v2733_v19 = vrot.slane %v2732_v26, 2 }
 0x279   : > { %v2634_v42 = vrot.slane %v2633_v32, 1 }
 0x27a   : > { %v2734_v31 = vadd.f32 %v2733_v19, %v2732_v26 }
 0x27b   : > { %v2635_v39 = vadd.f32 %v2634_v42, %v2633_v32 }
 0x27c   : > { %v2735_v38 = vrot.slane %v2734_v31, 1 }
 0x27e   : > { %v2736_v9 = vadd.f32 %v2735_v38, %v2734_v31 }
 0x280   : > { %v2738_v35 = vsel %vm2737_vm12, %v2635_v39, %v2736_v9 }
 0x281   : > { %2740 = vst.msk [vmem:[%s243_s18] sm:$0x3] %vm2739_vm13, %v2738_v35 }
 0x282 PF: > { %s16_s17 = sadd.s32 1, %s3598_s17   ;;  %s4663_s15 = smov %s3594_s16 }
 0x283   : > { %p13_p4 = scmp.ge.s32.totalorder %s16_s17, 4   ;;  %s4664_s16 = smov %s4666_s19 }
 0x285   :  { %15 = sbr.rel (!%p13_p4) target bundleno = 2 (0x2), region = 83 }
 0x28c   :  { %2783 = vsyncpa [#allocation3], 1 }
 0x28d   :  { %2785 = vsyncpa [#allocation3 + $0x1], 1 }

// kernel: fully_cnn_forward.11
= control target key start
LH: loop header
LB: loop body
LE: loop exit
PB: predicated region body
PF: predicated region fallthrough
CT: control target
= control target key end

     0   :  { %v33_v0 = vlaneseq  ;;  %v208_v1 = vmov 1983009808   ;;  %v209_v26 = vmov 1934713408   ;;  %s266_s0 = inlined_call_operand.vmem [shape: bf16[4,2,2,512], index: 0, kind: input, shape index: {}]   ;;  %s267_s1 = inlined_call_operand.vmem [shape: f32[1,256], index: 1, kind: input, shape index: {}]   ;;  %s268_s2 = inlined_call_operand.vmem [shape: f32[1,256], index: 2, kind: input, shape index: {}]   ;;  %s269_s3 = inlined_call_operand.vmem [shape: f32[4,512], index: 3, kind: output, shape index: {}]  }
   0x1   :  { %v43_v2 = vunpack.c.l.s4 %v208_v1  ;;  %v188_v3 = vld [vmem:[%s266_s0] sm:$0xff]   ;;  %v203_v4 = vld [vmem:[%s266_s0 + $0x8] sm:$0xff]   ;;  %v204_v5 = vld [vmem:[%s266_s0 + $0x10] sm:$0xff]   ;;  %v138_v27 = vunpack.c.l.s4 %v209_v26 }
   0x2   :  { %v239_v6 = vshrl.u32 %v33_v0, 7  ;;  %v30_v8 = vld [vmem:[%s267_s1] sm:$0x3]  ;;  %v189_v10 = vunpack.c.l.bf16 %v188_v3  ;;  %v190_v11 = vunpack.c.h.bf16 %v188_v3  ;;  %v205_v12 = vld [vmem:[%s266_s0 + $0x18] sm:$0xff]   ;;  %v193_v15 = vunpack.c.l.bf16 %v203_v4 }
   0x3   :  { %v44_v7 = vunpack.c.0.s8 %v43_v2  ;;  %v31_v9 = vld [vmem:[%s268_s2] sm:$0x3]  ;;  %v194_v16 = vunpack.c.h.bf16 %v203_v4  ;;  %v197_v17 = vunpack.c.l.bf16 %v204_v5  ;;  %v198_v23 = vunpack.c.h.bf16 %v204_v5 }
   0x4   :  { %v35_v13 = vsub.s32 0, %v239_v6  ;;  %v39_v14 = vsub.s32 1, %v239_v6  ;;  %v201_v24 = vunpack.c.l.bf16 %v205_v12  ;;  %v202_v25 = vunpack.c.h.bf16 %v205_v12 }
   0x5   :  { %v253_v18 = vsub.s32 %v44_v7, %v239_v6  ;;  %v92_v30 = vrot.slane %v189_v10, 4  ;;  %v93_v31 = vrot.slane %v190_v11, 4  ;;  %v94_v32 = vrot.slane %v193_v15, 4 }
   0x6   :  { %v36_v19 = vrot.slane %v30_v8, %v35_v13  ;;  %v40_v20 = vrot.slane %v30_v8, %v39_v14  ;;  %v62_v21 = vrot.slane %v31_v9, %v35_v13  ;;  %v66_v22 = vrot.slane %v31_v9, %v39_v14 }
   0x7   :  { %v95_v35 = vrot.slane %v194_v16, 4  ;;  %v96_v36 = vrot.slane %v197_v17, 4  ;;  %v97_v37 = vrot.slane %v198_v23, 4  ;;  %v98_v38 = vrot.slane %v201_v24, 4 }
   0x8   :  { %v41_v28 = vcombine.low %v36_v19, %v40_v20  ;;  %v67_v29 = vcombine.low %v62_v21, %v66_v22  ;;  %v99_v39 = vrot.slane %v202_v25, 4  ;;  %v139_v40 = vunpack.c.0.s8 %v138_v27 }
   0xa   :  { %v48_v33 = vrot.slane %v41_v28, %v253_v18  ;;  %v74_v34 = vrot.slane %v67_v29, %v253_v18  ;;  %v142_v21 = vsub.s32 %v139_v40, %v239_v6 }
   0xc   :  { %v50_v41 = vmul.f32 %v189_v10, %v48_v33  ;;  %v51_v42 = vmul.f32 %v190_v11, %v48_v33  ;;  %v52_v43 = vmul.f32 %v193_v15, %v48_v33  ;;  %v53_v44 = vmul.f32 %v194_v16, %v48_v33 }
   0xd   :  { %v54_v45 = vmul.f32 %v197_v17, %v48_v33  ;;  %v55_v46 = vmul.f32 %v198_v23, %v48_v33  ;;  %v56_v47 = vmul.f32 %v201_v24, %v48_v33  ;;  %v57_v48 = vmul.f32 %v202_v25, %v48_v33 }
   0xe   :  { %v76_v49 = vadd.f32 %v74_v34, %v50_v41  ;;  %v77_v50 = vadd.f32 %v74_v34, %v51_v42  ;;  %v78_v51 = vadd.f32 %v74_v34, %v52_v43  ;;  %v79_v52 = vadd.f32 %v74_v34, %v53_v44 }
   0xf   :  { %v80_v53 = vadd.f32 %v74_v34, %v54_v45  ;;  %v81_v54 = vadd.f32 %v74_v34, %v55_v46  ;;  %v82_v55 = vadd.f32 %v74_v34, %v56_v47  ;;  %v83_v56 = vadd.f32 %v74_v34, %v57_v48 }
  0x10   :  { %v108_v57 = vmul.f32 %v92_v30, %v48_v33  ;;  %v109_v58 = vmul.f32 %v93_v31, %v48_v33  ;;  %v110_v59 = vmul.f32 %v94_v32, %v48_v33  ;;  %v111_v60 = vmul.f32 %v95_v35, %v48_v33 }
  0x11   :  { %v112_v61 = vmul.f32 %v96_v36, %v48_v33  ;;  %v113_v62 = vmul.f32 %v97_v37, %v48_v33  ;;  %v114_v63 = vmul.f32 %v98_v38, %v48_v33  ;;  %v115_v0 = vmul.f32 %v99_v39, %v48_v33 }
  0x12   :  { %v116_v1 = vadd.f32 %v108_v57, %v74_v34  ;;  %v117_v2 = vadd.f32 %v109_v58, %v74_v34  ;;  %v118_v3 = vadd.f32 %v110_v59, %v74_v34  ;;  %v119_v4 = vadd.f32 %v111_v60, %v74_v34 }
  0x13   :  { %v120_v5 = vadd.f32 %v112_v61, %v74_v34  ;;  %v121_v7 = vadd.f32 %v113_v62, %v74_v34  ;;  %v122_v8 = vadd.f32 %v114_v63, %v74_v34  ;;  %v123_v9 = vadd.f32 %v115_v0, %v74_v34 }
  0x14   :  { %v124_v10 = vmax.f32 %v76_v49, %v116_v1  ;;  %v125_v11 = vmax.f32 %v77_v50, %v117_v2  ;;  %v126_v12 = vmax.f32 %v78_v51, %v118_v3  ;;  %v127_v13 = vmax.f32 %v79_v52, %v119_v4 }
  0x15   :  { %v128_v14 = vmax.f32 %v80_v53, %v120_v5  ;;  %v129_v15 = vmax.f32 %v81_v54, %v121_v7  ;;  %v130_v16 = vmax.f32 %v82_v55, %v122_v8  ;;  %v131_v17 = vmax.f32 %v83_v56, %v123_v9 }
  0x16   :  { %v132_v19 = vmax.f32 %v124_v10, %v125_v11  ;;  %v133_v20 = vmax.f32 %v126_v12, %v127_v13 }
  0x17   :  { %v134_v22 = vmax.f32 %v128_v14, %v129_v15  ;;  %v135_v23 = vmax.f32 %v130_v16, %v131_v17 }
  0x18   :  { %v136_v24 = vcombine.low %v132_v19, %v133_v20 }
  0x19   :  { %v145_v25 = vcombine.low %v134_v22, %v135_v23 }
  0x1a   :  { %v143_v26 = vrot.slane %v136_v24, %v142_v21 }
  0x1b   :  { %v152_v27 = vrot.slane %v145_v25, %v142_v21 }
  0x1d   :  { %v156_v28 = vcombine.low %v143_v26, %v152_v27  ;;  %v186_v29 = vcombine.high %v143_v26, %v152_v27 }
  0x1f   :  { %v163_v30 = vrot.slane %v156_v28, %v253_v18  ;;  %v174_v31 = vrot.slane %v186_v29, %v253_v18 }
  0x21   :  { %v164_v32 = vcombine.high %v163_v30, %v163_v30  ;;  %v175_v33 = vcombine.high %v174_v31, %v174_v31 }
  0x23   :  { %v176_v34 = vcombine.low %v163_v30, %v164_v32  ;;  %v177_v35 = vcombine.low %v174_v31, %v175_v33 }
  0x25   :  { %180 = vst [vmem:[%s269_s3] sm:$0xff] %v176_v34  ;;  %181 = vst [vmem:[%s269_s3 + $0x8] sm:$0xff] %v177_v35 }

// kernel: fully_cnn_forward.10
= control target key start
LH: loop header
LB: loop body
LE: loop exit
PB: predicated region body
PF: predicated region fallthrough
CT: control target
= control target key end

     0   :  { %s2414_s15 = smov 0   ;;  %s2416_s16 = smov 0   ;;  %s3019_s0 = inlined_call_operand.vmem [shape: bf16[2,6,6,128], index: 0, kind: input, shape index: {}]   ;;  %s3020_s1 = inlined_call_operand.vmem [shape: bf16[3,384,256], index: 1, kind: input, shape index: {}]   ;;  %s3021_s2 = inlined_call_operand.vmem [shape: f32[1,256], index: 2, kind: input, shape index: {}]   ;;  %s3022_s3 = inlined_call_operand.vmem [shape: bf16[32,256], index: 3, kind: output, shape index: {0}]   ;;  %s3023_s4 = inlined_call_operand.vmem [shape: f32[2,2,256], index: 4, kind: output, shape index: {1}]  }
   0x1   :  { %s2418_s17 = smov 0  }
   0x2 LB: > { %s27_s18 = sadd.s32 1, %s2381_s16  ;;  %p1822_p0 = scmp.ge.s32.totalorder %s2385_s17, 1  ;;  %s2385_s17 = sphi %s2418_s17, %s15_s17   ;;  %s2381_s16 = sphi %s2416_s16, %s3025_s16   ;;  %s2377_s15 = sphi %s2414_s15, %s3024_s15  }
   0x3   : > { %p29_p1 = scmp.ge.s32.totalorder %s27_s18, 2  ;;  %p181_p2 = scmp.lt.s32.totalorder %s2385_s17, 3 }
   0x5   : > { %s3027_s18 = smov (%p29_p1, %s27_s18), 0  ;;  %p182_p3 = pnand %p1822_p0, %p181_p2 }
   0x6   : > { %v2141_v0 = vld [vmem:[%s3020_s1 + $0x184] ss:$8 sps:$4 sm:$0xff] (!%p182_p3)   ;;  %v2387_v2 = vmov (!%p182_p3), 0   ;;  %v2145_v3 = vld [vmem:[%s3020_s1 + $0x180] ss:$8 sps:$4 sm:$0xff] (!%p182_p3)   ;;  %p215_p4 = scmp.lt.s32.totalorder (!%p182_p3), %s2377_s15, 1  ;;  %v291_v23 = vlaneseq (!%p182_p3) }
   0x7   : > { %185 = sbr.rel (%p182_p3) target bundleno = 409 (0x199), region = 32  ;;  %v2143_v1 = vld [vmem:[%s3020_s1 + $0x284] ss:$8 sps:$4 sm:$0xff] (!%p182_p3)   ;;  %828 = vmatprep.mubr.bf16.mxu0 (!%p182_p3), %v2387_v2  ;;  %753 = vmatprep.subr.bf16.mxu1 (!%p182_p3), %v2141_v0  ;;  %v2146_v4 = vld [vmem:[%s3020_s1 + $0x280] ss:$8 sps:$4 sm:$0xff] (!%p182_p3)   ;;  %s1824_s22 = sshll.u32 (!%p182_p3), %s2377_s15, 1 }
   0x8   : > { %796 = vmatprep.subr.bf16.mxu0 (!%p182_p3), %v2143_v1  ;;  %v2147_v5 = vld [vmem:[%s3020_s1 + $0x194] ss:$8 sps:$4 sm:$0xff] (!%p182_p3)   ;;  %754 = vmatpush1.bf16.msra.mxu1 (!%p182_p3), %v2145_v3  ;;  %v2151_v7 = vld [vmem:[%s3020_s1 + $0x190] ss:$8 sps:$4 sm:$0xff] (!%p182_p3)   ;;  %v2153_v9 = vld [vmem:[%s3020_s1 + $0x1a4] ss:$8 sps:$4 sm:$0xff] (!%p182_p3)  }
   0x9   : > { %797 = vmatpush1.bf16.msra.mxu0 (!%p182_p3), %v2146_v4  ;;  %v2149_v6 = vld [vmem:[%s3020_s1 + $0x294] ss:$8 sps:$4 sm:$0xff] (!%p182_p3)   ;;  %755 = vmatprep.subr.bf16.mxu1 (!%p182_p3), %v2147_v5  ;;  %v2152_v8 = vld [vmem:[%s3020_s1 + $0x290] ss:$8 sps:$4 sm:$0xff] (!%p182_p3)   ;;  %v2155_v10 = vld [vmem:[%s3020_s1 + $0x2a4] ss:$8 sps:$4 sm:$0xff] (!%p182_p3)  }
   0xa   : > { %798 = vmatprep.subr.bf16.mxu0 (!%p182_p3), %v2149_v6  ;;  %v2157_v11 = vld [vmem:[%s3020_s1 + $0x1a0] ss:$8 sps:$4 sm:$0xff] (!%p182_p3)   ;;  %v2159_v13 = vld [vmem:[%s3020_s1 + $0x1b4] ss:$8 sps:$4 sm:$0xff] (!%p182_p3)   ;;  %v2163_v15 = vld [vmem:[%s3020_s1 + $0x1b0] ss:$8 sps:$4 sm:$0xff] (!%p182_p3)  }
   0xb   : > { %v2158_v12 = vld [vmem:[%s3020_s1 + $0x2a0] ss:$8 sps:$4 sm:$0xff] (!%p182_p3)   ;;  %v2161_v14 = vld [vmem:[%s3020_s1 + $0x2b4] ss:$8 sps:$4 sm:$0xff] (!%p182_p3)   ;;  %v2164_v16 = vld [vmem:[%s3020_s1 + $0x2b0] ss:$8 sps:$4 sm:$0xff] (!%p182_p3)  }
   0xc   : > { %756 = vmatpush1.bf16.msra.mxu1 (!%p182_p3), %v2151_v7  ;;  %v2165_v17 = vld [vmem:[%s3020_s1 + $0x1c4] ss:$8 sps:$4 sm:$0xff] (!%p182_p3)   ;;  %v2169_v19 = vld [vmem:[%s3020_s1 + $0x1c0] ss:$8 sps:$4 sm:$0xff] (!%p182_p3)   ;;  %v2388_v21 = vmov (!%p182_p3), 1983009808  }
   0xd   : > { %799 = vmatpush1.bf16.msra.mxu0 (!%p182_p3), %v2152_v8  ;;  %757 = vmatprep.subr.bf16.mxu1 (!%p182_p3), %v2153_v9  ;;  %v2167_v18 = vld [vmem:[%s3020_s1 + $0x2c4] ss:$8 sps:$4 sm:$0xff] (!%p182_p3)   ;;  %v2170_v20 = vld [vmem:[%s3020_s1 + $0x2c0] ss:$8 sps:$4 sm:$0xff] (!%p182_p3)   ;;  %v289_v22 = vunpack.c.l.s4 (!%p182_p3), %v2388_v21  ;;  %v2171_v24 = vld [vmem:[%s3020_s1 + $0x1d4] ss:$8 sps:$4 sm:$0xff] (!%p182_p3)  }
   0xe   : > { %800 = vmatprep.subr.bf16.mxu0 %v2155_v10  ;;  %s2482_s27 = scalar_select %p215_p4, %s2377_s15, 1  ;;  %v2173_v25 = vld [vmem:[%s3020_s1 + $0x2d4] ss:$8 sps:$4 sm:$0xff]   ;;  %v2175_v26 = vld [vmem:[%s3020_s1 + $0x1d0] ss:$8 sps:$4 sm:$0xff]   ;;  %v2514_v28 = vshrl.u32 %v291_v23, 7 }
   0xf   : > { %v290_v27 = vunpack.c.0.s8 %v289_v22  ;;  %v2176_v29 = vld [vmem:[%s3020_s1 + $0x2d0] ss:$8 sps:$4 sm:$0xff]   ;;  %v2177_v30 = vld [vmem:[%s3020_s1 + $0x1e4] ss:$8 sps:$4 sm:$0xff]   ;;  %v2181_v32 = vld [vmem:[%s3020_s1 + $0x1e0] ss:$8 sps:$4 sm:$0xff]  }
  0x10   : > { %758 = vmatpush1.bf16.msra.mxu1 %v2157_v11  ;;  %s2114_s12 = smul.u32 24, %s2482_s27  ;;  %v2179_v31 = vld [vmem:[%s3020_s1 + $0x2e4] ss:$8 sps:$4 sm:$0xff]   ;;  %v2182_v40 = vld [vmem:[%s3020_s1 + $0x2e0] ss:$8 sps:$4 sm:$0xff]   ;;  %p222_p5 = scmp.lt.s32.totalorder %s1824_s22, 3 }
  0x11   : > { %801 = vmatpush1.bf16.msra.mxu0 %v2158_v12  ;;  %759 = vmatprep.subr.bf16.mxu1 %v2159_v13  ;;  %v2545_v39 = vsub.s32 %v290_v27, %v2514_v28  ;;  %v2183_v41 = vld [vmem:[%s3020_s1 + $0x1f4] ss:$8 sps:$4 sm:$0xff]   ;;  %v2187_v49 = vld [vmem:[%s3020_s1 + $0x1f0] ss:$8 sps:$4 sm:$0xff]   ;;  %v2189_v53 = vld [vmem:[%s3020_s1 + $0x204] ss:$8 sps:$4 sm:$0xff]  }
  0x12   : > { %802 = vmatprep.subr.bf16.mxu0 %v2161_v14  ;;  %s2512_s25 = scalar_lea.vmem %s3019_s0, %s2114_s12  ;;  %v2185_v44 = vld [vmem:[%s3020_s1 + $0x2f4] ss:$8 sps:$4 sm:$0xff]   ;;  %v2188_v50 = vld [vmem:[%s3020_s1 + $0x2f0] ss:$8 sps:$4 sm:$0xff]   ;;  %v2197_v59 = vld [vmem:[%s3020_s1 + $0x104] ss:$8 sps:$4 sm:$0xff]  }
  0x13   : > { %v2529_v33 = vld [vmem:[%s2512_s25 + $0x4] sm:$0x7]  ;;  %v2532_v34 = vld [vmem:[%s2512_s25 + $0x8] sm:$0x7]  ;;  %v2535_v35 = vld [vmem:[%s2512_s25 + $0xc] sm:$0x7] }
  0x14   : > { %760 = vmatpush1.bf16.msra.mxu1 %v2163_v15  ;;  %v2538_v36 = vld [vmem:[%s2512_s25 + $0x10] sm:$0x7]  ;;  %v1830_v37 = vcombine.low %v2529_v33, %v2529_v33  ;;  %v1831_v38 = vcombine.low %v2532_v34, %v2532_v34  ;;  %v1832_v42 = vcombine.low %v2535_v35, %v2535_v35  ;;  %v2195_v1 = vld [vmem:[%s3020_s1 + $0x100] ss:$8 sps:$4 sm:$0xff]   ;;  %v2199_v9 = vld [vmem:[%s3020_s1 + $0x214] ss:$8 sps:$4 sm:$0xff]  }
  0x15   : > { %803 = vmatpush1.bf16.msra.mxu0 %v2164_v16  ;;  %761 = vmatprep.subr.bf16.mxu1 %v2165_v17  ;;  %v2557_v43 = vcombine.low %v2538_v36, %v2538_v36  ;;  %v2198_v5 = vld [vmem:[%s3020_s1 + $0x200] ss:$8 sps:$4 sm:$0xff]   ;;  %v2203_v13 = vld [vmem:[%s3020_s1 + $0x114] ss:$8 sps:$4 sm:$0xff]   ;;  %v2201_v17 = vld [vmem:[%s3020_s1 + $0x110] ss:$8 sps:$4 sm:$0xff]  }
  0x16   : > { %804 = vmatprep.subr.bf16.mxu0 %v2167_v18  ;;  %v284_v45 = vrot.slane %v1830_v37, 1  ;;  %v285_v46 = vrot.slane %v1831_v38, 1  ;;  %v286_v47 = vrot.slane %v1832_v42, 1  ;;  %v263_v56 = vshrl.u32 %v1830_v37, 16  ;;  %v2205_v23 = vld [vmem:[%s3020_s1 + $0x224] ss:$8 sps:$4 sm:$0xff]  }
  0x17   : > { %v409_v48 = vrot.slane %v2557_v43, 1  ;;  %v265_v57 = vshll.u32 %v1830_v37, 16  ;;  %v270_v60 = vshrl.u32 %v1831_v38, 16  ;;  %v272_v61 = vshll.u32 %v1831_v38, 16  ;;  %v2216_v38 = vld [vmem:[%s3020_s1 + $0x230] ss:$8 sps:$4 sm:$0xff]  }
  0x18   : > { %762 = vmatpush1.bf16.msra.mxu1 %v2169_v19  ;;  %v2570_v51 = vrot.slane %v284_v45, %v2545_v39  ;;  %v2573_v52 = vrot.slane %v285_v46, %v2545_v39  ;;  %v2579_v54 = vrot.slane %v286_v47, %v2545_v39  ;;  %v277_v7 = vshrl.u32 %v1832_v42, 16  ;;  %v2204_v19 = vld [vmem:[%s3020_s1 + $0x210] ss:$8 sps:$4 sm:$0xff]   ;;  %v237_v45 = vld [vmem:[%s2512_s25] sm:$0x7]  ;;  %s3029_s22 = smov (!%p222_p5, %s1824_s22), 3 }
  0x19   : > { %805 = vmatpush1.bf16.msra.mxu0 %v2170_v20  ;;  %763 = vmatprep.subr.bf16.mxu1 %v2171_v24  ;;  %v2582_v55 = vrot.slane %v409_v48, %v2545_v39  ;;  %v267_v63 = vrot.slane %v265_v57, 1  ;;  %v274_v3 = vrot.slane %v272_v61, 1  ;;  %v279_v8 = vshll.u32 %v1832_v42, 16  ;;  %v2217_v42 = vld [vmem:[%s3020_s1 + $0x244] ss:$8 sps:$4 sm:$0xff]   ;;  %s2090_s15 = sshll.u32 %s3029_s22, 3 }
  0x1a   : > { %806 = vmatprep.subr.bf16.mxu0 %v2173_v25  ;;  %v1883_v58 = vcombine.low %v2570_v51, %v2573_v52  ;;  %v405_v11 = vshll.u32 %v2557_v43, 16  ;;  %v403_v16 = vshrl.u32 %v2557_v43, 16  ;;  %v2209_v25 = vld [vmem:[%s3020_s1 + $0x124] ss:$8 sps:$4 sm:$0xff]   ;;  %v1829_v46 = vcombine.low %v237_v45, %v237_v45  ;;  %v2222_v47 = vld [vmem:[%s3020_s1 + $0x240] ss:$8 sps:$4 sm:$0xff]  }
  0x1b   : > { %v1885_v62 = vcombine.low %v2579_v54, %v2582_v55  ;;  %v268_v6 = vor.u32 %v267_v63, %v263_v56  ;;  %v275_v10 = vor.u32 %v274_v3, %v270_v60  ;;  %v281_v14 = vrot.slane %v279_v8, 1  ;;  %v2221_v43 = vld [vmem:[%s3020_s1 + $0x144] ss:$8 sps:$4 sm:$0xff]   ;;  %v2227_v56 = vld [vmem:[%s3020_s1 + $0x154] ss:$8 sps:$4 sm:$0xff]   ;;  %s2091_s29 = sshll.u32 %s2482_s27, 2 }
  0x1c   : > { %764 = vmatpush1.bf16.msra.mxu1 %v2175_v26  ;;  %v492_v0 = vrot.slane %v1883_v58, %v2545_v39  ;;  %v407_v22 = vrot.slane %v405_v11, 1  ;;  %v256_v57 = vshrl.u32 %v1829_v46, 16  ;;  %v258_v58 = vshll.u32 %v1829_v46, 16  ;;  %v2225_v61 = vld [vmem:[%s3020_s1 + $0x150] ss:$8 sps:$4 sm:$0xff]   ;;  %s234_s6 = scalar_lea.vmem %s3023_s4, %s2091_s29 }
  0x1d   : > { %807 = vmatpush1.bf16.msra.mxu0 %v2176_v29  ;;  %765 = vmatprep.subr.bf16.mxu1 %v2177_v30  ;;  %v506_v4 = vrot.slane %v1885_v62, %v2545_v39  ;;  %v303_v15 = vcombine.low %v2529_v33, %v268_v6  ;;  %v319_v18 = vcombine.low %v2532_v34, %v275_v10  ;;  %v2207_v29 = vld [vmem:[%s3020_s1 + $0x120] ss:$8 sps:$4 sm:$0xff]   ;;  %v2211_v34 = vld [vmem:[%s3020_s1 + $0x234] ss:$8 sps:$4 sm:$0xff]   ;;  %v2229_v62 = vld [vmem:[%s3020_s1 + $0x264] ss:$8 sps:$4 sm:$0xff]  }
  0x1e   : > { %808 = vmatprep.subr.bf16.mxu0 %v2179_v31  ;;  %v282_v20 = vor.u32 %v281_v14, %v277_v7  ;;  %v408_v27 = vor.u32 %v407_v22, %v403_v16  ;;  %v2210_v30 = vld [vmem:[%s3020_s1 + $0x220] ss:$8 sps:$4 sm:$0xff]   ;;  %v260_v63 = vrot.slane %v258_v58, 1  ;;  %v2235_v7 = vld [vmem:[%s3020_s1 + $0x274] ss:$8 sps:$4 sm:$0xff]   ;;  %vm1697_vm0 = vcmask 1040384  }
  0x1f   : > { %v509_v12 = vcombine.low %v492_v0, %v506_v4  ;;  %v2616_v21 = vrot.slane %v303_v15, %v2545_v39  ;;  %v2622_v24 = vrot.slane %v319_v18, %v2545_v39  ;;  %v2233_v0 = vld [vmem:[%s3020_s1 + $0x164] ss:$8 sps:$4 sm:$0xff]   ;;  %v2234_v3 = vld [vmem:[%s3020_s1 + $0x260] ss:$8 sps:$4 sm:$0xff]   ;;  %v2250_v22 = vld [vmem:[%s3020_s1 + $0x14] ss:$8 sps:$4 sm:$0xff]  }
  0x20   : > { %766 = vmatpush1.bf16.msra.mxu1 %v2181_v32  ;;  %v335_v26 = vcombine.low %v2535_v35, %v282_v20  ;;  %v410_v32 = vcombine.low %v2538_v36, %v408_v27  ;;  %v2215_v35 = vld [vmem:[%s3020_s1 + $0x134] ss:$8 sps:$4 sm:$0xff]   ;;  %v2213_v36 = vld [vmem:[%s3020_s1 + $0x130] ss:$8 sps:$4 sm:$0xff]   ;;  %v2231_v6 = vld [vmem:[%s3020_s1 + $0x160] ss:$8 sps:$4 sm:$0xff]  }
  0x21   : > { %809 = vmatpush1.bf16.msra.mxu0 %v2182_v40  ;;  %767 = vmatprep.subr.bf16.mxu1 %v2183_v41  ;;  %v1882_v33 = vcombine.low %v2616_v21, %v2622_v24  ;;  %v2246_v16 = vld [vmem:[%s3020_s1 + $0x304] ss:$8 sps:$4 sm:$0xff]  }
  0x22   : > { %810 = vmatprep.subr.bf16.mxu0 %v2185_v44  ;;  %v2636_v31 = vrot.slane %v335_v26, %v2545_v39  ;;  %v2648_v37 = vrot.slane %v410_v32, %v2545_v39  ;;  %v2251_v26 = vld [vmem:[%s3020_s1 + $0x310] ss:$8 sps:$4 sm:$0xff]   ;;  %v2256_v27 = vld [vmem:[%s3020_s1 + $0x24] ss:$8 sps:$4 sm:$0xff]   ;;  %v2262_v32 = vld [vmem:[%s3020_s1 + $0x34] ss:$8 sps:$4 sm:$0xff]  }
  0x23   : > { %v2659_v41 = vrot.slane %v1882_v33, %v2545_v39  ;;  %v2265_v33 = vld [vmem:[%s3020_s1 + $0x334] ss:$8 sps:$4 sm:$0xff]  }
  0x24   : > { %768 = vmatpush1.bf16.msra.mxu1 %v2187_v49  ;;  %v1884_v40 = vcombine.low %v2636_v31, %v2648_v37  ;;  %v2219_v49 = vld [vmem:[%s3020_s1 + $0x140] ss:$8 sps:$4 sm:$0xff]  }
  0x25   : > { %811 = vmatpush1.bf16.msra.mxu0 %v2188_v50  ;;  %769 = vmatprep.subr.bf16.mxu1 %v2189_v53  ;;  %v2223_v50 = vld [vmem:[%s3020_s1 + $0x254] ss:$8 sps:$4 sm:$0xff]   ;;  %v283_v53 = vrot.slane %v1829_v46, 1  ;;  %v2280_v46 = vld [vmem:[%s3020_s1 + $0x64] ss:$8 sps:$4 sm:$0xff]  }
  0x26   : > { %1160 = vmatprep.subr.bf16.mxu0 %v2197_v59  ;;  %v2668_v44 = vrot.slane %v1884_v40, %v2545_v39  ;;  %v2228_v59 = vld [vmem:[%s3020_s1 + $0x250] ss:$8 sps:$4 sm:$0xff]   ;;  %v2266_v40 = vld [vmem:[%s3020_s1 + $0x40] ss:$8 sps:$4 sm:$0xff]  }
  0x27   : > { %v301_v60 = vrot.slane %v283_v53, %v2545_v39  ;;  %v2281_v53 = vld [vmem:[%s3020_s1 + $0x360] ss:$8 sps:$4 sm:$0xff]  }
  0x28   : > { %829 = vmatmul.mubr.bf16.vlgmr.msra.gmra.mrb[0].mxu0 %v509_v12  ;;  %770 = vmatpush1.bf16.msra.mxu1 %v2198_v5  ;;  %v508_v48 = vcombine.high %v2659_v41, %v2668_v44  ;;  %v1937_v5 = vcombine.low %v2573_v52, %v2579_v54  ;;  %v2240_v54 = vld [vmem:[%s3020_s1 + $0x270] ss:$8 sps:$4 sm:$0xff]  }
  0x29   : > { %1161 = vmatpush1.bf16.msra.mxu0 %v2195_v1  ;;  %771 = vmatprep.subr.bf16.mxu1 %v2199_v9  ;;  %v261_v1 = vor.u32 %v260_v63, %v256_v57  ;;  %v1935_v4 = vcombine.low %v301_v60, %v2570_v51  ;;  %v2239_v9 = vld [vmem:[%s3020_s1 + $0x174] ss:$8 sps:$4 sm:$0xff]   ;;  %v1936_v51 = vcombine.low %v2622_v24, %v2636_v31  ;;  %v2237_v12 = vld [vmem:[%s3020_s1 + $0x170] ss:$8 sps:$4 sm:$0xff]   ;;  %v2257_v31 = vld [vmem:[%s3020_s1 + $0x320] ss:$8 sps:$4 sm:$0xff]  }
  0x2a   : > { %1162 = vmatprep.subr.bf16.mxu0 %v2203_v13  ;;  %1192 = vmatprep.mubr.bf16.mxu0 %v2387_v2  ;;  %v2721_v11 = vrot.slane %v1937_v5, %v2545_v39  ;;  %v2243_v13 = vld [vmem:[%s3020_s1 + $0x4] ss:$8 sps:$4 sm:$0xff]   ;;  %v2289_v57 = vld [vmem:[%s3020_s1 + $0x374] ss:$8 sps:$4 sm:$0xff]   ;;  %v2287_v63 = vld [vmem:[%s3020_s1 + $0x370] ss:$8 sps:$4 sm:$0xff]  }
  0x2b   : > { %785 = vmatprep.mubr.bf16.mxu1 %v508_v48  ;;  %v287_v8 = vcombine.low %v237_v45, %v261_v1  ;;  %v856_v10 = vrot.slane %v1935_v4, %v2545_v39  ;;  %v2731_v15 = vrot.slane %v1936_v51, %v2545_v39  ;;  %v2275_v45 = vld [vmem:[%s3020_s1 + $0x350] ss:$8 sps:$4 sm:$0xff]   ;;  %v242_v48 = vld [vmem:[%s2512_s25 + $0x14] sm:$0x7]  ;;  %s226_s25 = scalar_lea.vmem %s3022_s3, %s2090_s15 }
  0x2c   : > { %772 = vmatpush1.bf16.msra.mxu1 %v2204_v19  ;;  %v2241_v19 = vld [vmem:[%s3020_s1] ss:$8 sps:$4 sm:$0xff]  }
  0x2d   : > { %1163 = vmatpush1.bf16.msra.mxu0 %v2201_v17  ;;  %773 = vmatprep.subr.bf16.mxu1 %v2205_v23  ;;  %v294_v52 = vrot.slane %v287_v8, %v2545_v39  ;;  %v507_v17 = vcombine.low %v2659_v41, %v2668_v44  ;;  %v873_v20 = vcombine.low %v856_v10, %v2721_v11  ;;  %v2253_v23 = vld [vmem:[%s3020_s1 + $0x314] ss:$8 sps:$4 sm:$0xff]   ;;  %v2269_v41 = vld [vmem:[%s3020_s1 + $0x340] ss:$8 sps:$4 sm:$0xff]   ;;  %v2272_v44 = vld [vmem:[%s3020_s1 + $0x50] ss:$8 sps:$4 sm:$0xff]  }
  0x2e   : > { %1164 = vmatprep.subr.bf16.mxu0 %v2209_v25  ;;  %v2248_v25 = vld [vmem:[%s3020_s1 + $0x10] ss:$8 sps:$4 sm:$0xff]   ;;  %v2293_v8 = vld [vmem:[%s3020_s1 + $0x380] ss:$8 sps:$4 sm:$0xff]  }
  0x2f   : > { %v1934_v14 = vcombine.low %v294_v52, %v2616_v21  ;;  %v2244_v21 = vld [vmem:[%s3020_s1 + $0x300] ss:$8 sps:$4 sm:$0xff]   ;;  %v2296_v10 = vld [vmem:[%s3020_s1 + $0x90] ss:$8 sps:$4 sm:$0xff]  }
  0x30   : > { %774 = vmatpush1.bf16.msra.mxu1 %v2210_v30  ;;  %v2254_v30 = vld [vmem:[%s3020_s1 + $0x20] ss:$8 sps:$4 sm:$0xff]  }
  0x31   : > { %1165 = vmatpush1.bf16.msra.mxu0 %v2207_v29  ;;  %775 = vmatprep.subr.bf16.mxu1 %v2211_v34  ;;  %v2739_v18 = vrot.slane %v1934_v14, %v2545_v39  ;;  %v2259_v29 = vld [vmem:[%s3020_s1 + $0x324] ss:$8 sps:$4 sm:$0xff]   ;;  %v2260_v34 = vld [vmem:[%s3020_s1 + $0x30] ss:$8 sps:$4 sm:$0xff]  }
  0x32   : > { %1166 = vmatprep.subr.bf16.mxu0 %v2215_v35  ;;  %v2263_v35 = vld [vmem:[%s3020_s1 + $0x330] ss:$8 sps:$4 sm:$0xff]   ;;  %v2304_v14 = vld [vmem:[%s3020_s1 + $0xa4] ss:$8 sps:$4 sm:$0xff]  }
  0x33   : > { %v872_v24 = vcombine.high %v2739_v18, %v2731_v15 }
  0x34   : > { %776 = vmatpush1.bf16.msra.mxu1 %v2216_v38  ;;  %v2271_v38 = vld [vmem:[%s3020_s1 + $0x344] ss:$8 sps:$4 sm:$0xff]  }
  0x35   : > { %1167 = vmatpush1.bf16.msra.mxu0 %v2213_v36  ;;  %777 = vmatprep.subr.bf16.mxu1 %v2217_v42  ;;  %v2268_v36 = vld [vmem:[%s3020_s1 + $0x44] ss:$8 sps:$4 sm:$0xff]   ;;  %v2274_v42 = vld [vmem:[%s3020_s1 + $0x54] ss:$8 sps:$4 sm:$0xff]  }
  0x36   : > { %1168 = vmatprep.subr.bf16.mxu0 %v2221_v43  ;;  %v2277_v43 = vld [vmem:[%s3020_s1 + $0x354] ss:$8 sps:$4 sm:$0xff]  }
  0x38   : > { %778 = vmatpush1.bf16.msra.mxu1 %v2222_v47  ;;  %v2283_v47 = vld [vmem:[%s3020_s1 + $0x364] ss:$8 sps:$4 sm:$0xff]  }
  0x39   : > { %1169 = vmatpush1.bf16.msra.mxu0 %v2219_v49  ;;  %779 = vmatprep.subr.bf16.mxu1 %v2223_v50  ;;  %v2278_v49 = vld [vmem:[%s3020_s1 + $0x60] ss:$8 sps:$4 sm:$0xff]   ;;  %v1986_v50 = vcombine.low %v242_v48, %v242_v48 }
  0x3a   : > { %1170 = vmatprep.subr.bf16.mxu0 %v2227_v56  ;;  %v2286_v56 = vld [vmem:[%s3020_s1 + $0x74] ss:$8 sps:$4 sm:$0xff]  }
  0x3b   : > { %v1207_v58 = vshrl.u32 %v1986_v50, 16  ;;  %v1213_v60 = vrot.slane %v1986_v50, 1 }
  0x3c   : > { %780 = vmatpush1.bf16.msra.mxu1 %v2228_v59  ;;  %v1209_v59 = vshll.u32 %v1986_v50, 16  ;;  %v2353_v50 = vld [vmem:[%s3020_s1 + $0x444] ss:$8 sps:$4 sm:$0xff]  }
  0x3d   : > { %1171 = vmatpush1.bf16.msra.mxu0 %v2225_v61  ;;  %781 = vmatprep.subr.bf16.mxu1 %v2229_v62  ;;  %v2284_v61 = vld [vmem:[%s3020_s1 + $0x70] ss:$8 sps:$4 sm:$0xff]   ;;  %v1228_v1 = vrot.slane %v1213_v60, %v2545_v39  ;;  %v2362_v60 = vld [vmem:[%s3020_s1 + $0x474] ss:$8 sps:$4 sm:$0xff]  }
  0x3e   : > { %1172 = vmatprep.subr.bf16.mxu0 %v2233_v0  ;;  %v1211_v62 = vrot.slane %v1209_v59, 1  ;;  %v2292_v0 = vld [vmem:[%s3020_s1 + $0x84] ss:$8 sps:$4 sm:$0xff]   ;;  %v2357_v59 = vld [vmem:[%s3020_s1 + $0x460] ss:$8 sps:$4 sm:$0xff]  }
  0x3f   : > { %v2036_v5 = vcombine.low %v2582_v55, %v1228_v1  ;;  %v2301_v55 = vld [vmem:[%s3020_s1 + $0x394] ss:$8 sps:$4 sm:$0xff]  }
  0x40   : > { %782 = vmatpush1.bf16.msra.mxu1 %v2234_v3  ;;  %v2295_v3 = vld [vmem:[%s3020_s1 + $0x384] ss:$8 sps:$4 sm:$0xff]   ;;  %v1212_v4 = vor.u32 %v1211_v62, %v1207_v58 }
  0x41   : > { %1173 = vmatpush1.bf16.msra.mxu0 %v2231_v6  ;;  %783 = vmatprep.subr.bf16.mxu1 %v2235_v7  ;;  %v2290_v6 = vld [vmem:[%s3020_s1 + $0x80] ss:$8 sps:$4 sm:$0xff]   ;;  %v2853_v51 = vrot.slane %v2036_v5, %v2545_v39  ;;  %v2359_v58 = vld [vmem:[%s3020_s1 + $0x464] ss:$8 sps:$4 sm:$0xff]  }
  0x42   : > { %1174 = vmatprep.subr.bf16.mxu0 %v2239_v9  ;;  %v1214_v7 = vcombine.low %v242_v48, %v1212_v4  ;;  %v2298_v9 = vld [vmem:[%s3020_s1 + $0x94] ss:$8 sps:$4 sm:$0xff]   ;;  %v2345_v48 = vld [vmem:[%s3020_s1 + $0x420] ss:$8 sps:$4 sm:$0xff]  }
  0x44   : > { %784 = vmatpush1.bf16.msra.mxu1 %v2240_v54  ;;  %v1221_v52 = vrot.slane %v1214_v7, %v2545_v39  ;;  %v1297_v54 = vcombine.low %v2721_v11, %v2853_v51 }
  0x45   : > { %1175 = vmatpush1.bf16.msra.mxu0 %v2237_v12  ;;  %1117 = vmatprep.subr.bf16.mxu1 %v2243_v13  ;;  %v2299_v13 = vld [vmem:[%s3020_s1 + $0x390] ss:$8 sps:$4 sm:$0xff]  }
  0x46   : > { %1541 = vmatprep.subr.bf16.mxu0 %v2246_v16  ;;  %v2035_v12 = vcombine.low %v2648_v37, %v1221_v52  ;;  %v2307_v16 = vld [vmem:[%s3020_s1 + $0x3a4] ss:$8 sps:$4 sm:$0xff]   ;;  %v2302_v37 = vld [vmem:[%s3020_s1 + $0xa0] ss:$8 sps:$4 sm:$0xff]  }
  0x47   : > { %786 = vmatmul.mubr.bf16.vlgmr.msra.gmra.mrb[0].mxu1 %v507_v17 }
  0x48   : > { %1118 = vmatpush1.bf16.msra.mxu1 %v2241_v19  ;;  %1193 = vmatmul.mubr.bf16.vlgmr.msra.gmra.mrb[4].mxu0 %v873_v20  ;;  %v1287_v17 = vrot.slane %v2035_v12, %v2545_v39  ;;  %v2305_v20 = vld [vmem:[%s3020_s1 + $0x3a0] ss:$8 sps:$4 sm:$0xff]   ;;  %v2313_v39 = vld [vmem:[%s3020_s1 + $0x3b4] ss:$8 sps:$4 sm:$0xff]  }
  0x49   : > { %1542 = vmatpush1.bf16.msra.mxu0 %v2244_v21  ;;  %1119 = vmatprep.subr.bf16.mxu1 %v2250_v22  ;;  %v2310_v21 = vld [vmem:[%s3020_s1 + $0xb4] ss:$8 sps:$4 sm:$0xff]   ;;  %v2308_v22 = vld [vmem:[%s3020_s1 + $0xb0] ss:$8 sps:$4 sm:$0xff]  }
  0x4a   : > { %1543 = vmatprep.subr.bf16.mxu0 %v2253_v23  ;;  %1149 = vmatprep.mubr.bf16.mxu1 %v872_v24  ;;  %v1296_v19 = vcombine.high %v2731_v15, %v1287_v17  ;;  %v2311_v23 = vld [vmem:[%s3020_s1 + $0x3b0] ss:$8 sps:$4 sm:$0xff]   ;;  %v2316_v24 = vld [vmem:[%s3020_s1 + $0xc4] ss:$8 sps:$4 sm:$0xff]  }
  0x4c   : > { %1120 = vmatpush1.bf16.msra.mxu1 %v2248_v25  ;;  %1573 = vmatprep.mubr.bf16.mxu0 %v1296_v19  ;;  %v2319_v25 = vld [vmem:[%s3020_s1 + $0x3c4] ss:$8 sps:$4 sm:$0xff]  }
  0x4d   : > { %1544 = vmatpush1.bf16.msra.mxu0 %v2251_v26  ;;  %1121 = vmatprep.subr.bf16.mxu1 %v2256_v27  ;;  %v2314_v26 = vld [vmem:[%s3020_s1 + $0xc0] ss:$8 sps:$4 sm:$0xff]  }
  0x4e   : > { %1545 = vmatprep.subr.bf16.mxu0 %v2259_v29  ;;  %v2317_v27 = vld [vmem:[%s3020_s1 + $0x3c0] ss:$8 sps:$4 sm:$0xff]   ;;  %v2322_v29 = vld [vmem:[%s3020_s1 + $0xd4] ss:$8 sps:$4 sm:$0xff]  }
  0x50   : > { %1122 = vmatpush1.bf16.msra.mxu1 %v2254_v30  ;;  %v2325_v30 = vld [vmem:[%s3020_s1 + $0x3d4] ss:$8 sps:$4 sm:$0xff]  }
  0x51   : > { %1546 = vmatpush1.bf16.msra.mxu0 %v2257_v31  ;;  %1123 = vmatprep.subr.bf16.mxu1 %v2262_v32  ;;  %v2320_v31 = vld [vmem:[%s3020_s1 + $0xd0] ss:$8 sps:$4 sm:$0xff]  }
  0x52   : > { %1547 = vmatprep.subr.bf16.mxu0 %v2265_v33  ;;  %v2323_v32 = vld [vmem:[%s3020_s1 + $0x3d0] ss:$8 sps:$4 sm:$0xff]   ;;  %v2328_v33 = vld [vmem:[%s3020_s1 + $0xe4] ss:$8 sps:$4 sm:$0xff]  }
  0x54   : > { %1124 = vmatpush1.bf16.msra.mxu1 %v2260_v34  ;;  %v2331_v34 = vld [vmem:[%s3020_s1 + $0x3e4] ss:$8 sps:$4 sm:$0xff]  }
  0x55   : > { %1548 = vmatpush1.bf16.msra.mxu0 %v2263_v35  ;;  %1125 = vmatprep.subr.bf16.mxu1 %v2268_v36  ;;  %v2326_v35 = vld [vmem:[%s3020_s1 + $0xe0] ss:$8 sps:$4 sm:$0xff]  }
  0x56   : > { %1549 = vmatprep.subr.bf16.mxu0 %v2271_v38  ;;  %v2329_v36 = vld [vmem:[%s3020_s1 + $0x3e0] ss:$8 sps:$4 sm:$0xff]   ;;  %v2334_v38 = vld [vmem:[%s3020_s1 + $0xf4] ss:$8 sps:$4 sm:$0xff]  }
  0x58   : > { %1126 = vmatpush1.bf16.msra.mxu1 %v2266_v40  ;;  %v2337_v40 = vld [vmem:[%s3020_s1 + $0x3f4] ss:$8 sps:$4 sm:$0xff]  }
  0x59   : > { %1550 = vmatpush1.bf16.msra.mxu0 %v2269_v41  ;;  %1127 = vmatprep.subr.bf16.mxu1 %v2274_v42  ;;  %v2332_v41 = vld [vmem:[%s3020_s1 + $0xf0] ss:$8 sps:$4 sm:$0xff]  }
  0x5a   : > { %1551 = vmatprep.subr.bf16.mxu0 %v2277_v43  ;;  %v2335_v42 = vld [vmem:[%s3020_s1 + $0x3f0] ss:$8 sps:$4 sm:$0xff]   ;;  %v2341_v43 = vld [vmem:[%s3020_s1 + $0x404] ss:$8 sps:$4 sm:$0xff]  }
  0x5c   : > { %1128 = vmatpush1.bf16.msra.mxu1 %v2272_v44  ;;  %v871_v44 = vcombine.low %v2739_v18, %v2731_v15  ;;  %v2342_v18 = vld [vmem:[%s3020_s1 + $0x410] ss:$8 sps:$4 sm:$0xff]  }
  0x5d   : > { %1552 = vmatpush1.bf16.msra.mxu0 %v2275_v45  ;;  %1129 = vmatprep.subr.bf16.mxu1 %v2280_v46  ;;  %v1295_v45 = vcombine.low %v2731_v15, %v1287_v17  ;;  %v2339_v46 = vld [vmem:[%s3020_s1 + $0x400] ss:$8 sps:$4 sm:$0xff]   ;;  %v2347_v15 = vld [vmem:[%s3020_s1 + $0x424] ss:$8 sps:$4 sm:$0xff]  }
  0x5e   : > { %1553 = vmatprep.subr.bf16.mxu0 %v2283_v47  ;;  %v2344_v47 = vld [vmem:[%s3020_s1 + $0x414] ss:$8 sps:$4 sm:$0xff]   ;;  %v1631_v17 = vld [vmem:[%s3021_s2] sm:$0x3] }
  0x60   : > { %1130 = vmatpush1.bf16.msra.mxu1 %v2278_v49  ;;  %v2350_v49 = vld [vmem:[%s3020_s1 + $0x434] ss:$8 sps:$4 sm:$0xff]  }
  0x61   : > { %1554 = vmatpush1.bf16.msra.mxu0 %v2281_v53  ;;  %1131 = vmatprep.subr.bf16.mxu1 %v2286_v56  ;;  %v2351_v53 = vld [vmem:[%s3020_s1 + $0x440] ss:$8 sps:$4 sm:$0xff]   ;;  %v2356_v56 = vld [vmem:[%s3020_s1 + $0x454] ss:$8 sps:$4 sm:$0xff]  }
  0x62   : > { %1555 = vmatprep.subr.bf16.mxu0 %v2289_v57  ;;  %v2354_v57 = vld [vmem:[%s3020_s1 + $0x450] ss:$8 sps:$4 sm:$0xff]  }
  0x64   : > { %1132 = vmatpush1.bf16.msra.mxu1 %v2284_v61  ;;  %v2360_v61 = vld [vmem:[%s3020_s1 + $0x470] ss:$8 sps:$4 sm:$0xff]  }
  0x65   : > { %1556 = vmatpush1.bf16.msra.mxu0 %v2287_v63  ;;  %1133 = vmatprep.subr.bf16.mxu1 %v2292_v0 }
  0x66   : > { %1557 = vmatprep.subr.bf16.mxu0 %v2295_v3 }
  0x68   : > { %1134 = vmatpush1.bf16.msra.mxu1 %v2290_v6 }
  0x69   : > { %1558 = vmatpush1.bf16.msra.mxu0 %v2293_v8  ;;  %1135 = vmatprep.subr.bf16.mxu1 %v2298_v9 }
  0x6a   : > { %1559 = vmatprep.subr.bf16.mxu0 %v2301_v55 }
  0x6c   : > { %1136 = vmatpush1.bf16.msra.mxu1 %v2296_v10 }
  0x6d   : > { %1560 = vmatpush1.bf16.msra.mxu0 %v2299_v13  ;;  %1137 = vmatprep.subr.bf16.mxu1 %v2304_v14 }
  0x6e   : > { %1561 = vmatprep.subr.bf16.mxu0 %v2307_v16  ;;  %v1635_v16 = vsub.s32 0, %v2514_v28 }
  0x70   : > { %1138 = vmatpush1.bf16.msra.mxu1 %v2302_v37  ;;  %v1639_v37 = vsub.s32 1, %v2514_v28  ;;  %v1636_v19 = vrot.slane %v1631_v17, %v1635_v16 }
  0x71   : > { %1562 = vmatpush1.bf16.msra.mxu0 %v2305_v20  ;;  %1139 = vmatprep.subr.bf16.mxu1 %v2310_v21 }
  0x72   : > { %1563 = vmatprep.subr.bf16.mxu0 %v2313_v39  ;;  %v1640_v21 = vrot.slane %v1631_v17, %v1639_v37 }
  0x74   : > { %1140 = vmatpush1.bf16.msra.mxu1 %v2308_v22 }
  0x75   : > { %1564 = vmatpush1.bf16.msra.mxu0 %v2311_v23  ;;  %1141 = vmatprep.subr.bf16.mxu1 %v2316_v24 }
  0x76   : > { %1565 = vmatprep.subr.bf16.mxu0 %v2319_v25 }
  0x78   : > { %1142 = vmatpush1.bf16.msra.mxu1 %v2314_v26 }
  0x79   : > { %1566 = vmatpush1.bf16.msra.mxu0 %v2317_v27  ;;  %1143 = vmatprep.subr.bf16.mxu1 %v2322_v29 }
  0x7a   : > { %1567 = vmatprep.subr.bf16.mxu0 %v2325_v30 }
  0x7c   : > { %1144 = vmatpush1.bf16.msra.mxu1 %v2320_v31 }
  0x7d   : > { %1568 = vmatpush1.bf16.msra.mxu0 %v2323_v32  ;;  %1145 = vmatprep.subr.bf16.mxu1 %v2328_v33 }
  0x7e   : > { %1569 = vmatprep.subr.bf16.mxu0 %v2331_v34 }
  0x80   : > { %1146 = vmatpush1.bf16.msra.mxu1 %v2326_v35 }
  0x81   : > { %1570 = vmatpush1.bf16.msra.mxu0 %v2329_v36  ;;  %1147 = vmatprep.subr.bf16.mxu1 %v2334_v38 }
  0x82   : > { %1571 = vmatprep.subr.bf16.mxu0 %v2337_v40 }
  0x84   : > { %1148 = vmatpush1.bf16.msra.mxu1 %v2332_v41 }
  0x85   : > { %1572 = vmatpush1.bf16.msra.mxu0 %v2335_v42 }
  0x86   : > { %1584 = vmatprep.subr.bf16.mxu0 %v2341_v43 }
  0x87   : > { %1150 = vmatmul.mubr.bf16.vlgmr.msra.gmra.mrb[4].mxu1 %v871_v44 }
  0x88   : > { %1574 = vmatmul.mubr.bf16.vlgmr.msra.gmra.mrb[4].mxu0 %v1295_v45 }
  0x89   : > { %1585 = vmatpush1.bf16.msra.mxu0 %v2339_v46  ;;  %1616 = vmatprep.mubr.bf16.mxu0 %v2387_v2  ;;  %v2348_v2 = vld [vmem:[%s3020_s1 + $0x430] ss:$8 sps:$4 sm:$0xff]  }
  0x8a   : > { %1586 = vmatprep.subr.bf16.mxu0 %v2344_v47 }
  0x8d   : > { %1587 = vmatpush1.bf16.msra.mxu0 %v2342_v18 }
  0x8e   : > { %1588 = vmatprep.subr.bf16.mxu0 %v2347_v15 }
  0x91   : > { %1589 = vmatpush1.bf16.msra.mxu0 %v2345_v48 }
  0x92   : > { %1590 = vmatprep.subr.bf16.mxu0 %v2350_v49 }
  0x95   : > { %1591 = vmatpush1.bf16.msra.mxu0 %v2348_v2 }
  0x96   : > { %1592 = vmatprep.subr.bf16.mxu0 %v2353_v50 }
  0x99   : > { %1593 = vmatpush1.bf16.msra.mxu0 %v2351_v53 }
  0x9a   : > { %1594 = vmatprep.subr.bf16.mxu0 %v2356_v56 }
  0x9d   : > { %1595 = vmatpush1.bf16.msra.mxu0 %v2354_v57 }
  0x9e   : > { %1596 = vmatprep.subr.bf16.mxu0 %v2359_v58 }
  0xa1   : > { %1597 = vmatpush1.bf16.msra.mxu0 %v2357_v59 }
  0xa2   : > { %1598 = vmatprep.subr.bf16.mxu0 %v2362_v60 }
  0xa5   : > { %1599 = vmatpush1.bf16.msra.mxu0 %v2360_v61 }
  0xa8   : > { %1617 = vmatmul.mubr.bf16.vlgmr.msra.gmra.mrb[4].mxu0 %v1297_v54 }
  0xfb   : > { %v830_v62 = vpop.f32.mrb[0].mxu0 }
  0xfc   : > { %v832_v63 = vpop.f32.mrb[1].mxu0 }
  0xfd   : > { %v834_v0 = vpop.f32.mrb[2].mxu0 }
  0xfe   : > { %v836_v1 = vpop.f32.mrb[3].mxu0 }
 0x11a   : > { %v787_v3 = vpop.f32.mrb[0].mxu1 }
 0x11b   : > { %v831_v4 = vadd.f32 %v830_v62, %v787_v3  ;;  %v789_v5 = vpop.f32.mrb[1].mxu1 }
 0x11c   : > { %v833_v6 = vadd.f32 %v832_v63, %v789_v5  ;;  %v791_v7 = vpop.f32.mrb[2].mxu1 }
 0x11d   : > { %v835_v8 = vadd.f32 %v834_v0, %v791_v7  ;;  %v793_v9 = vpop.f32.mrb[3].mxu1 }
 0x11e   : > { %v837_v55 = vadd.f32 %v836_v1, %v793_v9 }
 0x15a   : > { %v1151_v52 = vpop.f32.mrb[4].mxu1 }
 0x15b   : > { %v1152_v10 = vadd.f32 %v1151_v52, %v831_v4  ;;  %v1153_v12 = vpop.f32.mrb[5].mxu1 }
 0x15c   : > { %v1154_v13 = vadd.f32 %v1153_v12, %v833_v6  ;;  %v1155_v14 = vpop.f32.mrb[6].mxu1 }
 0x15d   : > { %v1156_v11 = vadd.f32 %v1155_v14, %v835_v8  ;;  %v1157_v51 = vpop.f32.mrb[7].mxu1 }
 0x15e   : > { %v1158_v54 = vadd.f32 %v1157_v51, %v837_v55 }
 0x17b   : > { %v1618_v20 = vpop.f32.mrb[4].mxu0 }
 0x17c   : > { %v2096_v39 = vadd.f32 %v1618_v20, %v1152_v10  ;;  %v1620_v22 = vpop.f32.mrb[5].mxu0 }
 0x17d   : > { %v2099_v23 = vadd.f32 %v1620_v22, %v1154_v13  ;;  %v1622_v24 = vpop.f32.mrb[6].mxu0 }
 0x17e   : > { %v1643_v25 = vadd.f32 %v2096_v39, %v1636_v19  ;;  %v2102_v26 = vadd.f32 %v1622_v24, %v1156_v11  ;;  %v1624_v27 = vpop.f32.mrb[7].mxu0 }
 0x17f   : > { %v1644_v29 = vadd.f32 %v2099_v23, %v1640_v21  ;;  %v2105_v30 = vadd.f32 %v1624_v27, %v1158_v54 }
 0x180   : > { %v1647_v31 = vmax.f32 %v1643_v25, 0.0  ;;  %v1645_v32 = vadd.f32 %v2102_v26, %v1636_v19 }
 0x181   : > { %v1648_v33 = vmax.f32 %v1644_v29, 0.0  ;;  %v1646_v34 = vadd.f32 %v2105_v30, %v1640_v21 }
 0x182   : > { %v1649_v28 = vmax.f32 %v1645_v32, 0.0  ;;  %v1679_v38 = vmul.f32 %v1647_v31, %v1647_v31 }
 0x183   : > { %v2092_v35 = vpack.c.bf16 %v1648_v33, %v1647_v31  ;;  %v1650_v36 = vmax.f32 %v1646_v34, 0.0  ;;  %v1680_v42 = vmul.f32 %v1648_v33, %v1648_v33 }
 0x184   : > { %v1665_v40 = vadd.f32 %v1649_v28, %v1647_v31  ;;  %v1681_v41 = vmul.f32 %v1649_v28, %v1649_v28 }
 0x185   : > { %1663 = vst [vmem:[%s226_s25] sm:$0xff] %v2092_v35  ;;  %v2093_v43 = vpack.c.bf16 %v1650_v36, %v1649_v28  ;;  %v1672_v44 = vadd.f32 %v1650_v36, %v1648_v33  ;;  %v1682_v45 = vmul.f32 %v1650_v36, %v1650_v36 }
 0x186   : > { %v1666_v46 = vrot.slane %v1665_v40, 4  ;;  %v1683_v47 = vadd.f32 %v1681_v41, %v1679_v38 }
 0x187   : > { %1664 = vst [vmem:[%s226_s25 + $0x8] sm:$0xff] %v2093_v43  ;;  %v1673_v18 = vrot.slane %v1672_v44, 4  ;;  %v1690_v15 = vadd.f32 %v1682_v45, %v1680_v42 }
 0x188   : > { %v1667_v48 = vadd.f32 %v1666_v46, %v1665_v40  ;;  %v1684_v49 = vrot.slane %v1683_v47, 4 }
 0x189   : > { %v1674_v2 = vadd.f32 %v1673_v18, %v1672_v44  ;;  %v1691_v50 = vrot.slane %v1690_v15, 4 }
 0x18a   : > { %v1668_v53 = vrot.slane %v1667_v48, 2  ;;  %v1685_v56 = vadd.f32 %v1684_v49, %v1683_v47 }
 0x18b   : > { %v1675_v57 = vrot.slane %v1674_v2, 2  ;;  %v1692_v58 = vadd.f32 %v1691_v50, %v1690_v15 }
 0x18c   : > { %v1669_v59 = vadd.f32 %v1668_v53, %v1667_v48  ;;  %v1686_v60 = vrot.slane %v1685_v56, 2 }
 0x18d   : > { %v1676_v61 = vadd.f32 %v1675_v57, %v1674_v2  ;;  %v1693_v62 = vrot.slane %v1692_v58, 2 }
 0x18e   : > { %v1670_v63 = vrot.slane %v1669_v59, 1  ;;  %v1687_v0 = vadd.f32 %v1686_v60, %v1685_v56 }
 0x18f   : > { %v1677_v1 = vrot.slane %v1676_v61, 1  ;;  %v1694_v3 = vadd.f32 %v1693_v62, %v1692_v58 }
 0x190   : > { %v1688_v4 = vrot.slane %v1687_v0, 1  ;;  %v1671_v6 = vadd.f32 %v1670_v63, %v1669_v59 }
 0x191   : > { %v1695_v5 = vrot.slane %v1694_v3, 1  ;;  %v1678_v8 = vadd.f32 %v1677_v1, %v1676_v61 }
 0x192   : > { %v1689_v7 = vadd.f32 %v1688_v4, %v1687_v0 }
 0x193   : > { %v1696_v9 = vadd.f32 %v1695_v5, %v1694_v3 }
 0x194   : > { %v1698_v55 = vsel %vm1697_vm0, %v1671_v6, %v1689_v7 }
 0x195   : > { %v1699_v52 = vsel %vm1697_vm0, %v1678_v8, %v1696_v9 }
 0x196   : > { %v1702_v10 = vcombine.low %v1698_v55, %v1699_v52 }
 0x198   : > { %2087 = vst.sshfl [vmem:[%s234_s6] sm:$0x33 pattern:$0x76325410] %v1702_v10 }
 0x199 PF: > { %s15_s17 = sadd.s32 1, %s2385_s17   ;;  %s3024_s15 = smov %s2381_s16 }
 0x19a   : > { %p12_p6 = scmp.ge.s32.totalorder %s15_s17, 4   ;;  %s3025_s16 = smov %s3027_s18 }
 0x19c   :  { %14 = sbr.rel (!%p12_p6) target bundleno = 2 (0x2), region = 76 }

</bundles_post_ra>
